<compile_context>
chip_gen: v7x
topology: tpu7x:2x2x1
jax: 0.10.0
libtpu: 0.0.40
codegen_flags: <defaults>
</compile_context>

<pallas_src>
import functools
import math
from dataclasses import dataclass

import jax
import jax.numpy as jnp
from jax import lax
from jax.experimental import pallas as pl
from jax.experimental.pallas import tpu as pltpu

LN_EPS = 1e-5                 # PyTorch nn.LayerNorm default
MXU_DTYPE = jnp.bfloat16      # matmul-operand dtype (f32 accumulation on MXU)


# ------------------------------------------------------------------ kernel math

def _ln(x, gamma, beta):
    mu = jnp.mean(x, axis=-1, keepdims=True)
    var = jnp.mean((x - mu) ** 2, axis=-1, keepdims=True)   # biased, like torch
    return (x - mu) * jax.lax.rsqrt(var + LN_EPS) * gamma + beta


def _mxu(a, b):
    """bf16 operands on the MXU, f32 accumulation."""
    return jnp.dot(a.astype(MXU_DTYPE), b.astype(MXU_DTYPE),
                   preferred_element_type=jnp.float32)


def _ff_sublayer(x, ln_g, ln_b, w1_ref, b1_ref, w2_ref, b2_ref):
    """x + W2(relu(W1(LN(x))))  (ResidualConnection around FF; dropout = identity).

    Weights are loaded lazily from their refs at point of use.
    """
    y = _ln(x, ln_g, ln_b)
    h = jnp.maximum(_mxu(y, w1_ref[...]) + b1_ref[...], 0.0)
    return x + _mxu(h, w2_ref[...]) + b2_ref[...]


def _mha_sublayer(x, ln_g, ln_b, wqkv_ref, bqkv_ref, wo_ref, bo_ref, *,
                  ctx_ref, num_heads, Bt, S, D):
    """x + Wo(MultiHeadSelfAttention(LN(x))) on a flattened (Bt*S, D) row slab.

    1/sqrt(dk) is already folded into the Q columns of w_qkv / b_qkv.
    Per-head contexts are scattered into the (Bt*S, D) VMEM scratch slab
    `ctx_ref` at lane offset h*dk, then ONE K=D output-projection matmul runs.
    """
    dk = D // num_heads
    y = _ln(x, ln_g, ln_b)
    qkv = _mxu(y, wqkv_ref[...]) + bqkv_ref[...]          # (M, 3D): fused Q|K|V

    for bidx in range(Bt):                                 # static loops: Bt, heads small
        r0 = bidx * S
        for h in range(num_heads):
            c0 = h * dk
            q = qkv[r0:r0 + S, c0:c0 + dk].astype(MXU_DTYPE)
            k = qkv[r0:r0 + S, D + c0:D + c0 + dk].astype(MXU_DTYPE)
            v = qkv[r0:r0 + S, 2 * D + c0:2 * D + c0 + dk].astype(MXU_DTYPE)
            # q @ k^T without an explicit transpose: contract last dims of both.
            s = lax.dot_general(q, k, (((1,), (1,)), ((), ())),
                                preferred_element_type=jnp.float32)   # (S, S) f32
            s = s - jnp.max(s, axis=-1, keepdims=True)
            p = jnp.exp(s)
            p = p * pl.reciprocal(jnp.sum(p, axis=-1, keepdims=True), approx=True)
            ctx = jnp.dot(p.astype(MXU_DTYPE), v,
                          preferred_element_type=jnp.float32)          # (S, dk) f32
            ctx_ref[r0:r0 + S, c0:c0 + dk] = ctx                       # lane-offset store

    # Single wide output projection: K = D instead of num_heads matmuls with K = dk.
    return x + _mxu(ctx_ref[...], wo_ref[...]) + bo_ref[...]


def _apply_sublayer(x, kind, heads, ln_g, ln_b, p_refs, ctx_ref, Bt, S, D):
    if kind == "ff":
        return _ff_sublayer(x, ln_g, ln_b, *p_refs)
    return _mha_sublayer(x, ln_g, ln_b, *p_refs,
                         ctx_ref=ctx_ref, num_heads=heads, Bt=Bt, S=S, D=D)


def encoder_stack_kernel(*refs, block_meta, Bt, S, D):
    """Whole encoder stack: every block's two sublayers + the shared output
    LayerNorm, fused.  One grid step handles one (Bt, S, D) batch tile."""
    n_blocks = len(block_meta)
    x_ref = refs[0]
    pos = 1
    block_refs = []
    for _ in range(n_blocks):
        block_refs.append(refs[pos:pos + 12])
        pos += 12
    norm_g_ref, norm_b_ref = refs[pos], refs[pos + 1]
    pos += 2
    out_refs = refs[pos:pos + n_blocks]
    pos += n_blocks
    ctx_ref = refs[pos]                                   # (Bt*S, D) f32 VMEM scratch

    M = Bt * S
    x = x_ref[...].astype(jnp.float32).reshape(M, D)      # flatten rows: bigger matmul M
    norm_g = norm_g_ref[...]
    norm_b = norm_b_ref[...]

    for bi, (kind1, h1, kind2, h2) in enumerate(block_meta):
        br = block_refs[bi]
        x = _apply_sublayer(x, kind1, h1, br[0][...], br[1][...], br[2:6],
                            ctx_ref, Bt, S, D)
        x = _apply_sublayer(x, kind2, h2, br[6][...], br[7][...], br[8:12],
                            ctx_ref, Bt, S, D)
        out_refs[bi][...] = _ln(x, norm_g, norm_b).reshape(Bt, S, D).astype(out_refs[bi].dtype)


# ------------------------------------------------------------------ wrapper

def _sub_params(sub):
    if sub["kind"] == "ff":
        return [sub["w1"], sub["b1"], sub["w2"], sub["b2"]]
    return [sub["w_qkv"], sub["b_qkv"], sub["wo"], sub["bo"]]


def encoder_stack(x, blocks, norm_g, norm_b):
    """One fused pallas_call for the whole block stack.
    Returns list of per-block norm(x) outputs."""
    B, S, D = x.shape

    # Batch-tile size: largest divisor of B with Bt*S <= 128 rows per step
    # (fills MXU M without blowing up the in-kernel row slabs).
    Bt = 1
    for cand in range(1, B + 1):
        if B % cand == 0 and cand * S <= 128:
            Bt = cand
    M = Bt * S

    block_meta = []
    param_list = []
    for blk in blocks:
        block_meta.append((blk["layer1"]["kind"], blk["layer1"].get("h", 0),
                           blk["layer2"]["kind"], blk["layer2"].get("h", 0)))
        param_list += ([blk["ln1_g"], blk["ln1_b"]] + _sub_params(blk["layer1"]) +
                       [blk["ln2_g"], blk["ln2_b"]] + _sub_params(blk["layer2"]))
    param_list += [norm_g, norm_b]

    kern = functools.partial(encoder_stack_kernel,
                             block_meta=tuple(block_meta), Bt=Bt, S=S, D=D)

    x_spec = pl.BlockSpec((Bt, S, D), lambda i: (i, 0, 0))
    param_specs = [pl.BlockSpec(p.shape, lambda i, nd=p.ndim: (0,) * nd)
                   for p in param_list]
    out_shape = tuple(jax.ShapeDtypeStruct((B, S, D), x.dtype) for _ in blocks)
    out_specs = tuple(pl.BlockSpec((Bt, S, D), lambda i: (i, 0, 0)) for _ in blocks)

    # TODO(synk): at production widths (d_embed=512, d_ff=1024, long S) add row
    # tiling + flash-style KV tiling for the (S,S) scores and set
    # vmem_limit_bytes with headroom for v7x's 64 MiB VMEM; also split the grid
    # over a row-tile axis when B < 2 so both v7x TensorCores get work.
    outs = pl.pallas_call(
        kern,
        grid=(B // Bt,),
        out_shape=out_shape,
        in_specs=[x_spec] + param_specs,
        out_specs=out_specs,
        scratch_shapes=[pltpu.VMEM((M, D), jnp.float32)],
        compiler_params=pltpu.CompilerParams(dimension_semantics=("parallel",)),
    )(x, *param_list)
    return list(outs)


# ------------------------------------------------------------------ model setup

@dataclass
class ModelConfig:
    encoder_vocab_size: int
    decoder_vocab_size: int
    d_embed: int
    d_ff: int
    h: int
    N_encoder: int
    N_decoder: int
    max_seq_len: int
    dropout: float


@dataclass
class GeneEncoding:
    elist: list
    ne: int


def _linear_init(key, fan_in, fan_out):
    kw, kb = jax.random.split(key)
    bound = 1.0 / math.sqrt(fan_in)
    w = jax.random.uniform(kw, (fan_in, fan_out), jnp.float32, -bound, bound)
    b = jax.random.uniform(kb, (1, fan_out), jnp.float32, -bound, bound)
    return w, b


def _make_ff(key, d_embed, hidden):
    k1, k2 = jax.random.split(key)
    w1, b1 = _linear_init(k1, d_embed, hidden)
    w2, b2 = _linear_init(k2, hidden, d_embed)
    return {"kind": "ff",
            "w1": w1.astype(MXU_DTYPE), "b1": b1,
            "w2": w2.astype(MXU_DTYPE), "b2": b2}


def _make_mha(key, d_embed, num_heads):
    ks = jax.random.split(key, 4)
    wq, bq = _linear_init(ks[0], d_embed, d_embed)
    wk, bk = _linear_init(ks[1], d_embed, d_embed)
    wv, bv = _linear_init(ks[2], d_embed, d_embed)
    wo, bo = _linear_init(ks[3], d_embed, d_embed)
    dk = d_embed // num_heads
    scale = 1.0 / math.sqrt(dk)
    # Fold the 1/sqrt(dk) softmax scale into the Q projection (weights + bias).
    wq = wq * scale
    bq = bq * scale
    # Fused Q|K|V projection: one (D, 3D) matmul inside the kernel.
    w_qkv = jnp.concatenate([wq, wk, wv], axis=1).astype(MXU_DTYPE)
    b_qkv = jnp.concatenate([bq, bk, bv], axis=1)
    return {"kind": "mha", "h": num_heads,
            "w_qkv": w_qkv, "b_qkv": b_qkv,
            "wo": wo.astype(MXU_DTYPE), "bo": bo}


# TODO(synk): original module hardcodes 512 / 1024 FF widths; scaled to 256 / 512
# for the small-shape demo (structure identical).
_FF_WIDTHS = (256, 512)


def _make_block(key, gene, cfg):
    bt = gene[0]
    k1, k2 = jax.random.split(key)
    if bt == 1:
        l1 = _make_ff(k1, cfg.d_embed, _FF_WIDTHS[gene[1]])
        l2 = _make_ff(k2, cfg.d_embed, _FF_WIDTHS[gene[2]])
    elif bt == 2:
        l1 = _make_ff(k1, cfg.d_embed, _FF_WIDTHS[gene[1]])
        l2 = _make_mha(k2, cfg.d_embed, 4 if gene[2] == 0 else 8)
    elif bt == 3:
        l1 = _make_mha(k1, cfg.d_embed, 4 if gene[1] == 0 else 8)
        l2 = _make_ff(k2, cfg.d_embed, _FF_WIDTHS[gene[2]])
    else:
        l1 = _make_mha(k1, cfg.d_embed, 4 if gene[1] == 0 else 8)
        l2 = _make_mha(k2, cfg.d_embed, 4 if gene[2] == 0 else 8)
    D = cfg.d_embed
    ones = jnp.ones((1, D), jnp.float32)
    zeros = jnp.zeros((1, D), jnp.float32)
    return {"layer1": l1, "layer2": l2,
            "ln1_g": ones, "ln1_b": zeros, "ln2_g": ones, "ln2_b": zeros}


def make_encoder_params(key, gene, cfg):
    keys = jax.random.split(key, gene.ne + 1)
    tok_embed = jax.random.normal(keys[0], (cfg.encoder_vocab_size, cfg.d_embed), jnp.float32)
    pos_embed = jnp.zeros((1, cfg.max_seq_len, cfg.d_embed), jnp.float32)  # torch.zeros param
    blocks = [_make_block(keys[i + 1], gene.elist[i], cfg) for i in range(gene.ne)]
    D = cfg.d_embed
    return {"tok_embed": tok_embed, "pos_embed": pos_embed, "blocks": blocks,
            "norm_g": jnp.ones((1, D), jnp.float32), "norm_b": jnp.zeros((1, D), jnp.float32)}


def encoder_ga_forward(params, input_ids):
    """Mirrors Encoder_GA.forward (inference, mask=None).
    Returns list of per-block norm outputs."""
    S = input_ids.shape[1]
    # TODO(synk): token-embedding gather stays in plain JAX (data-dependent row gather).
    x = jnp.take(params["tok_embed"], input_ids, axis=0)
    x = x + params["pos_embed"][:, :S, :]
    return encoder_stack(x, params["blocks"], params["norm_g"], params["norm_b"])


# ------------------------------------------------------------------ pure-JAX reference
# Mirrors the kernel's precision policy (bf16 MXU operands, f32 accumulation,
# f32 elementwise; 1/sqrt(dk) folded into the Q projection) so it checks the
# kernel math tightly; softmax division is exact.

def _mm_ref(a, w):
    return jnp.einsum("...d,dh->...h", a.astype(MXU_DTYPE), w.astype(MXU_DTYPE),
                      preferred_element_type=jnp.float32)


def _ref_forward(params, input_ids):
    S = input_ids.shape[1]
    x = jnp.take(params["tok_embed"], input_ids, axis=0) + params["pos_embed"][:, :S, :]

    def ln(v, g, b):
        mu = jnp.mean(v, -1, keepdims=True)
        var = jnp.mean((v - mu) ** 2, -1, keepdims=True)
        return (v - mu) * jax.lax.rsqrt(var + LN_EPS) * g + b

    def sub(v, s, g, b):
        y = ln(v, g, b)
        if s["kind"] == "ff":
            h = jnp.maximum(_mm_ref(y, s["w1"]) + s["b1"], 0.0)
            return v + _mm_ref(h, s["w2"]) + s["b2"]
        B, S_, D = y.shape
        nh = s["h"]; dk = D // nh
        qkv = _mm_ref(y, s["w_qkv"]) + s["b_qkv"]
        q, k, vv = qkv[..., :D], qkv[..., D:2 * D], qkv[..., 2 * D:]
        q = q.reshape(B, S_, nh, dk).transpose(0, 2, 1, 3)
        k = k.reshape(B, S_, nh, dk).transpose(0, 2, 1, 3)
        vv = vv.reshape(B, S_, nh, dk).transpose(0, 2, 1, 3)
        # NOTE: 1/sqrt(dk) is already folded into the Q projection params.
        sc = jnp.einsum("bhqd,bhkd->bhqk", q.astype(MXU_DTYPE), k.astype(MXU_DTYPE),
                        preferred_element_type=jnp.float32)
        p = jax.nn.softmax(sc, axis=-1)
        ctx = jnp.einsum("bhqk,bhkd->bhqd", p.astype(MXU_DTYPE), vv.astype(MXU_DTYPE),
                         preferred_element_type=jnp.float32)
        ctx = ctx.transpose(0, 2, 1, 3).reshape(B, S_, D)
        return v + _mm_ref(ctx, s["wo"]) + s["bo"]

    outs = []
    for blk in params["blocks"]:
        x = sub(x, blk["layer1"], blk["ln1_g"], blk["ln1_b"])
        x = sub(x, blk["layer2"], blk["ln2_g"], blk["ln2_b"])
        outs.append(ln(x, params["norm_g"], params["norm_b"]))
    return outs


# ------------------------------------------------------------------ main

if __name__ == "__main__":
    cfg = ModelConfig(encoder_vocab_size=200, decoder_vocab_size=200,
                      d_embed=128, d_ff=128, h=8, N_encoder=2, N_decoder=2,
                      max_seq_len=16, dropout=0.1)
    # one type-3 block (MHA(h=4) -> FF) and one type-2 block (FF -> MHA(h=8))
    gene = GeneEncoding(elist=[[3, 0, 0], [2, 1, 1]], ne=2)

    key = jax.random.PRNGKey(0)
    k_params, k_inp = jax.random.split(key)
    params = make_encoder_params(k_params, gene, cfg)

    batch, seq = 2, 8
    input_ids = jax.random.randint(k_inp, (batch, seq), 0, cfg.encoder_vocab_size, jnp.int32)

    outs = encoder_ga_forward(params, input_ids)
    outs = [jax.block_until_ready(o) for o in outs]

    refs = _ref_forward(params, input_ids)
    for o, r in zip(outs, refs):
        assert o.shape == (batch, seq, cfg.d_embed)
        # approx-reciprocal softmax + MXU accumulation-order differences only
        assert jnp.allclose(o, r, rtol=1e-2, atol=1e-2), "mismatch vs reference"

    print("KERNEL_OK")
</pallas_src>

<mosaic_0001>
module attributes {stable_mosaic.version = 11 : i64} {
  func.func @encoder_stack_kernel(%arg0: i32, %arg1: memref<2x8x128xf32, #tpu.memory_space<vmem>>, %arg2: memref<1x128xf32, #tpu.memory_space<vmem>>, %arg3: memref<1x128xf32, #tpu.memory_space<vmem>>, %arg4: memref<128x384xbf16, #tpu.memory_space<vmem>>, %arg5: memref<1x384xf32, #tpu.memory_space<vmem>>, %arg6: memref<128x128xbf16, #tpu.memory_space<vmem>>, %arg7: memref<1x128xf32, #tpu.memory_space<vmem>>, %arg8: memref<1x128xf32, #tpu.memory_space<vmem>>, %arg9: memref<1x128xf32, #tpu.memory_space<vmem>>, %arg10: memref<128x256xbf16, #tpu.memory_space<vmem>>, %arg11: memref<1x256xf32, #tpu.memory_space<vmem>>, %arg12: memref<256x128xbf16, #tpu.memory_space<vmem>>, %arg13: memref<1x128xf32, #tpu.memory_space<vmem>>, %arg14: memref<1x128xf32, #tpu.memory_space<vmem>>, %arg15: memref<1x128xf32, #tpu.memory_space<vmem>>, %arg16: memref<128x512xbf16, #tpu.memory_space<vmem>>, %arg17: memref<1x512xf32, #tpu.memory_space<vmem>>, %arg18: memref<512x128xbf16, #tpu.memory_space<vmem>>, %arg19: memref<1x128xf32, #tpu.memory_space<vmem>>, %arg20: memref<1x128xf32, #tpu.memory_space<vmem>>, %arg21: memref<1x128xf32, #tpu.memory_space<vmem>>, %arg22: memref<128x384xbf16, #tpu.memory_space<vmem>>, %arg23: memref<1x384xf32, #tpu.memory_space<vmem>>, %arg24: memref<128x128xbf16, #tpu.memory_space<vmem>>, %arg25: memref<1x128xf32, #tpu.memory_space<vmem>>, %arg26: memref<1x128xf32, #tpu.memory_space<vmem>>, %arg27: memref<1x128xf32, #tpu.memory_space<vmem>>, %arg28: memref<2x8x128xf32, #tpu.memory_space<vmem>>, %arg29: memref<2x8x128xf32, #tpu.memory_space<vmem>>, %arg30: memref<16x128xf32, #tpu.memory_space<vmem>>) attributes {dimension_semantics = [#tpu.dimension_semantics<parallel>], iteration_bounds = array<i64: 1>, scalar_prefetch = 0 : i64, scratch_operands = 1 : i64, tpu.core_type = #tpu.core_type<tc>, window_params = [{transform_indices = @transform_0, window_bounds = array<i64: 2, 8, 128>}, {pipeline_mode = #tpu.pipeline_mode<synchronous>, transform_indices = @transform_1, window_bounds = array<i64: 1, 128>}, {pipeline_mode = #tpu.pipeline_mode<synchronous>, transform_indices = @transform_2, window_bounds = array<i64: 1, 128>}, {pipeline_mode = #tpu.pipeline_mode<synchronous>, transform_indices = @transform_3, window_bounds = array<i64: 128, 384>}, {pipeline_mode = #tpu.pipeline_mode<synchronous>, transform_indices = @transform_4, window_bounds = array<i64: 1, 384>}, {pipeline_mode = #tpu.pipeline_mode<synchronous>, transform_indices = @transform_5, window_bounds = array<i64: 128, 128>}, {pipeline_mode = #tpu.pipeline_mode<synchronous>, transform_indices = @transform_6, window_bounds = array<i64: 1, 128>}, {pipeline_mode = #tpu.pipeline_mode<synchronous>, transform_indices = @transform_7, window_bounds = array<i64: 1, 128>}, {pipeline_mode = #tpu.pipeline_mode<synchronous>, transform_indices = @transform_8, window_bounds = array<i64: 1, 128>}, {pipeline_mode = #tpu.pipeline_mode<synchronous>, transform_indices = @transform_9, window_bounds = array<i64: 128, 256>}, {pipeline_mode = #tpu.pipeline_mode<synchronous>, transform_indices = @transform_10, window_bounds = array<i64: 1, 256>}, {pipeline_mode = #tpu.pipeline_mode<synchronous>, transform_indices = @transform_11, window_bounds = array<i64: 256, 128>}, {pipeline_mode = #tpu.pipeline_mode<synchronous>, transform_indices = @transform_12, window_bounds = array<i64: 1, 128>}, {pipeline_mode = #tpu.pipeline_mode<synchronous>, transform_indices = @transform_13, window_bounds = array<i64: 1, 128>}, {pipeline_mode = #tpu.pipeline_mode<synchronous>, transform_indices = @transform_14, window_bounds = array<i64: 1, 128>}, {pipeline_mode = #tpu.pipeline_mode<synchronous>, transform_indices = @transform_15, window_bounds = array<i64: 128, 512>}, {pipeline_mode = #tpu.pipeline_mode<synchronous>, transform_indices = @transform_16, window_bounds = array<i64: 1, 512>}, {pipeline_mode = #tpu.pipeline_mode<synchronous>, transform_indices = @transform_17, window_bounds = array<i64: 512, 128>}, {pipeline_mode = #tpu.pipeline_mode<synchronous>, transform_indices = @transform_18, window_bounds = array<i64: 1, 128>}, {pipeline_mode = #tpu.pipeline_mode<synchronous>, transform_indices = @transform_19, window_bounds = array<i64: 1, 128>}, {pipeline_mode = #tpu.pipeline_mode<synchronous>, transform_indices = @transform_20, window_bounds = array<i64: 1, 128>}, {pipeline_mode = #tpu.pipeline_mode<synchronous>, transform_indices = @transform_21, window_bounds = array<i64: 128, 384>}, {pipeline_mode = #tpu.pipeline_mode<synchronous>, transform_indices = @transform_22, window_bounds = array<i64: 1, 384>}, {pipeline_mode = #tpu.pipeline_mode<synchronous>, transform_indices = @transform_23, window_bounds = array<i64: 128, 128>}, {pipeline_mode = #tpu.pipeline_mode<synchronous>, transform_indices = @transform_24, window_bounds = array<i64: 1, 128>}, {pipeline_mode = #tpu.pipeline_mode<synchronous>, transform_indices = @transform_25, window_bounds = array<i64: 1, 128>}, {pipeline_mode = #tpu.pipeline_mode<synchronous>, transform_indices = @transform_26, window_bounds = array<i64: 1, 128>}, {transform_indices = @transform_27, window_bounds = array<i64: 2, 8, 128>}, {transform_indices = @transform_28, window_bounds = array<i64: 2, 8, 128>}]} {
    %c0 = arith.constant 0 : index
    %c0_0 = arith.constant 0 : index
    %c0_1 = arith.constant 0 : index
    %0 = vector.load %arg1[%c0, %c0_0, %c0_1] : memref<2x8x128xf32, #tpu.memory_space<vmem>>, vector<2x8x128xf32>
    %1 = vector.shape_cast %0 : vector<2x8x128xf32> to vector<16x128xf32>
    %c0_2 = arith.constant 0 : index
    %c0_3 = arith.constant 0 : index
    %2 = vector.load %arg26[%c0_2, %c0_3] : memref<1x128xf32, #tpu.memory_space<vmem>>, vector<1x128xf32>
    %c0_4 = arith.constant 0 : index
    %c0_5 = arith.constant 0 : index
    %3 = vector.load %arg27[%c0_4, %c0_5] : memref<1x128xf32, #tpu.memory_space<vmem>>, vector<1x128xf32>
    %c0_6 = arith.constant 0 : index
    %c0_7 = arith.constant 0 : index
    %4 = vector.load %arg2[%c0_6, %c0_7] : memref<1x128xf32, #tpu.memory_space<vmem>>, vector<1x128xf32>
    %c0_8 = arith.constant 0 : index
    %c0_9 = arith.constant 0 : index
    %5 = vector.load %arg3[%c0_8, %c0_9] : memref<1x128xf32, #tpu.memory_space<vmem>>, vector<1x128xf32>
    %cst = arith.constant dense<0.000000e+00> : vector<16xf32>
    %6 = vector.multi_reduction <add>, %1, %cst [1] : vector<16x128xf32> to vector<16xf32>
    %7 = vector.shape_cast %6 : vector<16xf32> to vector<16x1xf32>
    %cst_10 = arith.constant 1.280000e+02 : f32
    %8 = vector.broadcast %cst_10 : f32 to vector<16x1xf32>
    %9 = arith.divf %7, %8 : vector<16x1xf32>
    %10 = vector.broadcast %9 : vector<16x1xf32> to vector<16x128xf32>
    %11 = arith.subf %1, %10 : vector<16x128xf32>
    %12 = arith.mulf %11, %11 : vector<16x128xf32>
    %cst_11 = arith.constant dense<0.000000e+00> : vector<16xf32>
    %13 = vector.multi_reduction <add>, %12, %cst_11 [1] : vector<16x128xf32> to vector<16xf32>
    %14 = vector.shape_cast %13 : vector<16xf32> to vector<16x1xf32>
    %cst_12 = arith.constant 1.280000e+02 : f32
    %15 = vector.broadcast %cst_12 : f32 to vector<16x1xf32>
    %16 = arith.divf %14, %15 : vector<16x1xf32>
    %17 = vector.broadcast %9 : vector<16x1xf32> to vector<16x128xf32>
    %18 = arith.subf %1, %17 : vector<16x128xf32>
    %cst_13 = arith.constant 9.99999974E-6 : f32
    %19 = vector.broadcast %cst_13 : f32 to vector<16x1xf32>
    %20 = arith.addf %16, %19 : vector<16x1xf32>
    %21 = math.rsqrt %20 : vector<16x1xf32>
    %22 = vector.broadcast %21 : vector<16x1xf32> to vector<16x128xf32>
    %23 = arith.mulf %18, %22 : vector<16x128xf32>
    %24 = vector.broadcast %4 : vector<1x128xf32> to vector<16x128xf32>
    %25 = arith.mulf %23, %24 : vector<16x128xf32>
    %26 = vector.broadcast %5 : vector<1x128xf32> to vector<16x128xf32>
    %27 = arith.addf %25, %26 : vector<16x128xf32>
    %c0_14 = arith.constant 0 : index
    %c0_15 = arith.constant 0 : index
    %28 = vector.load %arg4[%c0_14, %c0_15] : memref<128x384xbf16, #tpu.memory_space<vmem>>, vector<128x384xbf16>
    %29 = arith.truncf %27 : vector<16x128xf32> to vector<16x128xbf16>
    %cst_16 = arith.constant dense<0.000000e+00> : vector<16x384xf32>
    %30 = tpu.matmul %29, %28, %cst_16 {dimension_numbers = #tpu.dot_dimension_numbers<[1], [0], [0], [1], [0, 0, 1, 1], [], []>} : vector<16x128xbf16>, vector<128x384xbf16>, vector<16x384xf32> -> vector<16x384xf32>
    %c0_17 = arith.constant 0 : index
    %c0_18 = arith.constant 0 : index
    %31 = vector.load %arg5[%c0_17, %c0_18] : memref<1x384xf32, #tpu.memory_space<vmem>>, vector<1x384xf32>
    %32 = vector.broadcast %31 : vector<1x384xf32> to vector<16x384xf32>
    %33 = arith.addf %30, %32 : vector<16x384xf32>
    %34 = vector.extract_strided_slice %33 {offsets = [0, 0], sizes = [8, 32], strides = [1, 1]} : vector<16x384xf32> to vector<8x32xf32>
    %35 = arith.truncf %34 : vector<8x32xf32> to vector<8x32xbf16>
    %36 = vector.extract_strided_slice %33 {offsets = [0, 128], sizes = [8, 32], strides = [1, 1]} : vector<16x384xf32> to vector<8x32xf32>
    %37 = arith.truncf %36 : vector<8x32xf32> to vector<8x32xbf16>
    %38 = vector.extract_strided_slice %33 {offsets = [0, 256], sizes = [8, 32], strides = [1, 1]} : vector<16x384xf32> to vector<8x32xf32>
    %39 = arith.truncf %38 : vector<8x32xf32> to vector<8x32xbf16>
    %cst_19 = arith.constant dense<0.000000e+00> : vector<8x8xf32>
    %40 = tpu.matmul %35, %37, %cst_19 {dimension_numbers = #tpu.dot_dimension_numbers<[1], [1], [0], [0], [0, 0, 1, 0], [], []>} : vector<8x32xbf16>, vector<8x32xbf16>, vector<8x8xf32> -> vector<8x8xf32>
    %cst_20 = arith.constant dense<0xFF800000> : vector<8xf32>
    %41 = vector.multi_reduction <maximumf>, %40, %cst_20 [1] : vector<8x8xf32> to vector<8xf32>
    %42 = vector.shape_cast %41 : vector<8xf32> to vector<8x1xf32>
    %43 = vector.broadcast %42 : vector<8x1xf32> to vector<8x8xf32>
    %44 = arith.subf %40, %43 : vector<8x8xf32>
    %45 = math.exp %44 : vector<8x8xf32>
    %cst_21 = arith.constant dense<0.000000e+00> : vector<8xf32>
    %46 = vector.multi_reduction <add>, %45, %cst_21 [1] : vector<8x8xf32> to vector<8xf32>
    %47 = vector.shape_cast %46 : vector<8xf32> to vector<8x1xf32>
    %48 = tpu.reciprocal %47 {approx = true} : vector<8x1xf32> -> vector<8x1xf32>
    %49 = vector.broadcast %48 : vector<8x1xf32> to vector<8x8xf32>
    %50 = arith.mulf %45, %49 : vector<8x8xf32>
    %51 = arith.truncf %50 : vector<8x8xf32> to vector<8x8xbf16>
    %cst_22 = arith.constant dense<0.000000e+00> : vector<8x32xf32>
    %52 = tpu.matmul %51, %39, %cst_22 {dimension_numbers = #tpu.dot_dimension_numbers<[1], [0], [0], [1], [0, 0, 1, 1], [], []>} : vector<8x8xbf16>, vector<8x32xbf16>, vector<8x32xf32> -> vector<8x32xf32>
    %c0_23 = arith.constant 0 : index
    %c0_24 = arith.constant 0 : index
    %53 = vector.load %arg30[%c0_23, %c0_24] : memref<16x128xf32, #tpu.memory_space<vmem>>, vector<8x32xf32>
    tpu.vector_store %arg30[%c0_23, %c0_24], %52 {strides = array<i32>} : memref<16x128xf32, #tpu.memory_space<vmem>>, vector<8x32xf32>,
    %54 = vector.extract_strided_slice %33 {offsets = [0, 32], sizes = [8, 32], strides = [1, 1]} : vector<16x384xf32> to vector<8x32xf32>
    %55 = arith.truncf %54 : vector<8x32xf32> to vector<8x32xbf16>
    %56 = vector.extract_strided_slice %33 {offsets = [0, 160], sizes = [8, 32], strides = [1, 1]} : vector<16x384xf32> to vector<8x32xf32>
    %57 = arith.truncf %56 : vector<8x32xf32> to vector<8x32xbf16>
    %58 = vector.extract_strided_slice %33 {offsets = [0, 288], sizes = [8, 32], strides = [1, 1]} : vector<16x384xf32> to vector<8x32xf32>
    %59 = arith.truncf %58 : vector<8x32xf32> to vector<8x32xbf16>
    %cst_25 = arith.constant dense<0.000000e+00> : vector<8x8xf32>
    %60 = tpu.matmul %55, %57, %cst_25 {dimension_numbers = #tpu.dot_dimension_numbers<[1], [1], [0], [0], [0, 0, 1, 0], [], []>} : vector<8x32xbf16>, vector<8x32xbf16>, vector<8x8xf32> -> vector<8x8xf32>
    %cst_26 = arith.constant dense<0xFF800000> : vector<8xf32>
    %61 = vector.multi_reduction <maximumf>, %60, %cst_26 [1] : vector<8x8xf32> to vector<8xf32>
    %62 = vector.shape_cast %61 : vector<8xf32> to vector<8x1xf32>
    %63 = vector.broadcast %62 : vector<8x1xf32> to vector<8x8xf32>
    %64 = arith.subf %60, %63 : vector<8x8xf32>
    %65 = math.exp %64 : vector<8x8xf32>
    %cst_27 = arith.constant dense<0.000000e+00> : vector<8xf32>
    %66 = vector.multi_reduction <add>, %65, %cst_27 [1] : vector<8x8xf32> to vector<8xf32>
    %67 = vector.shape_cast %66 : vector<8xf32> to vector<8x1xf32>
    %68 = tpu.reciprocal %67 {approx = true} : vector<8x1xf32> -> vector<8x1xf32>
    %69 = vector.broadcast %68 : vector<8x1xf32> to vector<8x8xf32>
    %70 = arith.mulf %65, %69 : vector<8x8xf32>
    %71 = arith.truncf %70 : vector<8x8xf32> to vector<8x8xbf16>
    %cst_28 = arith.constant dense<0.000000e+00> : vector<8x32xf32>
    %72 = tpu.matmul %71, %59, %cst_28 {dimension_numbers = #tpu.dot_dimension_numbers<[1], [0], [0], [1], [0, 0, 1, 1], [], []>} : vector<8x8xbf16>, vector<8x32xbf16>, vector<8x32xf32> -> vector<8x32xf32>
    %c0_29 = arith.constant 0 : index
    %c32 = arith.constant 32 : index
    %73 = vector.load %arg30[%c0_29, %c32] : memref<16x128xf32, #tpu.memory_space<vmem>>, vector<8x32xf32>
    tpu.vector_store %arg30[%c0_29, %c32], %72 {strides = array<i32>} : memref<16x128xf32, #tpu.memory_space<vmem>>, vector<8x32xf32>,
    %74 = vector.extract_strided_slice %33 {offsets = [0, 64], sizes = [8, 32], strides = [1, 1]} : vector<16x384xf32> to vector<8x32xf32>
    %75 = arith.truncf %74 : vector<8x32xf32> to vector<8x32xbf16>
    %76 = vector.extract_strided_slice %33 {offsets = [0, 192], sizes = [8, 32], strides = [1, 1]} : vector<16x384xf32> to vector<8x32xf32>
    %77 = arith.truncf %76 : vector<8x32xf32> to vector<8x32xbf16>
    %78 = vector.extract_strided_slice %33 {offsets = [0, 320], sizes = [8, 32], strides = [1, 1]} : vector<16x384xf32> to vector<8x32xf32>
    %79 = arith.truncf %78 : vector<8x32xf32> to vector<8x32xbf16>
    %cst_30 = arith.constant dense<0.000000e+00> : vector<8x8xf32>
    %80 = tpu.matmul %75, %77, %cst_30 {dimension_numbers = #tpu.dot_dimension_numbers<[1], [1], [0], [0], [0, 0, 1, 0], [], []>} : vector<8x32xbf16>, vector<8x32xbf16>, vector<8x8xf32> -> vector<8x8xf32>
    %cst_31 = arith.constant dense<0xFF800000> : vector<8xf32>
    %81 = vector.multi_reduction <maximumf>, %80, %cst_31 [1] : vector<8x8xf32> to vector<8xf32>
    %82 = vector.shape_cast %81 : vector<8xf32> to vector<8x1xf32>
    %83 = vector.broadcast %82 : vector<8x1xf32> to vector<8x8xf32>
    %84 = arith.subf %80, %83 : vector<8x8xf32>
    %85 = math.exp %84 : vector<8x8xf32>
    %cst_32 = arith.constant dense<0.000000e+00> : vector<8xf32>
    %86 = vector.multi_reduction <add>, %85, %cst_32 [1] : vector<8x8xf32> to vector<8xf32>
    %87 = vector.shape_cast %86 : vector<8xf32> to vector<8x1xf32>
    %88 = tpu.reciprocal %87 {approx = true} : vector<8x1xf32> -> vector<8x1xf32>
    %89 = vector.broadcast %88 : vector<8x1xf32> to vector<8x8xf32>
    %90 = arith.mulf %85, %89 : vector<8x8xf32>
    %91 = arith.truncf %90 : vector<8x8xf32> to vector<8x8xbf16>
    %cst_33 = arith.constant dense<0.000000e+00> : vector<8x32xf32>
    %92 = tpu.matmul %91, %79, %cst_33 {dimension_numbers = #tpu.dot_dimension_numbers<[1], [0], [0], [1], [0, 0, 1, 1], [], []>} : vector<8x8xbf16>, vector<8x32xbf16>, vector<8x32xf32> -> vector<8x32xf32>
    %c0_34 = arith.constant 0 : index
    %c64 = arith.constant 64 : index
    %93 = vector.load %arg30[%c0_34, %c64] : memref<16x128xf32, #tpu.memory_space<vmem>>, vector<8x32xf32>
    tpu.vector_store %arg30[%c0_34, %c64], %92 {strides = array<i32>} : memref<16x128xf32, #tpu.memory_space<vmem>>, vector<8x32xf32>,
    %94 = vector.extract_strided_slice %33 {offsets = [0, 96], sizes = [8, 32], strides = [1, 1]} : vector<16x384xf32> to vector<8x32xf32>
    %95 = arith.truncf %94 : vector<8x32xf32> to vector<8x32xbf16>
    %96 = vector.extract_strided_slice %33 {offsets = [0, 224], sizes = [8, 32], strides = [1, 1]} : vector<16x384xf32> to vector<8x32xf32>
    %97 = arith.truncf %96 : vector<8x32xf32> to vector<8x32xbf16>
    %98 = vector.extract_strided_slice %33 {offsets = [0, 352], sizes = [8, 32], strides = [1, 1]} : vector<16x384xf32> to vector<8x32xf32>
    %99 = arith.truncf %98 : vector<8x32xf32> to vector<8x32xbf16>
    %cst_35 = arith.constant dense<0.000000e+00> : vector<8x8xf32>
    %100 = tpu.matmul %95, %97, %cst_35 {dimension_numbers = #tpu.dot_dimension_numbers<[1], [1], [0], [0], [0, 0, 1, 0], [], []>} : vector<8x32xbf16>, vector<8x32xbf16>, vector<8x8xf32> -> vector<8x8xf32>
    %cst_36 = arith.constant dense<0xFF800000> : vector<8xf32>
    %101 = vector.multi_reduction <maximumf>, %100, %cst_36 [1] : vector<8x8xf32> to vector<8xf32>
    %102 = vector.shape_cast %101 : vector<8xf32> to vector<8x1xf32>
    %103 = vector.broadcast %102 : vector<8x1xf32> to vector<8x8xf32>
    %104 = arith.subf %100, %103 : vector<8x8xf32>
    %105 = math.exp %104 : vector<8x8xf32>
    %cst_37 = arith.constant dense<0.000000e+00> : vector<8xf32>
    %106 = vector.multi_reduction <add>, %105, %cst_37 [1] : vector<8x8xf32> to vector<8xf32>
    %107 = vector.shape_cast %106 : vector<8xf32> to vector<8x1xf32>
    %108 = tpu.reciprocal %107 {approx = true} : vector<8x1xf32> -> vector<8x1xf32>
    %109 = vector.broadcast %108 : vector<8x1xf32> to vector<8x8xf32>
    %110 = arith.mulf %105, %109 : vector<8x8xf32>
    %111 = arith.truncf %110 : vector<8x8xf32> to vector<8x8xbf16>
    %cst_38 = arith.constant dense<0.000000e+00> : vector<8x32xf32>
    %112 = tpu.matmul %111, %99, %cst_38 {dimension_numbers = #tpu.dot_dimension_numbers<[1], [0], [0], [1], [0, 0, 1, 1], [], []>} : vector<8x8xbf16>, vector<8x32xbf16>, vector<8x32xf32> -> vector<8x32xf32>
    %c0_39 = arith.constant 0 : index
    %c96 = arith.constant 96 : index
    %113 = vector.load %arg30[%c0_39, %c96] : memref<16x128xf32, #tpu.memory_space<vmem>>, vector<8x32xf32>
    tpu.vector_store %arg30[%c0_39, %c96], %112 {strides = array<i32>} : memref<16x128xf32, #tpu.memory_space<vmem>>, vector<8x32xf32>,
    %114 = vector.extract_strided_slice %33 {offsets = [8, 0], sizes = [8, 32], strides = [1, 1]} : vector<16x384xf32> to vector<8x32xf32>
    %115 = arith.truncf %114 : vector<8x32xf32> to vector<8x32xbf16>
    %116 = vector.extract_strided_slice %33 {offsets = [8, 128], sizes = [8, 32], strides = [1, 1]} : vector<16x384xf32> to vector<8x32xf32>
    %117 = arith.truncf %116 : vector<8x32xf32> to vector<8x32xbf16>
    %118 = vector.extract_strided_slice %33 {offsets = [8, 256], sizes = [8, 32], strides = [1, 1]} : vector<16x384xf32> to vector<8x32xf32>
    %119 = arith.truncf %118 : vector<8x32xf32> to vector<8x32xbf16>
    %cst_40 = arith.constant dense<0.000000e+00> : vector<8x8xf32>
    %120 = tpu.matmul %115, %117, %cst_40 {dimension_numbers = #tpu.dot_dimension_numbers<[1], [1], [0], [0], [0, 0, 1, 0], [], []>} : vector<8x32xbf16>, vector<8x32xbf16>, vector<8x8xf32> -> vector<8x8xf32>
    %cst_41 = arith.constant dense<0xFF800000> : vector<8xf32>
    %121 = vector.multi_reduction <maximumf>, %120, %cst_41 [1] : vector<8x8xf32> to vector<8xf32>
    %122 = vector.shape_cast %121 : vector<8xf32> to vector<8x1xf32>
    %123 = vector.broadcast %122 : vector<8x1xf32> to vector<8x8xf32>
    %124 = arith.subf %120, %123 : vector<8x8xf32>
    %125 = math.exp %124 : vector<8x8xf32>
    %cst_42 = arith.constant dense<0.000000e+00> : vector<8xf32>
    %126 = vector.multi_reduction <add>, %125, %cst_42 [1] : vector<8x8xf32> to vector<8xf32>
    %127 = vector.shape_cast %126 : vector<8xf32> to vector<8x1xf32>
    %128 = tpu.reciprocal %127 {approx = true} : vector<8x1xf32> -> vector<8x1xf32>
    %129 = vector.broadcast %128 : vector<8x1xf32> to vector<8x8xf32>
    %130 = arith.mulf %125, %129 : vector<8x8xf32>
    %131 = arith.truncf %130 : vector<8x8xf32> to vector<8x8xbf16>
    %cst_43 = arith.constant dense<0.000000e+00> : vector<8x32xf32>
    %132 = tpu.matmul %131, %119, %cst_43 {dimension_numbers = #tpu.dot_dimension_numbers<[1], [0], [0], [1], [0, 0, 1, 1], [], []>} : vector<8x8xbf16>, vector<8x32xbf16>, vector<8x32xf32> -> vector<8x32xf32>
    %c8 = arith.constant 8 : index
    %c0_44 = arith.constant 0 : index
    %133 = vector.load %arg30[%c8, %c0_44] : memref<16x128xf32, #tpu.memory_space<vmem>>, vector<8x32xf32>
    tpu.vector_store %arg30[%c8, %c0_44], %132 {strides = array<i32>} : memref<16x128xf32, #tpu.memory_space<vmem>>, vector<8x32xf32>,
    %134 = vector.extract_strided_slice %33 {offsets = [8, 32], sizes = [8, 32], strides = [1, 1]} : vector<16x384xf32> to vector<8x32xf32>
    %135 = arith.truncf %134 : vector<8x32xf32> to vector<8x32xbf16>
    %136 = vector.extract_strided_slice %33 {offsets = [8, 160], sizes = [8, 32], strides = [1, 1]} : vector<16x384xf32> to vector<8x32xf32>
    %137 = arith.truncf %136 : vector<8x32xf32> to vector<8x32xbf16>
    %138 = vector.extract_strided_slice %33 {offsets = [8, 288], sizes = [8, 32], strides = [1, 1]} : vector<16x384xf32> to vector<8x32xf32>
    %139 = arith.truncf %138 : vector<8x32xf32> to vector<8x32xbf16>
    %cst_45 = arith.constant dense<0.000000e+00> : vector<8x8xf32>
    %140 = tpu.matmul %135, %137, %cst_45 {dimension_numbers = #tpu.dot_dimension_numbers<[1], [1], [0], [0], [0, 0, 1, 0], [], []>} : vector<8x32xbf16>, vector<8x32xbf16>, vector<8x8xf32> -> vector<8x8xf32>
    %cst_46 = arith.constant dense<0xFF800000> : vector<8xf32>
    %141 = vector.multi_reduction <maximumf>, %140, %cst_46 [1] : vector<8x8xf32> to vector<8xf32>
    %142 = vector.shape_cast %141 : vector<8xf32> to vector<8x1xf32>
    %143 = vector.broadcast %142 : vector<8x1xf32> to vector<8x8xf32>
    %144 = arith.subf %140, %143 : vector<8x8xf32>
    %145 = math.exp %144 : vector<8x8xf32>
    %cst_47 = arith.constant dense<0.000000e+00> : vector<8xf32>
    %146 = vector.multi_reduction <add>, %145, %cst_47 [1] : vector<8x8xf32> to vector<8xf32>
    %147 = vector.shape_cast %146 : vector<8xf32> to vector<8x1xf32>
    %148 = tpu.reciprocal %147 {approx = true} : vector<8x1xf32> -> vector<8x1xf32>
    %149 = vector.broadcast %148 : vector<8x1xf32> to vector<8x8xf32>
    %150 = arith.mulf %145, %149 : vector<8x8xf32>
    %151 = arith.truncf %150 : vector<8x8xf32> to vector<8x8xbf16>
    %cst_48 = arith.constant dense<0.000000e+00> : vector<8x32xf32>
    %152 = tpu.matmul %151, %139, %cst_48 {dimension_numbers = #tpu.dot_dimension_numbers<[1], [0], [0], [1], [0, 0, 1, 1], [], []>} : vector<8x8xbf16>, vector<8x32xbf16>, vector<8x32xf32> -> vector<8x32xf32>
    %c8_49 = arith.constant 8 : index
    %c32_50 = arith.constant 32 : index
    %153 = vector.load %arg30[%c8_49, %c32_50] : memref<16x128xf32, #tpu.memory_space<vmem>>, vector<8x32xf32>
    tpu.vector_store %arg30[%c8_49, %c32_50], %152 {strides = array<i32>} : memref<16x128xf32, #tpu.memory_space<vmem>>, vector<8x32xf32>,
    %154 = vector.extract_strided_slice %33 {offsets = [8, 64], sizes = [8, 32], strides = [1, 1]} : vector<16x384xf32> to vector<8x32xf32>
    %155 = arith.truncf %154 : vector<8x32xf32> to vector<8x32xbf16>
    %156 = vector.extract_strided_slice %33 {offsets = [8, 192], sizes = [8, 32], strides = [1, 1]} : vector<16x384xf32> to vector<8x32xf32>
    %157 = arith.truncf %156 : vector<8x32xf32> to vector<8x32xbf16>
    %158 = vector.extract_strided_slice %33 {offsets = [8, 320], sizes = [8, 32], strides = [1, 1]} : vector<16x384xf32> to vector<8x32xf32>
    %159 = arith.truncf %158 : vector<8x32xf32> to vector<8x32xbf16>
    %cst_51 = arith.constant dense<0.000000e+00> : vector<8x8xf32>
    %160 = tpu.matmul %155, %157, %cst_51 {dimension_numbers = #tpu.dot_dimension_numbers<[1], [1], [0], [0], [0, 0, 1, 0], [], []>} : vector<8x32xbf16>, vector<8x32xbf16>, vector<8x8xf32> -> vector<8x8xf32>
    %cst_52 = arith.constant dense<0xFF800000> : vector<8xf32>
    %161 = vector.multi_reduction <maximumf>, %160, %cst_52 [1] : vector<8x8xf32> to vector<8xf32>
    %162 = vector.shape_cast %161 : vector<8xf32> to vector<8x1xf32>
    %163 = vector.broadcast %162 : vector<8x1xf32> to vector<8x8xf32>
    %164 = arith.subf %160, %163 : vector<8x8xf32>
    %165 = math.exp %164 : vector<8x8xf32>
    %cst_53 = arith.constant dense<0.000000e+00> : vector<8xf32>
    %166 = vector.multi_reduction <add>, %165, %cst_53 [1] : vector<8x8xf32> to vector<8xf32>
    %167 = vector.shape_cast %166 : vector<8xf32> to vector<8x1xf32>
    %168 = tpu.reciprocal %167 {approx = true} : vector<8x1xf32> -> vector<8x1xf32>
    %169 = vector.broadcast %168 : vector<8x1xf32> to vector<8x8xf32>
    %170 = arith.mulf %165, %169 : vector<8x8xf32>
    %171 = arith.truncf %170 : vector<8x8xf32> to vector<8x8xbf16>
    %cst_54 = arith.constant dense<0.000000e+00> : vector<8x32xf32>
    %172 = tpu.matmul %171, %159, %cst_54 {dimension_numbers = #tpu.dot_dimension_numbers<[1], [0], [0], [1], [0, 0, 1, 1], [], []>} : vector<8x8xbf16>, vector<8x32xbf16>, vector<8x32xf32> -> vector<8x32xf32>
    %c8_55 = arith.constant 8 : index
    %c64_56 = arith.constant 64 : index
    %173 = vector.load %arg30[%c8_55, %c64_56] : memref<16x128xf32, #tpu.memory_space<vmem>>, vector<8x32xf32>
    tpu.vector_store %arg30[%c8_55, %c64_56], %172 {strides = array<i32>} : memref<16x128xf32, #tpu.memory_space<vmem>>, vector<8x32xf32>,
    %174 = vector.extract_strided_slice %33 {offsets = [8, 96], sizes = [8, 32], strides = [1, 1]} : vector<16x384xf32> to vector<8x32xf32>
    %175 = arith.truncf %174 : vector<8x32xf32> to vector<8x32xbf16>
    %176 = vector.extract_strided_slice %33 {offsets = [8, 224], sizes = [8, 32], strides = [1, 1]} : vector<16x384xf32> to vector<8x32xf32>
    %177 = arith.truncf %176 : vector<8x32xf32> to vector<8x32xbf16>
    %178 = vector.extract_strided_slice %33 {offsets = [8, 352], sizes = [8, 32], strides = [1, 1]} : vector<16x384xf32> to vector<8x32xf32>
    %179 = arith.truncf %178 : vector<8x32xf32> to vector<8x32xbf16>
    %cst_57 = arith.constant dense<0.000000e+00> : vector<8x8xf32>
    %180 = tpu.matmul %175, %177, %cst_57 {dimension_numbers = #tpu.dot_dimension_numbers<[1], [1], [0], [0], [0, 0, 1, 0], [], []>} : vector<8x32xbf16>, vector<8x32xbf16>, vector<8x8xf32> -> vector<8x8xf32>
    %cst_58 = arith.constant dense<0xFF800000> : vector<8xf32>
    %181 = vector.multi_reduction <maximumf>, %180, %cst_58 [1] : vector<8x8xf32> to vector<8xf32>
    %182 = vector.shape_cast %181 : vector<8xf32> to vector<8x1xf32>
    %183 = vector.broadcast %182 : vector<8x1xf32> to vector<8x8xf32>
    %184 = arith.subf %180, %183 : vector<8x8xf32>
    %185 = math.exp %184 : vector<8x8xf32>
    %cst_59 = arith.constant dense<0.000000e+00> : vector<8xf32>
    %186 = vector.multi_reduction <add>, %185, %cst_59 [1] : vector<8x8xf32> to vector<8xf32>
    %187 = vector.shape_cast %186 : vector<8xf32> to vector<8x1xf32>
    %188 = tpu.reciprocal %187 {approx = true} : vector<8x1xf32> -> vector<8x1xf32>
    %189 = vector.broadcast %188 : vector<8x1xf32> to vector<8x8xf32>
    %190 = arith.mulf %185, %189 : vector<8x8xf32>
    %191 = arith.truncf %190 : vector<8x8xf32> to vector<8x8xbf16>
    %cst_60 = arith.constant dense<0.000000e+00> : vector<8x32xf32>
    %192 = tpu.matmul %191, %179, %cst_60 {dimension_numbers = #tpu.dot_dimension_numbers<[1], [0], [0], [1], [0, 0, 1, 1], [], []>} : vector<8x8xbf16>, vector<8x32xbf16>, vector<8x32xf32> -> vector<8x32xf32>
    %c8_61 = arith.constant 8 : index
    %c96_62 = arith.constant 96 : index
    %193 = vector.load %arg30[%c8_61, %c96_62] : memref<16x128xf32, #tpu.memory_space<vmem>>, vector<8x32xf32>
    tpu.vector_store %arg30[%c8_61, %c96_62], %192 {strides = array<i32>} : memref<16x128xf32, #tpu.memory_space<vmem>>, vector<8x32xf32>,
    %c0_63 = arith.constant 0 : index
    %c0_64 = arith.constant 0 : index
    %194 = vector.load %arg30[%c0_63, %c0_64] : memref<16x128xf32, #tpu.memory_space<vmem>>, vector<16x128xf32>
    %c0_65 = arith.constant 0 : index
    %c0_66 = arith.constant 0 : index
    %195 = vector.load %arg6[%c0_65, %c0_66] : memref<128x128xbf16, #tpu.memory_space<vmem>>, vector<128x128xbf16>
    %196 = arith.truncf %194 : vector<16x128xf32> to vector<16x128xbf16>
    %cst_67 = arith.constant dense<0.000000e+00> : vector<16x128xf32>
    %197 = tpu.matmul %196, %195, %cst_67 {dimension_numbers = #tpu.dot_dimension_numbers<[1], [0], [0], [1], [0, 0, 1, 1], [], []>} : vector<16x128xbf16>, vector<128x128xbf16>, vector<16x128xf32> -> vector<16x128xf32>
    %198 = arith.addf %1, %197 : vector<16x128xf32>
    %c0_68 = arith.constant 0 : index
    %c0_69 = arith.constant 0 : index
    %199 = vector.load %arg7[%c0_68, %c0_69] : memref<1x128xf32, #tpu.memory_space<vmem>>, vector<1x128xf32>
    %200 = vector.broadcast %199 : vector<1x128xf32> to vector<16x128xf32>
    %201 = arith.addf %198, %200 : vector<16x128xf32>
    %c0_70 = arith.constant 0 : index
    %c0_71 = arith.constant 0 : index
    %202 = vector.load %arg8[%c0_70, %c0_71] : memref<1x128xf32, #tpu.memory_space<vmem>>, vector<1x128xf32>
    %c0_72 = arith.constant 0 : index
    %c0_73 = arith.constant 0 : index
    %203 = vector.load %arg9[%c0_72, %c0_73] : memref<1x128xf32, #tpu.memory_space<vmem>>, vector<1x128xf32>
    %cst_74 = arith.constant dense<0.000000e+00> : vector<16xf32>
    %204 = vector.multi_reduction <add>, %201, %cst_74 [1] : vector<16x128xf32> to vector<16xf32>
    %205 = vector.shape_cast %204 : vector<16xf32> to vector<16x1xf32>
    %cst_75 = arith.constant 1.280000e+02 : f32
    %206 = vector.broadcast %cst_75 : f32 to vector<16x1xf32>
    %207 = arith.divf %205, %206 : vector<16x1xf32>
    %208 = vector.broadcast %207 : vector<16x1xf32> to vector<16x128xf32>
    %209 = arith.subf %201, %208 : vector<16x128xf32>
    %210 = arith.mulf %209, %209 : vector<16x128xf32>
    %cst_76 = arith.constant dense<0.000000e+00> : vector<16xf32>
    %211 = vector.multi_reduction <add>, %210, %cst_76 [1] : vector<16x128xf32> to vector<16xf32>
    %212 = vector.shape_cast %211 : vector<16xf32> to vector<16x1xf32>
    %cst_77 = arith.constant 1.280000e+02 : f32
    %213 = vector.broadcast %cst_77 : f32 to vector<16x1xf32>
    %214 = arith.divf %212, %213 : vector<16x1xf32>
    %215 = vector.broadcast %207 : vector<16x1xf32> to vector<16x128xf32>
    %216 = arith.subf %201, %215 : vector<16x128xf32>
    %cst_78 = arith.constant 9.99999974E-6 : f32
    %217 = vector.broadcast %cst_78 : f32 to vector<16x1xf32>
    %218 = arith.addf %214, %217 : vector<16x1xf32>
    %219 = math.rsqrt %218 : vector<16x1xf32>
    %220 = vector.broadcast %219 : vector<16x1xf32> to vector<16x128xf32>
    %221 = arith.mulf %216, %220 : vector<16x128xf32>
    %222 = vector.broadcast %202 : vector<1x128xf32> to vector<16x128xf32>
    %223 = arith.mulf %221, %222 : vector<16x128xf32>
    %224 = vector.broadcast %203 : vector<1x128xf32> to vector<16x128xf32>
    %225 = arith.addf %223, %224 : vector<16x128xf32>
    %c0_79 = arith.constant 0 : index
    %c0_80 = arith.constant 0 : index
    %226 = vector.load %arg10[%c0_79, %c0_80] : memref<128x256xbf16, #tpu.memory_space<vmem>>, vector<128x256xbf16>
    %227 = arith.truncf %225 : vector<16x128xf32> to vector<16x128xbf16>
    %cst_81 = arith.constant dense<0.000000e+00> : vector<16x256xf32>
    %228 = tpu.matmul %227, %226, %cst_81 {dimension_numbers = #tpu.dot_dimension_numbers<[1], [0], [0], [1], [0, 0, 1, 1], [], []>} : vector<16x128xbf16>, vector<128x256xbf16>, vector<16x256xf32> -> vector<16x256xf32>
    %c0_82 = arith.constant 0 : index
    %c0_83 = arith.constant 0 : index
    %229 = vector.load %arg11[%c0_82, %c0_83] : memref<1x256xf32, #tpu.memory_space<vmem>>, vector<1x256xf32>
    %230 = vector.broadcast %229 : vector<1x256xf32> to vector<16x256xf32>
    %231 = arith.addf %228, %230 : vector<16x256xf32>
    %cst_84 = arith.constant 0.000000e+00 : f32
    %232 = vector.broadcast %cst_84 : f32 to vector<16x256xf32>
    %233 = arith.maximumf %231, %232 : vector<16x256xf32>
    %c0_85 = arith.constant 0 : index
    %c0_86 = arith.constant 0 : index
    %234 = vector.load %arg12[%c0_85, %c0_86] : memref<256x128xbf16, #tpu.memory_space<vmem>>, vector<256x128xbf16>
    %235 = arith.truncf %233 : vector<16x256xf32> to vector<16x256xbf16>
    %cst_87 = arith.constant dense<0.000000e+00> : vector<16x128xf32>
    %236 = tpu.matmul %235, %234, %cst_87 {dimension_numbers = #tpu.dot_dimension_numbers<[1], [0], [0], [1], [0, 0, 1, 1], [], []>} : vector<16x256xbf16>, vector<256x128xbf16>, vector<16x128xf32> -> vector<16x128xf32>
    %237 = arith.addf %201, %236 : vector<16x128xf32>
    %c0_88 = arith.constant 0 : index
    %c0_89 = arith.constant 0 : index
    %238 = vector.load %arg13[%c0_88, %c0_89] : memref<1x128xf32, #tpu.memory_space<vmem>>, vector<1x128xf32>
    %239 = vector.broadcast %238 : vector<1x128xf32> to vector<16x128xf32>
    %240 = arith.addf %237, %239 : vector<16x128xf32>
    %cst_90 = arith.constant dense<0.000000e+00> : vector<16xf32>
    %241 = vector.multi_reduction <add>, %240, %cst_90 [1] : vector<16x128xf32> to vector<16xf32>
    %242 = vector.shape_cast %241 : vector<16xf32> to vector<16x1xf32>
    %cst_91 = arith.constant 1.280000e+02 : f32
    %243 = vector.broadcast %cst_91 : f32 to vector<16x1xf32>
    %244 = arith.divf %242, %243 : vector<16x1xf32>
    %245 = vector.broadcast %244 : vector<16x1xf32> to vector<16x128xf32>
    %246 = arith.subf %240, %245 : vector<16x128xf32>
    %247 = arith.mulf %246, %246 : vector<16x128xf32>
    %cst_92 = arith.constant dense<0.000000e+00> : vector<16xf32>
    %248 = vector.multi_reduction <add>, %247, %cst_92 [1] : vector<16x128xf32> to vector<16xf32>
    %249 = vector.shape_cast %248 : vector<16xf32> to vector<16x1xf32>
    %cst_93 = arith.constant 1.280000e+02 : f32
    %250 = vector.broadcast %cst_93 : f32 to vector<16x1xf32>
    %251 = arith.divf %249, %250 : vector<16x1xf32>
    %252 = vector.broadcast %244 : vector<16x1xf32> to vector<16x128xf32>
    %253 = arith.subf %240, %252 : vector<16x128xf32>
    %cst_94 = arith.constant 9.99999974E-6 : f32
    %254 = vector.broadcast %cst_94 : f32 to vector<16x1xf32>
    %255 = arith.addf %251, %254 : vector<16x1xf32>
    %256 = math.rsqrt %255 : vector<16x1xf32>
    %257 = vector.broadcast %256 : vector<16x1xf32> to vector<16x128xf32>
    %258 = arith.mulf %253, %257 : vector<16x128xf32>
    %259 = vector.broadcast %2 : vector<1x128xf32> to vector<16x128xf32>
    %260 = arith.mulf %258, %259 : vector<16x128xf32>
    %261 = vector.broadcast %3 : vector<1x128xf32> to vector<16x128xf32>
    %262 = arith.addf %260, %261 : vector<16x128xf32>
    %263 = vector.shape_cast %262 : vector<16x128xf32> to vector<2x8x128xf32>
    %c0_95 = arith.constant 0 : index
    %c0_96 = arith.constant 0 : index
    %c0_97 = arith.constant 0 : index
    %264 = vector.load %arg28[%c0_95, %c0_96, %c0_97] : memref<2x8x128xf32, #tpu.memory_space<vmem>>, vector<2x8x128xf32>
    tpu.vector_store %arg28[%c0_95, %c0_96, %c0_97], %263 {strides = array<i32>} : memref<2x8x128xf32, #tpu.memory_space<vmem>>, vector<2x8x128xf32>,
    %c0_98 = arith.constant 0 : index
    %c0_99 = arith.constant 0 : index
    %265 = vector.load %arg14[%c0_98, %c0_99] : memref<1x128xf32, #tpu.memory_space<vmem>>, vector<1x128xf32>
    %c0_100 = arith.constant 0 : index
    %c0_101 = arith.constant 0 : index
    %266 = vector.load %arg15[%c0_100, %c0_101] : memref<1x128xf32, #tpu.memory_space<vmem>>, vector<1x128xf32>
    %cst_102 = arith.constant dense<0.000000e+00> : vector<16xf32>
    %267 = vector.multi_reduction <add>, %240, %cst_102 [1] : vector<16x128xf32> to vector<16xf32>
    %268 = vector.shape_cast %267 : vector<16xf32> to vector<16x1xf32>
    %cst_103 = arith.constant 1.280000e+02 : f32
    %269 = vector.broadcast %cst_103 : f32 to vector<16x1xf32>
    %270 = arith.divf %268, %269 : vector<16x1xf32>
    %271 = vector.broadcast %270 : vector<16x1xf32> to vector<16x128xf32>
    %272 = arith.subf %240, %271 : vector<16x128xf32>
    %273 = arith.mulf %272, %272 : vector<16x128xf32>
    %cst_104 = arith.constant dense<0.000000e+00> : vector<16xf32>
    %274 = vector.multi_reduction <add>, %273, %cst_104 [1] : vector<16x128xf32> to vector<16xf32>
    %275 = vector.shape_cast %274 : vector<16xf32> to vector<16x1xf32>
    %cst_105 = arith.constant 1.280000e+02 : f32
    %276 = vector.broadcast %cst_105 : f32 to vector<16x1xf32>
    %277 = arith.divf %275, %276 : vector<16x1xf32>
    %278 = vector.broadcast %270 : vector<16x1xf32> to vector<16x128xf32>
    %279 = arith.subf %240, %278 : vector<16x128xf32>
    %cst_106 = arith.constant 9.99999974E-6 : f32
    %280 = vector.broadcast %cst_106 : f32 to vector<16x1xf32>
    %281 = arith.addf %277, %280 : vector<16x1xf32>
    %282 = math.rsqrt %281 : vector<16x1xf32>
    %283 = vector.broadcast %282 : vector<16x1xf32> to vector<16x128xf32>
    %284 = arith.mulf %279, %283 : vector<16x128xf32>
    %285 = vector.broadcast %265 : vector<1x128xf32> to vector<16x128xf32>
    %286 = arith.mulf %284, %285 : vector<16x128xf32>
    %287 = vector.broadcast %266 : vector<1x128xf32> to vector<16x128xf32>
    %288 = arith.addf %286, %287 : vector<16x128xf32>
    %c0_107 = arith.constant 0 : index
    %c0_108 = arith.constant 0 : index
    %289 = vector.load %arg16[%c0_107, %c0_108] : memref<128x512xbf16, #tpu.memory_space<vmem>>, vector<128x512xbf16>
    %290 = arith.truncf %288 : vector<16x128xf32> to vector<16x128xbf16>
    %cst_109 = arith.constant dense<0.000000e+00> : vector<16x512xf32>
    %291 = tpu.matmul %290, %289, %cst_109 {dimension_numbers = #tpu.dot_dimension_numbers<[1], [0], [0], [1], [0, 0, 1, 1], [], []>} : vector<16x128xbf16>, vector<128x512xbf16>, vector<16x512xf32> -> vector<16x512xf32>
    %c0_110 = arith.constant 0 : index
    %c0_111 = arith.constant 0 : index
    %292 = vector.load %arg17[%c0_110, %c0_111] : memref<1x512xf32, #tpu.memory_space<vmem>>, vector<1x512xf32>
    %293 = vector.broadcast %292 : vector<1x512xf32> to vector<16x512xf32>
    %294 = arith.addf %291, %293 : vector<16x512xf32>
    %cst_112 = arith.constant 0.000000e+00 : f32
    %295 = vector.broadcast %cst_112 : f32 to vector<16x512xf32>
    %296 = arith.maximumf %294, %295 : vector<16x512xf32>
    %c0_113 = arith.constant 0 : index
    %c0_114 = arith.constant 0 : index
    %297 = vector.load %arg18[%c0_113, %c0_114] : memref<512x128xbf16, #tpu.memory_space<vmem>>, vector<512x128xbf16>
    %298 = arith.truncf %296 : vector<16x512xf32> to vector<16x512xbf16>
    %cst_115 = arith.constant dense<0.000000e+00> : vector<16x128xf32>
    %299 = tpu.matmul %298, %297, %cst_115 {dimension_numbers = #tpu.dot_dimension_numbers<[1], [0], [0], [1], [0, 0, 1, 1], [], []>} : vector<16x512xbf16>, vector<512x128xbf16>, vector<16x128xf32> -> vector<16x128xf32>
    %300 = arith.addf %240, %299 : vector<16x128xf32>
    %c0_116 = arith.constant 0 : index
    %c0_117 = arith.constant 0 : index
    %301 = vector.load %arg19[%c0_116, %c0_117] : memref<1x128xf32, #tpu.memory_space<vmem>>, vector<1x128xf32>
    %302 = vector.broadcast %301 : vector<1x128xf32> to vector<16x128xf32>
    %303 = arith.addf %300, %302 : vector<16x128xf32>
    %c0_118 = arith.constant 0 : index
    %c0_119 = arith.constant 0 : index
    %304 = vector.load %arg20[%c0_118, %c0_119] : memref<1x128xf32, #tpu.memory_space<vmem>>, vector<1x128xf32>
    %c0_120 = arith.constant 0 : index
    %c0_121 = arith.constant 0 : index
    %305 = vector.load %arg21[%c0_120, %c0_121] : memref<1x128xf32, #tpu.memory_space<vmem>>, vector<1x128xf32>
    %cst_122 = arith.constant dense<0.000000e+00> : vector<16xf32>
    %306 = vector.multi_reduction <add>, %303, %cst_122 [1] : vector<16x128xf32> to vector<16xf32>
    %307 = vector.shape_cast %306 : vector<16xf32> to vector<16x1xf32>
    %cst_123 = arith.constant 1.280000e+02 : f32
    %308 = vector.broadcast %cst_123 : f32 to vector<16x1xf32>
    %309 = arith.divf %307, %308 : vector<16x1xf32>
    %310 = vector.broadcast %309 : vector<16x1xf32> to vector<16x128xf32>
    %311 = arith.subf %303, %310 : vector<16x128xf32>
    %312 = arith.mulf %311, %311 : vector<16x128xf32>
    %cst_124 = arith.constant dense<0.000000e+00> : vector<16xf32>
    %313 = vector.multi_reduction <add>, %312, %cst_124 [1] : vector<16x128xf32> to vector<16xf32>
    %314 = vector.shape_cast %313 : vector<16xf32> to vector<16x1xf32>
    %cst_125 = arith.constant 1.280000e+02 : f32
    %315 = vector.broadcast %cst_125 : f32 to vector<16x1xf32>
    %316 = arith.divf %314, %315 : vector<16x1xf32>
    %317 = vector.broadcast %309 : vector<16x1xf32> to vector<16x128xf32>
    %318 = arith.subf %303, %317 : vector<16x128xf32>
    %cst_126 = arith.constant 9.99999974E-6 : f32
    %319 = vector.broadcast %cst_126 : f32 to vector<16x1xf32>
    %320 = arith.addf %316, %319 : vector<16x1xf32>
    %321 = math.rsqrt %320 : vector<16x1xf32>
    %322 = vector.broadcast %321 : vector<16x1xf32> to vector<16x128xf32>
    %323 = arith.mulf %318, %322 : vector<16x128xf32>
    %324 = vector.broadcast %304 : vector<1x128xf32> to vector<16x128xf32>
    %325 = arith.mulf %323, %324 : vector<16x128xf32>
    %326 = vector.broadcast %305 : vector<1x128xf32> to vector<16x128xf32>
    %327 = arith.addf %325, %326 : vector<16x128xf32>
    %c0_127 = arith.constant 0 : index
    %c0_128 = arith.constant 0 : index
    %328 = vector.load %arg22[%c0_127, %c0_128] : memref<128x384xbf16, #tpu.memory_space<vmem>>, vector<128x384xbf16>
    %329 = arith.truncf %327 : vector<16x128xf32> to vector<16x128xbf16>
    %cst_129 = arith.constant dense<0.000000e+00> : vector<16x384xf32>
    %330 = tpu.matmul %329, %328, %cst_129 {dimension_numbers = #tpu.dot_dimension_numbers<[1], [0], [0], [1], [0, 0, 1, 1], [], []>} : vector<16x128xbf16>, vector<128x384xbf16>, vector<16x384xf32> -> vector<16x384xf32>
    %c0_130 = arith.constant 0 : index
    %c0_131 = arith.constant 0 : index
    %331 = vector.load %arg23[%c0_130, %c0_131] : memref<1x384xf32, #tpu.memory_space<vmem>>, vector<1x384xf32>
    %332 = vector.broadcast %331 : vector<1x384xf32> to vector<16x384xf32>
    %333 = arith.addf %330, %332 : vector<16x384xf32>
    %334 = vector.extract_strided_slice %333 {offsets = [0, 0], sizes = [8, 16], strides = [1, 1]} : vector<16x384xf32> to vector<8x16xf32>
    %335 = arith.truncf %334 : vector<8x16xf32> to vector<8x16xbf16>
    %336 = vector.extract_strided_slice %333 {offsets = [0, 128], sizes = [8, 16], strides = [1, 1]} : vector<16x384xf32> to vector<8x16xf32>
    %337 = arith.truncf %336 : vector<8x16xf32> to vector<8x16xbf16>
    %338 = vector.extract_strided_slice %333 {offsets = [0, 256], sizes = [8, 16], strides = [1, 1]} : vector<16x384xf32> to vector<8x16xf32>
    %339 = arith.truncf %338 : vector<8x16xf32> to vector<8x16xbf16>
    %cst_132 = arith.constant dense<0.000000e+00> : vector<8x8xf32>
    %340 = tpu.matmul %335, %337, %cst_132 {dimension_numbers = #tpu.dot_dimension_numbers<[1], [1], [0], [0], [0, 0, 1, 0], [], []>} : vector<8x16xbf16>, vector<8x16xbf16>, vector<8x8xf32> -> vector<8x8xf32>
    %cst_133 = arith.constant dense<0xFF800000> : vector<8xf32>
    %341 = vector.multi_reduction <maximumf>, %340, %cst_133 [1] : vector<8x8xf32> to vector<8xf32>
    %342 = vector.shape_cast %341 : vector<8xf32> to vector<8x1xf32>
    %343 = vector.broadcast %342 : vector<8x1xf32> to vector<8x8xf32>
    %344 = arith.subf %340, %343 : vector<8x8xf32>
    %345 = math.exp %344 : vector<8x8xf32>
    %cst_134 = arith.constant dense<0.000000e+00> : vector<8xf32>
    %346 = vector.multi_reduction <add>, %345, %cst_134 [1] : vector<8x8xf32> to vector<8xf32>
    %347 = vector.shape_cast %346 : vector<8xf32> to vector<8x1xf32>
    %348 = tpu.reciprocal %347 {approx = true} : vector<8x1xf32> -> vector<8x1xf32>
    %349 = vector.broadcast %348 : vector<8x1xf32> to vector<8x8xf32>
    %350 = arith.mulf %345, %349 : vector<8x8xf32>
    %351 = arith.truncf %350 : vector<8x8xf32> to vector<8x8xbf16>
    %cst_135 = arith.constant dense<0.000000e+00> : vector<8x16xf32>
    %352 = tpu.matmul %351, %339, %cst_135 {dimension_numbers = #tpu.dot_dimension_numbers<[1], [0], [0], [1], [0, 0, 1, 1], [], []>} : vector<8x8xbf16>, vector<8x16xbf16>, vector<8x16xf32> -> vector<8x16xf32>
    %c0_136 = arith.constant 0 : index
    %c0_137 = arith.constant 0 : index
    %353 = vector.load %arg30[%c0_136, %c0_137] : memref<16x128xf32, #tpu.memory_space<vmem>>, vector<8x16xf32>
    tpu.vector_store %arg30[%c0_136, %c0_137], %352 {strides = array<i32>} : memref<16x128xf32, #tpu.memory_space<vmem>>, vector<8x16xf32>,
    %354 = vector.extract_strided_slice %333 {offsets = [0, 16], sizes = [8, 16], strides = [1, 1]} : vector<16x384xf32> to vector<8x16xf32>
    %355 = arith.truncf %354 : vector<8x16xf32> to vector<8x16xbf16>
    %356 = vector.extract_strided_slice %333 {offsets = [0, 144], sizes = [8, 16], strides = [1, 1]} : vector<16x384xf32> to vector<8x16xf32>
    %357 = arith.truncf %356 : vector<8x16xf32> to vector<8x16xbf16>
    %358 = vector.extract_strided_slice %333 {offsets = [0, 272], sizes = [8, 16], strides = [1, 1]} : vector<16x384xf32> to vector<8x16xf32>
    %359 = arith.truncf %358 : vector<8x16xf32> to vector<8x16xbf16>
    %cst_138 = arith.constant dense<0.000000e+00> : vector<8x8xf32>
    %360 = tpu.matmul %355, %357, %cst_138 {dimension_numbers = #tpu.dot_dimension_numbers<[1], [1], [0], [0], [0, 0, 1, 0], [], []>} : vector<8x16xbf16>, vector<8x16xbf16>, vector<8x8xf32> -> vector<8x8xf32>
    %cst_139 = arith.constant dense<0xFF800000> : vector<8xf32>
    %361 = vector.multi_reduction <maximumf>, %360, %cst_139 [1] : vector<8x8xf32> to vector<8xf32>
    %362 = vector.shape_cast %361 : vector<8xf32> to vector<8x1xf32>
    %363 = vector.broadcast %362 : vector<8x1xf32> to vector<8x8xf32>
    %364 = arith.subf %360, %363 : vector<8x8xf32>
    %365 = math.exp %364 : vector<8x8xf32>
    %cst_140 = arith.constant dense<0.000000e+00> : vector<8xf32>
    %366 = vector.multi_reduction <add>, %365, %cst_140 [1] : vector<8x8xf32> to vector<8xf32>
    %367 = vector.shape_cast %366 : vector<8xf32> to vector<8x1xf32>
    %368 = tpu.reciprocal %367 {approx = true} : vector<8x1xf32> -> vector<8x1xf32>
    %369 = vector.broadcast %368 : vector<8x1xf32> to vector<8x8xf32>
    %370 = arith.mulf %365, %369 : vector<8x8xf32>
    %371 = arith.truncf %370 : vector<8x8xf32> to vector<8x8xbf16>
    %cst_141 = arith.constant dense<0.000000e+00> : vector<8x16xf32>
    %372 = tpu.matmul %371, %359, %cst_141 {dimension_numbers = #tpu.dot_dimension_numbers<[1], [0], [0], [1], [0, 0, 1, 1], [], []>} : vector<8x8xbf16>, vector<8x16xbf16>, vector<8x16xf32> -> vector<8x16xf32>
    %c0_142 = arith.constant 0 : index
    %c16 = arith.constant 16 : index
    %373 = vector.load %arg30[%c0_142, %c16] : memref<16x128xf32, #tpu.memory_space<vmem>>, vector<8x16xf32>
    tpu.vector_store %arg30[%c0_142, %c16], %372 {strides = array<i32>} : memref<16x128xf32, #tpu.memory_space<vmem>>, vector<8x16xf32>,
    %374 = vector.extract_strided_slice %333 {offsets = [0, 32], sizes = [8, 16], strides = [1, 1]} : vector<16x384xf32> to vector<8x16xf32>
    %375 = arith.truncf %374 : vector<8x16xf32> to vector<8x16xbf16>
    %376 = vector.extract_strided_slice %333 {offsets = [0, 160], sizes = [8, 16], strides = [1, 1]} : vector<16x384xf32> to vector<8x16xf32>
    %377 = arith.truncf %376 : vector<8x16xf32> to vector<8x16xbf16>
    %378 = vector.extract_strided_slice %333 {offsets = [0, 288], sizes = [8, 16], strides = [1, 1]} : vector<16x384xf32> to vector<8x16xf32>
    %379 = arith.truncf %378 : vector<8x16xf32> to vector<8x16xbf16>
    %cst_143 = arith.constant dense<0.000000e+00> : vector<8x8xf32>
    %380 = tpu.matmul %375, %377, %cst_143 {dimension_numbers = #tpu.dot_dimension_numbers<[1], [1], [0], [0], [0, 0, 1, 0], [], []>} : vector<8x16xbf16>, vector<8x16xbf16>, vector<8x8xf32> -> vector<8x8xf32>
    %cst_144 = arith.constant dense<0xFF800000> : vector<8xf32>
    %381 = vector.multi_reduction <maximumf>, %380, %cst_144 [1] : vector<8x8xf32> to vector<8xf32>
    %382 = vector.shape_cast %381 : vector<8xf32> to vector<8x1xf32>
    %383 = vector.broadcast %382 : vector<8x1xf32> to vector<8x8xf32>
    %384 = arith.subf %380, %383 : vector<8x8xf32>
    %385 = math.exp %384 : vector<8x8xf32>
    %cst_145 = arith.constant dense<0.000000e+00> : vector<8xf32>
    %386 = vector.multi_reduction <add>, %385, %cst_145 [1] : vector<8x8xf32> to vector<8xf32>
    %387 = vector.shape_cast %386 : vector<8xf32> to vector<8x1xf32>
    %388 = tpu.reciprocal %387 {approx = true} : vector<8x1xf32> -> vector<8x1xf32>
    %389 = vector.broadcast %388 : vector<8x1xf32> to vector<8x8xf32>
    %390 = arith.mulf %385, %389 : vector<8x8xf32>
    %391 = arith.truncf %390 : vector<8x8xf32> to vector<8x8xbf16>
    %cst_146 = arith.constant dense<0.000000e+00> : vector<8x16xf32>
    %392 = tpu.matmul %391, %379, %cst_146 {dimension_numbers = #tpu.dot_dimension_numbers<[1], [0], [0], [1], [0, 0, 1, 1], [], []>} : vector<8x8xbf16>, vector<8x16xbf16>, vector<8x16xf32> -> vector<8x16xf32>
    %c0_147 = arith.constant 0 : index
    %c32_148 = arith.constant 32 : index
    %393 = vector.load %arg30[%c0_147, %c32_148] : memref<16x128xf32, #tpu.memory_space<vmem>>, vector<8x16xf32>
    tpu.vector_store %arg30[%c0_147, %c32_148], %392 {strides = array<i32>} : memref<16x128xf32, #tpu.memory_space<vmem>>, vector<8x16xf32>,
    %394 = vector.extract_strided_slice %333 {offsets = [0, 48], sizes = [8, 16], strides = [1, 1]} : vector<16x384xf32> to vector<8x16xf32>
    %395 = arith.truncf %394 : vector<8x16xf32> to vector<8x16xbf16>
    %396 = vector.extract_strided_slice %333 {offsets = [0, 176], sizes = [8, 16], strides = [1, 1]} : vector<16x384xf32> to vector<8x16xf32>
    %397 = arith.truncf %396 : vector<8x16xf32> to vector<8x16xbf16>
    %398 = vector.extract_strided_slice %333 {offsets = [0, 304], sizes = [8, 16], strides = [1, 1]} : vector<16x384xf32> to vector<8x16xf32>
    %399 = arith.truncf %398 : vector<8x16xf32> to vector<8x16xbf16>
    %cst_149 = arith.constant dense<0.000000e+00> : vector<8x8xf32>
    %400 = tpu.matmul %395, %397, %cst_149 {dimension_numbers = #tpu.dot_dimension_numbers<[1], [1], [0], [0], [0, 0, 1, 0], [], []>} : vector<8x16xbf16>, vector<8x16xbf16>, vector<8x8xf32> -> vector<8x8xf32>
    %cst_150 = arith.constant dense<0xFF800000> : vector<8xf32>
    %401 = vector.multi_reduction <maximumf>, %400, %cst_150 [1] : vector<8x8xf32> to vector<8xf32>
    %402 = vector.shape_cast %401 : vector<8xf32> to vector<8x1xf32>
    %403 = vector.broadcast %402 : vector<8x1xf32> to vector<8x8xf32>
    %404 = arith.subf %400, %403 : vector<8x8xf32>
    %405 = math.exp %404 : vector<8x8xf32>
    %cst_151 = arith.constant dense<0.000000e+00> : vector<8xf32>
    %406 = vector.multi_reduction <add>, %405, %cst_151 [1] : vector<8x8xf32> to vector<8xf32>
    %407 = vector.shape_cast %406 : vector<8xf32> to vector<8x1xf32>
    %408 = tpu.reciprocal %407 {approx = true} : vector<8x1xf32> -> vector<8x1xf32>
    %409 = vector.broadcast %408 : vector<8x1xf32> to vector<8x8xf32>
    %410 = arith.mulf %405, %409 : vector<8x8xf32>
    %411 = arith.truncf %410 : vector<8x8xf32> to vector<8x8xbf16>
    %cst_152 = arith.constant dense<0.000000e+00> : vector<8x16xf32>
    %412 = tpu.matmul %411, %399, %cst_152 {dimension_numbers = #tpu.dot_dimension_numbers<[1], [0], [0], [1], [0, 0, 1, 1], [], []>} : vector<8x8xbf16>, vector<8x16xbf16>, vector<8x16xf32> -> vector<8x16xf32>
    %c0_153 = arith.constant 0 : index
    %c48 = arith.constant 48 : index
    %413 = vector.load %arg30[%c0_153, %c48] : memref<16x128xf32, #tpu.memory_space<vmem>>, vector<8x16xf32>
    tpu.vector_store %arg30[%c0_153, %c48], %412 {strides = array<i32>} : memref<16x128xf32, #tpu.memory_space<vmem>>, vector<8x16xf32>,
    %414 = vector.extract_strided_slice %333 {offsets = [0, 64], sizes = [8, 16], strides = [1, 1]} : vector<16x384xf32> to vector<8x16xf32>
    %415 = arith.truncf %414 : vector<8x16xf32> to vector<8x16xbf16>
    %416 = vector.extract_strided_slice %333 {offsets = [0, 192], sizes = [8, 16], strides = [1, 1]} : vector<16x384xf32> to vector<8x16xf32>
    %417 = arith.truncf %416 : vector<8x16xf32> to vector<8x16xbf16>
    %418 = vector.extract_strided_slice %333 {offsets = [0, 320], sizes = [8, 16], strides = [1, 1]} : vector<16x384xf32> to vector<8x16xf32>
    %419 = arith.truncf %418 : vector<8x16xf32> to vector<8x16xbf16>
    %cst_154 = arith.constant dense<0.000000e+00> : vector<8x8xf32>
    %420 = tpu.matmul %415, %417, %cst_154 {dimension_numbers = #tpu.dot_dimension_numbers<[1], [1], [0], [0], [0, 0, 1, 0], [], []>} : vector<8x16xbf16>, vector<8x16xbf16>, vector<8x8xf32> -> vector<8x8xf32>
    %cst_155 = arith.constant dense<0xFF800000> : vector<8xf32>
    %421 = vector.multi_reduction <maximumf>, %420, %cst_155 [1] : vector<8x8xf32> to vector<8xf32>
    %422 = vector.shape_cast %421 : vector<8xf32> to vector<8x1xf32>
    %423 = vector.broadcast %422 : vector<8x1xf32> to vector<8x8xf32>
    %424 = arith.subf %420, %423 : vector<8x8xf32>
    %425 = math.exp %424 : vector<8x8xf32>
    %cst_156 = arith.constant dense<0.000000e+00> : vector<8xf32>
    %426 = vector.multi_reduction <add>, %425, %cst_156 [1] : vector<8x8xf32> to vector<8xf32>
    %427 = vector.shape_cast %426 : vector<8xf32> to vector<8x1xf32>
    %428 = tpu.reciprocal %427 {approx = true} : vector<8x1xf32> -> vector<8x1xf32>
    %429 = vector.broadcast %428 : vector<8x1xf32> to vector<8x8xf32>
    %430 = arith.mulf %425, %429 : vector<8x8xf32>
    %431 = arith.truncf %430 : vector<8x8xf32> to vector<8x8xbf16>
    %cst_157 = arith.constant dense<0.000000e+00> : vector<8x16xf32>
    %432 = tpu.matmul %431, %419, %cst_157 {dimension_numbers = #tpu.dot_dimension_numbers<[1], [0], [0], [1], [0, 0, 1, 1], [], []>} : vector<8x8xbf16>, vector<8x16xbf16>, vector<8x16xf32> -> vector<8x16xf32>
    %c0_158 = arith.constant 0 : index
    %c64_159 = arith.constant 64 : index
    %433 = vector.load %arg30[%c0_158, %c64_159] : memref<16x128xf32, #tpu.memory_space<vmem>>, vector<8x16xf32>
    tpu.vector_store %arg30[%c0_158, %c64_159], %432 {strides = array<i32>} : memref<16x128xf32, #tpu.memory_space<vmem>>, vector<8x16xf32>,
    %434 = vector.extract_strided_slice %333 {offsets = [0, 80], sizes = [8, 16], strides = [1, 1]} : vector<16x384xf32> to vector<8x16xf32>
    %435 = arith.truncf %434 : vector<8x16xf32> to vector<8x16xbf16>
    %436 = vector.extract_strided_slice %333 {offsets = [0, 208], sizes = [8, 16], strides = [1, 1]} : vector<16x384xf32> to vector<8x16xf32>
    %437 = arith.truncf %436 : vector<8x16xf32> to vector<8x16xbf16>
    %438 = vector.extract_strided_slice %333 {offsets = [0, 336], sizes = [8, 16], strides = [1, 1]} : vector<16x384xf32> to vector<8x16xf32>
    %439 = arith.truncf %438 : vector<8x16xf32> to vector<8x16xbf16>
    %cst_160 = arith.constant dense<0.000000e+00> : vector<8x8xf32>
    %440 = tpu.matmul %435, %437, %cst_160 {dimension_numbers = #tpu.dot_dimension_numbers<[1], [1], [0], [0], [0, 0, 1, 0], [], []>} : vector<8x16xbf16>, vector<8x16xbf16>, vector<8x8xf32> -> vector<8x8xf32>
    %cst_161 = arith.constant dense<0xFF800000> : vector<8xf32>
    %441 = vector.multi_reduction <maximumf>, %440, %cst_161 [1] : vector<8x8xf32> to vector<8xf32>
    %442 = vector.shape_cast %441 : vector<8xf32> to vector<8x1xf32>
    %443 = vector.broadcast %442 : vector<8x1xf32> to vector<8x8xf32>
    %444 = arith.subf %440, %443 : vector<8x8xf32>
    %445 = math.exp %444 : vector<8x8xf32>
    %cst_162 = arith.constant dense<0.000000e+00> : vector<8xf32>
    %446 = vector.multi_reduction <add>, %445, %cst_162 [1] : vector<8x8xf32> to vector<8xf32>
    %447 = vector.shape_cast %446 : vector<8xf32> to vector<8x1xf32>
    %448 = tpu.reciprocal %447 {approx = true} : vector<8x1xf32> -> vector<8x1xf32>
    %449 = vector.broadcast %448 : vector<8x1xf32> to vector<8x8xf32>
    %450 = arith.mulf %445, %449 : vector<8x8xf32>
    %451 = arith.truncf %450 : vector<8x8xf32> to vector<8x8xbf16>
    %cst_163 = arith.constant dense<0.000000e+00> : vector<8x16xf32>
    %452 = tpu.matmul %451, %439, %cst_163 {dimension_numbers = #tpu.dot_dimension_numbers<[1], [0], [0], [1], [0, 0, 1, 1], [], []>} : vector<8x8xbf16>, vector<8x16xbf16>, vector<8x16xf32> -> vector<8x16xf32>
    %c0_164 = arith.constant 0 : index
    %c80 = arith.constant 80 : index
    %453 = vector.load %arg30[%c0_164, %c80] : memref<16x128xf32, #tpu.memory_space<vmem>>, vector<8x16xf32>
    tpu.vector_store %arg30[%c0_164, %c80], %452 {strides = array<i32>} : memref<16x128xf32, #tpu.memory_space<vmem>>, vector<8x16xf32>,
    %454 = vector.extract_strided_slice %333 {offsets = [0, 96], sizes = [8, 16], strides = [1, 1]} : vector<16x384xf32> to vector<8x16xf32>
    %455 = arith.truncf %454 : vector<8x16xf32> to vector<8x16xbf16>
    %456 = vector.extract_strided_slice %333 {offsets = [0, 224], sizes = [8, 16], strides = [1, 1]} : vector<16x384xf32> to vector<8x16xf32>
    %457 = arith.truncf %456 : vector<8x16xf32> to vector<8x16xbf16>
    %458 = vector.extract_strided_slice %333 {offsets = [0, 352], sizes = [8, 16], strides = [1, 1]} : vector<16x384xf32> to vector<8x16xf32>
    %459 = arith.truncf %458 : vector<8x16xf32> to vector<8x16xbf16>
    %cst_165 = arith.constant dense<0.000000e+00> : vector<8x8xf32>
    %460 = tpu.matmul %455, %457, %cst_165 {dimension_numbers = #tpu.dot_dimension_numbers<[1], [1], [0], [0], [0, 0, 1, 0], [], []>} : vector<8x16xbf16>, vector<8x16xbf16>, vector<8x8xf32> -> vector<8x8xf32>
    %cst_166 = arith.constant dense<0xFF800000> : vector<8xf32>
    %461 = vector.multi_reduction <maximumf>, %460, %cst_166 [1] : vector<8x8xf32> to vector<8xf32>
    %462 = vector.shape_cast %461 : vector<8xf32> to vector<8x1xf32>
    %463 = vector.broadcast %462 : vector<8x1xf32> to vector<8x8xf32>
    %464 = arith.subf %460, %463 : vector<8x8xf32>
    %465 = math.exp %464 : vector<8x8xf32>
    %cst_167 = arith.constant dense<0.000000e+00> : vector<8xf32>
    %466 = vector.multi_reduction <add>, %465, %cst_167 [1] : vector<8x8xf32> to vector<8xf32>
    %467 = vector.shape_cast %466 : vector<8xf32> to vector<8x1xf32>
    %468 = tpu.reciprocal %467 {approx = true} : vector<8x1xf32> -> vector<8x1xf32>
    %469 = vector.broadcast %468 : vector<8x1xf32> to vector<8x8xf32>
    %470 = arith.mulf %465, %469 : vector<8x8xf32>
    %471 = arith.truncf %470 : vector<8x8xf32> to vector<8x8xbf16>
    %cst_168 = arith.constant dense<0.000000e+00> : vector<8x16xf32>
    %472 = tpu.matmul %471, %459, %cst_168 {dimension_numbers = #tpu.dot_dimension_numbers<[1], [0], [0], [1], [0, 0, 1, 1], [], []>} : vector<8x8xbf16>, vector<8x16xbf16>, vector<8x16xf32> -> vector<8x16xf32>
    %c0_169 = arith.constant 0 : index
    %c96_170 = arith.constant 96 : index
    %473 = vector.load %arg30[%c0_169, %c96_170] : memref<16x128xf32, #tpu.memory_space<vmem>>, vector<8x16xf32>
    tpu.vector_store %arg30[%c0_169, %c96_170], %472 {strides = array<i32>} : memref<16x128xf32, #tpu.memory_space<vmem>>, vector<8x16xf32>,
    %474 = vector.extract_strided_slice %333 {offsets = [0, 112], sizes = [8, 16], strides = [1, 1]} : vector<16x384xf32> to vector<8x16xf32>
    %475 = arith.truncf %474 : vector<8x16xf32> to vector<8x16xbf16>
    %476 = vector.extract_strided_slice %333 {offsets = [0, 240], sizes = [8, 16], strides = [1, 1]} : vector<16x384xf32> to vector<8x16xf32>
    %477 = arith.truncf %476 : vector<8x16xf32> to vector<8x16xbf16>
    %478 = vector.extract_strided_slice %333 {offsets = [0, 368], sizes = [8, 16], strides = [1, 1]} : vector<16x384xf32> to vector<8x16xf32>
    %479 = arith.truncf %478 : vector<8x16xf32> to vector<8x16xbf16>
    %cst_171 = arith.constant dense<0.000000e+00> : vector<8x8xf32>
    %480 = tpu.matmul %475, %477, %cst_171 {dimension_numbers = #tpu.dot_dimension_numbers<[1], [1], [0], [0], [0, 0, 1, 0], [], []>} : vector<8x16xbf16>, vector<8x16xbf16>, vector<8x8xf32> -> vector<8x8xf32>
    %cst_172 = arith.constant dense<0xFF800000> : vector<8xf32>
    %481 = vector.multi_reduction <maximumf>, %480, %cst_172 [1] : vector<8x8xf32> to vector<8xf32>
    %482 = vector.shape_cast %481 : vector<8xf32> to vector<8x1xf32>
    %483 = vector.broadcast %482 : vector<8x1xf32> to vector<8x8xf32>
    %484 = arith.subf %480, %483 : vector<8x8xf32>
    %485 = math.exp %484 : vector<8x8xf32>
    %cst_173 = arith.constant dense<0.000000e+00> : vector<8xf32>
    %486 = vector.multi_reduction <add>, %485, %cst_173 [1] : vector<8x8xf32> to vector<8xf32>
    %487 = vector.shape_cast %486 : vector<8xf32> to vector<8x1xf32>
    %488 = tpu.reciprocal %487 {approx = true} : vector<8x1xf32> -> vector<8x1xf32>
    %489 = vector.broadcast %488 : vector<8x1xf32> to vector<8x8xf32>
    %490 = arith.mulf %485, %489 : vector<8x8xf32>
    %491 = arith.truncf %490 : vector<8x8xf32> to vector<8x8xbf16>
    %cst_174 = arith.constant dense<0.000000e+00> : vector<8x16xf32>
    %492 = tpu.matmul %491, %479, %cst_174 {dimension_numbers = #tpu.dot_dimension_numbers<[1], [0], [0], [1], [0, 0, 1, 1], [], []>} : vector<8x8xbf16>, vector<8x16xbf16>, vector<8x16xf32> -> vector<8x16xf32>
    %c0_175 = arith.constant 0 : index
    %c112 = arith.constant 112 : index
    %493 = vector.load %arg30[%c0_175, %c112] : memref<16x128xf32, #tpu.memory_space<vmem>>, vector<8x16xf32>
    tpu.vector_store %arg30[%c0_175, %c112], %492 {strides = array<i32>} : memref<16x128xf32, #tpu.memory_space<vmem>>, vector<8x16xf32>,
    %494 = vector.extract_strided_slice %333 {offsets = [8, 0], sizes = [8, 16], strides = [1, 1]} : vector<16x384xf32> to vector<8x16xf32>
    %495 = arith.truncf %494 : vector<8x16xf32> to vector<8x16xbf16>
    %496 = vector.extract_strided_slice %333 {offsets = [8, 128], sizes = [8, 16], strides = [1, 1]} : vector<16x384xf32> to vector<8x16xf32>
    %497 = arith.truncf %496 : vector<8x16xf32> to vector<8x16xbf16>
    %498 = vector.extract_strided_slice %333 {offsets = [8, 256], sizes = [8, 16], strides = [1, 1]} : vector<16x384xf32> to vector<8x16xf32>
    %499 = arith.truncf %498 : vector<8x16xf32> to vector<8x16xbf16>
    %cst_176 = arith.constant dense<0.000000e+00> : vector<8x8xf32>
    %500 = tpu.matmul %495, %497, %cst_176 {dimension_numbers = #tpu.dot_dimension_numbers<[1], [1], [0], [0], [0, 0, 1, 0], [], []>} : vector<8x16xbf16>, vector<8x16xbf16>, vector<8x8xf32> -> vector<8x8xf32>
    %cst_177 = arith.constant dense<0xFF800000> : vector<8xf32>
    %501 = vector.multi_reduction <maximumf>, %500, %cst_177 [1] : vector<8x8xf32> to vector<8xf32>
    %502 = vector.shape_cast %501 : vector<8xf32> to vector<8x1xf32>
    %503 = vector.broadcast %502 : vector<8x1xf32> to vector<8x8xf32>
    %504 = arith.subf %500, %503 : vector<8x8xf32>
    %505 = math.exp %504 : vector<8x8xf32>
    %cst_178 = arith.constant dense<0.000000e+00> : vector<8xf32>
    %506 = vector.multi_reduction <add>, %505, %cst_178 [1] : vector<8x8xf32> to vector<8xf32>
    %507 = vector.shape_cast %506 : vector<8xf32> to vector<8x1xf32>
    %508 = tpu.reciprocal %507 {approx = true} : vector<8x1xf32> -> vector<8x1xf32>
    %509 = vector.broadcast %508 : vector<8x1xf32> to vector<8x8xf32>
    %510 = arith.mulf %505, %509 : vector<8x8xf32>
    %511 = arith.truncf %510 : vector<8x8xf32> to vector<8x8xbf16>
    %cst_179 = arith.constant dense<0.000000e+00> : vector<8x16xf32>
    %512 = tpu.matmul %511, %499, %cst_179 {dimension_numbers = #tpu.dot_dimension_numbers<[1], [0], [0], [1], [0, 0, 1, 1], [], []>} : vector<8x8xbf16>, vector<8x16xbf16>, vector<8x16xf32> -> vector<8x16xf32>
    %c8_180 = arith.constant 8 : index
    %c0_181 = arith.constant 0 : index
    %513 = vector.load %arg30[%c8_180, %c0_181] : memref<16x128xf32, #tpu.memory_space<vmem>>, vector<8x16xf32>
    tpu.vector_store %arg30[%c8_180, %c0_181], %512 {strides = array<i32>} : memref<16x128xf32, #tpu.memory_space<vmem>>, vector<8x16xf32>,
    %514 = vector.extract_strided_slice %333 {offsets = [8, 16], sizes = [8, 16], strides = [1, 1]} : vector<16x384xf32> to vector<8x16xf32>
    %515 = arith.truncf %514 : vector<8x16xf32> to vector<8x16xbf16>
    %516 = vector.extract_strided_slice %333 {offsets = [8, 144], sizes = [8, 16], strides = [1, 1]} : vector<16x384xf32> to vector<8x16xf32>
    %517 = arith.truncf %516 : vector<8x16xf32> to vector<8x16xbf16>
    %518 = vector.extract_strided_slice %333 {offsets = [8, 272], sizes = [8, 16], strides = [1, 1]} : vector<16x384xf32> to vector<8x16xf32>
    %519 = arith.truncf %518 : vector<8x16xf32> to vector<8x16xbf16>
    %cst_182 = arith.constant dense<0.000000e+00> : vector<8x8xf32>
    %520 = tpu.matmul %515, %517, %cst_182 {dimension_numbers = #tpu.dot_dimension_numbers<[1], [1], [0], [0], [0, 0, 1, 0], [], []>} : vector<8x16xbf16>, vector<8x16xbf16>, vector<8x8xf32> -> vector<8x8xf32>
    %cst_183 = arith.constant dense<0xFF800000> : vector<8xf32>
    %521 = vector.multi_reduction <maximumf>, %520, %cst_183 [1] : vector<8x8xf32> to vector<8xf32>
    %522 = vector.shape_cast %521 : vector<8xf32> to vector<8x1xf32>
    %523 = vector.broadcast %522 : vector<8x1xf32> to vector<8x8xf32>
    %524 = arith.subf %520, %523 : vector<8x8xf32>
    %525 = math.exp %524 : vector<8x8xf32>
    %cst_184 = arith.constant dense<0.000000e+00> : vector<8xf32>
    %526 = vector.multi_reduction <add>, %525, %cst_184 [1] : vector<8x8xf32> to vector<8xf32>
    %527 = vector.shape_cast %526 : vector<8xf32> to vector<8x1xf32>
    %528 = tpu.reciprocal %527 {approx = true} : vector<8x1xf32> -> vector<8x1xf32>
    %529 = vector.broadcast %528 : vector<8x1xf32> to vector<8x8xf32>
    %530 = arith.mulf %525, %529 : vector<8x8xf32>
    %531 = arith.truncf %530 : vector<8x8xf32> to vector<8x8xbf16>
    %cst_185 = arith.constant dense<0.000000e+00> : vector<8x16xf32>
    %532 = tpu.matmul %531, %519, %cst_185 {dimension_numbers = #tpu.dot_dimension_numbers<[1], [0], [0], [1], [0, 0, 1, 1], [], []>} : vector<8x8xbf16>, vector<8x16xbf16>, vector<8x16xf32> -> vector<8x16xf32>
    %c8_186 = arith.constant 8 : index
    %c16_187 = arith.constant 16 : index
    %533 = vector.load %arg30[%c8_186, %c16_187] : memref<16x128xf32, #tpu.memory_space<vmem>>, vector<8x16xf32>
    tpu.vector_store %arg30[%c8_186, %c16_187], %532 {strides = array<i32>} : memref<16x128xf32, #tpu.memory_space<vmem>>, vector<8x16xf32>,
    %534 = vector.extract_strided_slice %333 {offsets = [8, 32], sizes = [8, 16], strides = [1, 1]} : vector<16x384xf32> to vector<8x16xf32>
    %535 = arith.truncf %534 : vector<8x16xf32> to vector<8x16xbf16>
    %536 = vector.extract_strided_slice %333 {offsets = [8, 160], sizes = [8, 16], strides = [1, 1]} : vector<16x384xf32> to vector<8x16xf32>
    %537 = arith.truncf %536 : vector<8x16xf32> to vector<8x16xbf16>
    %538 = vector.extract_strided_slice %333 {offsets = [8, 288], sizes = [8, 16], strides = [1, 1]} : vector<16x384xf32> to vector<8x16xf32>
    %539 = arith.truncf %538 : vector<8x16xf32> to vector<8x16xbf16>
    %cst_188 = arith.constant dense<0.000000e+00> : vector<8x8xf32>
    %540 = tpu.matmul %535, %537, %cst_188 {dimension_numbers = #tpu.dot_dimension_numbers<[1], [1], [0], [0], [0, 0, 1, 0], [], []>} : vector<8x16xbf16>, vector<8x16xbf16>, vector<8x8xf32> -> vector<8x8xf32>
    %cst_189 = arith.constant dense<0xFF800000> : vector<8xf32>
    %541 = vector.multi_reduction <maximumf>, %540, %cst_189 [1] : vector<8x8xf32> to vector<8xf32>
    %542 = vector.shape_cast %541 : vector<8xf32> to vector<8x1xf32>
    %543 = vector.broadcast %542 : vector<8x1xf32> to vector<8x8xf32>
    %544 = arith.subf %540, %543 : vector<8x8xf32>
    %545 = math.exp %544 : vector<8x8xf32>
    %cst_190 = arith.constant dense<0.000000e+00> : vector<8xf32>
    %546 = vector.multi_reduction <add>, %545, %cst_190 [1] : vector<8x8xf32> to vector<8xf32>
    %547 = vector.shape_cast %546 : vector<8xf32> to vector<8x1xf32>
    %548 = tpu.reciprocal %547 {approx = true} : vector<8x1xf32> -> vector<8x1xf32>
    %549 = vector.broadcast %548 : vector<8x1xf32> to vector<8x8xf32>
    %550 = arith.mulf %545, %549 : vector<8x8xf32>
    %551 = arith.truncf %550 : vector<8x8xf32> to vector<8x8xbf16>
    %cst_191 = arith.constant dense<0.000000e+00> : vector<8x16xf32>
    %552 = tpu.matmul %551, %539, %cst_191 {dimension_numbers = #tpu.dot_dimension_numbers<[1], [0], [0], [1], [0, 0, 1, 1], [], []>} : vector<8x8xbf16>, vector<8x16xbf16>, vector<8x16xf32> -> vector<8x16xf32>
    %c8_192 = arith.constant 8 : index
    %c32_193 = arith.constant 32 : index
    %553 = vector.load %arg30[%c8_192, %c32_193] : memref<16x128xf32, #tpu.memory_space<vmem>>, vector<8x16xf32>
    tpu.vector_store %arg30[%c8_192, %c32_193], %552 {strides = array<i32>} : memref<16x128xf32, #tpu.memory_space<vmem>>, vector<8x16xf32>,
    %554 = vector.extract_strided_slice %333 {offsets = [8, 48], sizes = [8, 16], strides = [1, 1]} : vector<16x384xf32> to vector<8x16xf32>
    %555 = arith.truncf %554 : vector<8x16xf32> to vector<8x16xbf16>
    %556 = vector.extract_strided_slice %333 {offsets = [8, 176], sizes = [8, 16], strides = [1, 1]} : vector<16x384xf32> to vector<8x16xf32>
    %557 = arith.truncf %556 : vector<8x16xf32> to vector<8x16xbf16>
    %558 = vector.extract_strided_slice %333 {offsets = [8, 304], sizes = [8, 16], strides = [1, 1]} : vector<16x384xf32> to vector<8x16xf32>
    %559 = arith.truncf %558 : vector<8x16xf32> to vector<8x16xbf16>
    %cst_194 = arith.constant dense<0.000000e+00> : vector<8x8xf32>
    %560 = tpu.matmul %555, %557, %cst_194 {dimension_numbers = #tpu.dot_dimension_numbers<[1], [1], [0], [0], [0, 0, 1, 0], [], []>} : vector<8x16xbf16>, vector<8x16xbf16>, vector<8x8xf32> -> vector<8x8xf32>
    %cst_195 = arith.constant dense<0xFF800000> : vector<8xf32>
    %561 = vector.multi_reduction <maximumf>, %560, %cst_195 [1] : vector<8x8xf32> to vector<8xf32>
    %562 = vector.shape_cast %561 : vector<8xf32> to vector<8x1xf32>
    %563 = vector.broadcast %562 : vector<8x1xf32> to vector<8x8xf32>
    %564 = arith.subf %560, %563 : vector<8x8xf32>
    %565 = math.exp %564 : vector<8x8xf32>
    %cst_196 = arith.constant dense<0.000000e+00> : vector<8xf32>
    %566 = vector.multi_reduction <add>, %565, %cst_196 [1] : vector<8x8xf32> to vector<8xf32>
    %567 = vector.shape_cast %566 : vector<8xf32> to vector<8x1xf32>
    %568 = tpu.reciprocal %567 {approx = true} : vector<8x1xf32> -> vector<8x1xf32>
    %569 = vector.broadcast %568 : vector<8x1xf32> to vector<8x8xf32>
    %570 = arith.mulf %565, %569 : vector<8x8xf32>
    %571 = arith.truncf %570 : vector<8x8xf32> to vector<8x8xbf16>
    %cst_197 = arith.constant dense<0.000000e+00> : vector<8x16xf32>
    %572 = tpu.matmul %571, %559, %cst_197 {dimension_numbers = #tpu.dot_dimension_numbers<[1], [0], [0], [1], [0, 0, 1, 1], [], []>} : vector<8x8xbf16>, vector<8x16xbf16>, vector<8x16xf32> -> vector<8x16xf32>
    %c8_198 = arith.constant 8 : index
    %c48_199 = arith.constant 48 : index
    %573 = vector.load %arg30[%c8_198, %c48_199] : memref<16x128xf32, #tpu.memory_space<vmem>>, vector<8x16xf32>
    tpu.vector_store %arg30[%c8_198, %c48_199], %572 {strides = array<i32>} : memref<16x128xf32, #tpu.memory_space<vmem>>, vector<8x16xf32>,
    %574 = vector.extract_strided_slice %333 {offsets = [8, 64], sizes = [8, 16], strides = [1, 1]} : vector<16x384xf32> to vector<8x16xf32>
    %575 = arith.truncf %574 : vector<8x16xf32> to vector<8x16xbf16>
    %576 = vector.extract_strided_slice %333 {offsets = [8, 192], sizes = [8, 16], strides = [1, 1]} : vector<16x384xf32> to vector<8x16xf32>
    %577 = arith.truncf %576 : vector<8x16xf32> to vector<8x16xbf16>
    %578 = vector.extract_strided_slice %333 {offsets = [8, 320], sizes = [8, 16], strides = [1, 1]} : vector<16x384xf32> to vector<8x16xf32>
    %579 = arith.truncf %578 : vector<8x16xf32> to vector<8x16xbf16>
    %cst_200 = arith.constant dense<0.000000e+00> : vector<8x8xf32>
    %580 = tpu.matmul %575, %577, %cst_200 {dimension_numbers = #tpu.dot_dimension_numbers<[1], [1], [0], [0], [0, 0, 1, 0], [], []>} : vector<8x16xbf16>, vector<8x16xbf16>, vector<8x8xf32> -> vector<8x8xf32>
    %cst_201 = arith.constant dense<0xFF800000> : vector<8xf32>
    %581 = vector.multi_reduction <maximumf>, %580, %cst_201 [1] : vector<8x8xf32> to vector<8xf32>
    %582 = vector.shape_cast %581 : vector<8xf32> to vector<8x1xf32>
    %583 = vector.broadcast %582 : vector<8x1xf32> to vector<8x8xf32>
    %584 = arith.subf %580, %583 : vector<8x8xf32>
    %585 = math.exp %584 : vector<8x8xf32>
    %cst_202 = arith.constant dense<0.000000e+00> : vector<8xf32>
    %586 = vector.multi_reduction <add>, %585, %cst_202 [1] : vector<8x8xf32> to vector<8xf32>
    %587 = vector.shape_cast %586 : vector<8xf32> to vector<8x1xf32>
    %588 = tpu.reciprocal %587 {approx = true} : vector<8x1xf32> -> vector<8x1xf32>
    %589 = vector.broadcast %588 : vector<8x1xf32> to vector<8x8xf32>
    %590 = arith.mulf %585, %589 : vector<8x8xf32>
    %591 = arith.truncf %590 : vector<8x8xf32> to vector<8x8xbf16>
    %cst_203 = arith.constant dense<0.000000e+00> : vector<8x16xf32>
    %592 = tpu.matmul %591, %579, %cst_203 {dimension_numbers = #tpu.dot_dimension_numbers<[1], [0], [0], [1], [0, 0, 1, 1], [], []>} : vector<8x8xbf16>, vector<8x16xbf16>, vector<8x16xf32> -> vector<8x16xf32>
    %c8_204 = arith.constant 8 : index
    %c64_205 = arith.constant 64 : index
    %593 = vector.load %arg30[%c8_204, %c64_205] : memref<16x128xf32, #tpu.memory_space<vmem>>, vector<8x16xf32>
    tpu.vector_store %arg30[%c8_204, %c64_205], %592 {strides = array<i32>} : memref<16x128xf32, #tpu.memory_space<vmem>>, vector<8x16xf32>,
    %594 = vector.extract_strided_slice %333 {offsets = [8, 80], sizes = [8, 16], strides = [1, 1]} : vector<16x384xf32> to vector<8x16xf32>
    %595 = arith.truncf %594 : vector<8x16xf32> to vector<8x16xbf16>
    %596 = vector.extract_strided_slice %333 {offsets = [8, 208], sizes = [8, 16], strides = [1, 1]} : vector<16x384xf32> to vector<8x16xf32>
    %597 = arith.truncf %596 : vector<8x16xf32> to vector<8x16xbf16>
    %598 = vector.extract_strided_slice %333 {offsets = [8, 336], sizes = [8, 16], strides = [1, 1]} : vector<16x384xf32> to vector<8x16xf32>
    %599 = arith.truncf %598 : vector<8x16xf32> to vector<8x16xbf16>
    %cst_206 = arith.constant dense<0.000000e+00> : vector<8x8xf32>
    %600 = tpu.matmul %595, %597, %cst_206 {dimension_numbers = #tpu.dot_dimension_numbers<[1], [1], [0], [0], [0, 0, 1, 0], [], []>} : vector<8x16xbf16>, vector<8x16xbf16>, vector<8x8xf32> -> vector<8x8xf32>
    %cst_207 = arith.constant dense<0xFF800000> : vector<8xf32>
    %601 = vector.multi_reduction <maximumf>, %600, %cst_207 [1] : vector<8x8xf32> to vector<8xf32>
    %602 = vector.shape_cast %601 : vector<8xf32> to vector<8x1xf32>
    %603 = vector.broadcast %602 : vector<8x1xf32> to vector<8x8xf32>
    %604 = arith.subf %600, %603 : vector<8x8xf32>
    %605 = math.exp %604 : vector<8x8xf32>
    %cst_208 = arith.constant dense<0.000000e+00> : vector<8xf32>
    %606 = vector.multi_reduction <add>, %605, %cst_208 [1] : vector<8x8xf32> to vector<8xf32>
    %607 = vector.shape_cast %606 : vector<8xf32> to vector<8x1xf32>
    %608 = tpu.reciprocal %607 {approx = true} : vector<8x1xf32> -> vector<8x1xf32>
    %609 = vector.broadcast %608 : vector<8x1xf32> to vector<8x8xf32>
    %610 = arith.mulf %605, %609 : vector<8x8xf32>
    %611 = arith.truncf %610 : vector<8x8xf32> to vector<8x8xbf16>
    %cst_209 = arith.constant dense<0.000000e+00> : vector<8x16xf32>
    %612 = tpu.matmul %611, %599, %cst_209 {dimension_numbers = #tpu.dot_dimension_numbers<[1], [0], [0], [1], [0, 0, 1, 1], [], []>} : vector<8x8xbf16>, vector<8x16xbf16>, vector<8x16xf32> -> vector<8x16xf32>
    %c8_210 = arith.constant 8 : index
    %c80_211 = arith.constant 80 : index
    %613 = vector.load %arg30[%c8_210, %c80_211] : memref<16x128xf32, #tpu.memory_space<vmem>>, vector<8x16xf32>
    tpu.vector_store %arg30[%c8_210, %c80_211], %612 {strides = array<i32>} : memref<16x128xf32, #tpu.memory_space<vmem>>, vector<8x16xf32>,
    %614 = vector.extract_strided_slice %333 {offsets = [8, 96], sizes = [8, 16], strides = [1, 1]} : vector<16x384xf32> to vector<8x16xf32>
    %615 = arith.truncf %614 : vector<8x16xf32> to vector<8x16xbf16>
    %616 = vector.extract_strided_slice %333 {offsets = [8, 224], sizes = [8, 16], strides = [1, 1]} : vector<16x384xf32> to vector<8x16xf32>
    %617 = arith.truncf %616 : vector<8x16xf32> to vector<8x16xbf16>
    %618 = vector.extract_strided_slice %333 {offsets = [8, 352], sizes = [8, 16], strides = [1, 1]} : vector<16x384xf32> to vector<8x16xf32>
    %619 = arith.truncf %618 : vector<8x16xf32> to vector<8x16xbf16>
    %cst_212 = arith.constant dense<0.000000e+00> : vector<8x8xf32>
    %620 = tpu.matmul %615, %617, %cst_212 {dimension_numbers = #tpu.dot_dimension_numbers<[1], [1], [0], [0], [0, 0, 1, 0], [], []>} : vector<8x16xbf16>, vector<8x16xbf16>, vector<8x8xf32> -> vector<8x8xf32>
    %cst_213 = arith.constant dense<0xFF800000> : vector<8xf32>
    %621 = vector.multi_reduction <maximumf>, %620, %cst_213 [1] : vector<8x8xf32> to vector<8xf32>
    %622 = vector.shape_cast %621 : vector<8xf32> to vector<8x1xf32>
    %623 = vector.broadcast %622 : vector<8x1xf32> to vector<8x8xf32>
    %624 = arith.subf %620, %623 : vector<8x8xf32>
    %625 = math.exp %624 : vector<8x8xf32>
    %cst_214 = arith.constant dense<0.000000e+00> : vector<8xf32>
    %626 = vector.multi_reduction <add>, %625, %cst_214 [1] : vector<8x8xf32> to vector<8xf32>
    %627 = vector.shape_cast %626 : vector<8xf32> to vector<8x1xf32>
    %628 = tpu.reciprocal %627 {approx = true} : vector<8x1xf32> -> vector<8x1xf32>
    %629 = vector.broadcast %628 : vector<8x1xf32> to vector<8x8xf32>
    %630 = arith.mulf %625, %629 : vector<8x8xf32>
    %631 = arith.truncf %630 : vector<8x8xf32> to vector<8x8xbf16>
    %cst_215 = arith.constant dense<0.000000e+00> : vector<8x16xf32>
    %632 = tpu.matmul %631, %619, %cst_215 {dimension_numbers = #tpu.dot_dimension_numbers<[1], [0], [0], [1], [0, 0, 1, 1], [], []>} : vector<8x8xbf16>, vector<8x16xbf16>, vector<8x16xf32> -> vector<8x16xf32>
    %c8_216 = arith.constant 8 : index
    %c96_217 = arith.constant 96 : index
    %633 = vector.load %arg30[%c8_216, %c96_217] : memref<16x128xf32, #tpu.memory_space<vmem>>, vector<8x16xf32>
    tpu.vector_store %arg30[%c8_216, %c96_217], %632 {strides = array<i32>} : memref<16x128xf32, #tpu.memory_space<vmem>>, vector<8x16xf32>,
    %634 = vector.extract_strided_slice %333 {offsets = [8, 112], sizes = [8, 16], strides = [1, 1]} : vector<16x384xf32> to vector<8x16xf32>
    %635 = arith.truncf %634 : vector<8x16xf32> to vector<8x16xbf16>
    %636 = vector.extract_strided_slice %333 {offsets = [8, 240], sizes = [8, 16], strides = [1, 1]} : vector<16x384xf32> to vector<8x16xf32>
    %637 = arith.truncf %636 : vector<8x16xf32> to vector<8x16xbf16>
    %638 = vector.extract_strided_slice %333 {offsets = [8, 368], sizes = [8, 16], strides = [1, 1]} : vector<16x384xf32> to vector<8x16xf32>
    %639 = arith.truncf %638 : vector<8x16xf32> to vector<8x16xbf16>
    %cst_218 = arith.constant dense<0.000000e+00> : vector<8x8xf32>
    %640 = tpu.matmul %635, %637, %cst_218 {dimension_numbers = #tpu.dot_dimension_numbers<[1], [1], [0], [0], [0, 0, 1, 0], [], []>} : vector<8x16xbf16>, vector<8x16xbf16>, vector<8x8xf32> -> vector<8x8xf32>
    %cst_219 = arith.constant dense<0xFF800000> : vector<8xf32>
    %641 = vector.multi_reduction <maximumf>, %640, %cst_219 [1] : vector<8x8xf32> to vector<8xf32>
    %642 = vector.shape_cast %641 : vector<8xf32> to vector<8x1xf32>
    %643 = vector.broadcast %642 : vector<8x1xf32> to vector<8x8xf32>
    %644 = arith.subf %640, %643 : vector<8x8xf32>
    %645 = math.exp %644 : vector<8x8xf32>
    %cst_220 = arith.constant dense<0.000000e+00> : vector<8xf32>
    %646 = vector.multi_reduction <add>, %645, %cst_220 [1] : vector<8x8xf32> to vector<8xf32>
    %647 = vector.shape_cast %646 : vector<8xf32> to vector<8x1xf32>
    %648 = tpu.reciprocal %647 {approx = true} : vector<8x1xf32> -> vector<8x1xf32>
    %649 = vector.broadcast %648 : vector<8x1xf32> to vector<8x8xf32>
    %650 = arith.mulf %645, %649 : vector<8x8xf32>
    %651 = arith.truncf %650 : vector<8x8xf32> to vector<8x8xbf16>
    %cst_221 = arith.constant dense<0.000000e+00> : vector<8x16xf32>
    %652 = tpu.matmul %651, %639, %cst_221 {dimension_numbers = #tpu.dot_dimension_numbers<[1], [0], [0], [1], [0, 0, 1, 1], [], []>} : vector<8x8xbf16>, vector<8x16xbf16>, vector<8x16xf32> -> vector<8x16xf32>
    %c8_222 = arith.constant 8 : index
    %c112_223 = arith.constant 112 : index
    %653 = vector.load %arg30[%c8_222, %c112_223] : memref<16x128xf32, #tpu.memory_space<vmem>>, vector<8x16xf32>
    tpu.vector_store %arg30[%c8_222, %c112_223], %652 {strides = array<i32>} : memref<16x128xf32, #tpu.memory_space<vmem>>, vector<8x16xf32>,
    %c0_224 = arith.constant 0 : index
    %c0_225 = arith.constant 0 : index
    %654 = vector.load %arg30[%c0_224, %c0_225] : memref<16x128xf32, #tpu.memory_space<vmem>>, vector<16x128xf32>
    %c0_226 = arith.constant 0 : index
    %c0_227 = arith.constant 0 : index
    %655 = vector.load %arg24[%c0_226, %c0_227] : memref<128x128xbf16, #tpu.memory_space<vmem>>, vector<128x128xbf16>
    %656 = arith.truncf %654 : vector<16x128xf32> to vector<16x128xbf16>
    %cst_228 = arith.constant dense<0.000000e+00> : vector<16x128xf32>
    %657 = tpu.matmul %656, %655, %cst_228 {dimension_numbers = #tpu.dot_dimension_numbers<[1], [0], [0], [1], [0, 0, 1, 1], [], []>} : vector<16x128xbf16>, vector<128x128xbf16>, vector<16x128xf32> -> vector<16x128xf32>
    %658 = arith.addf %303, %657 : vector<16x128xf32>
    %c0_229 = arith.constant 0 : index
    %c0_230 = arith.constant 0 : index
    %659 = vector.load %arg25[%c0_229, %c0_230] : memref<1x128xf32, #tpu.memory_space<vmem>>, vector<1x128xf32>
    %660 = vector.broadcast %659 : vector<1x128xf32> to vector<16x128xf32>
    %661 = arith.addf %658, %660 : vector<16x128xf32>
    %cst_231 = arith.constant dense<0.000000e+00> : vector<16xf32>
    %662 = vector.multi_reduction <add>, %661, %cst_231 [1] : vector<16x128xf32> to vector<16xf32>
    %663 = vector.shape_cast %662 : vector<16xf32> to vector<16x1xf32>
    %cst_232 = arith.constant 1.280000e+02 : f32
    %664 = vector.broadcast %cst_232 : f32 to vector<16x1xf32>
    %665 = arith.divf %663, %664 : vector<16x1xf32>
    %666 = vector.broadcast %665 : vector<16x1xf32> to vector<16x128xf32>
    %667 = arith.subf %661, %666 : vector<16x128xf32>
    %668 = arith.mulf %667, %667 : vector<16x128xf32>
    %cst_233 = arith.constant dense<0.000000e+00> : vector<16xf32>
    %669 = vector.multi_reduction <add>, %668, %cst_233 [1] : vector<16x128xf32> to vector<16xf32>
    %670 = vector.shape_cast %669 : vector<16xf32> to vector<16x1xf32>
    %cst_234 = arith.constant 1.280000e+02 : f32
    %671 = vector.broadcast %cst_234 : f32 to vector<16x1xf32>
    %672 = arith.divf %670, %671 : vector<16x1xf32>
    %673 = vector.broadcast %665 : vector<16x1xf32> to vector<16x128xf32>
    %674 = arith.subf %661, %673 : vector<16x128xf32>
    %cst_235 = arith.constant 9.99999974E-6 : f32
    %675 = vector.broadcast %cst_235 : f32 to vector<16x1xf32>
    %676 = arith.addf %672, %675 : vector<16x1xf32>
    %677 = math.rsqrt %676 : vector<16x1xf32>
    %678 = vector.broadcast %677 : vector<16x1xf32> to vector<16x128xf32>
    %679 = arith.mulf %674, %678 : vector<16x128xf32>
    %680 = vector.broadcast %2 : vector<1x128xf32> to vector<16x128xf32>
    %681 = arith.mulf %679, %680 : vector<16x128xf32>
    %682 = vector.broadcast %3 : vector<1x128xf32> to vector<16x128xf32>
    %683 = arith.addf %681, %682 : vector<16x128xf32>
    %684 = vector.shape_cast %683 : vector<16x128xf32> to vector<2x8x128xf32>
    %c0_236 = arith.constant 0 : index
    %c0_237 = arith.constant 0 : index
    %c0_238 = arith.constant 0 : index
    %685 = vector.load %arg29[%c0_236, %c0_237, %c0_238] : memref<2x8x128xf32, #tpu.memory_space<vmem>>, vector<2x8x128xf32>
    tpu.vector_store %arg29[%c0_236, %c0_237, %c0_238], %684 {strides = array<i32>} : memref<2x8x128xf32, #tpu.memory_space<vmem>>, vector<2x8x128xf32>,
    return
  }
  func.func @transform_0(%arg0: i32) -> (i32, i32, i32) {
    %c0_i32 = arith.constant 0 : i32
    %c0_i32_0 = arith.constant 0 : i32
    %c0_i32_1 = arith.constant 0 : i32
    return %arg0, %c0_i32, %c0_i32_0 : i32, i32, i32
  }
  func.func @transform_1(%arg0: i32) -> (i32, i32) {
    %c0_i32 = arith.constant 0 : i32
    %c0_i32_0 = arith.constant 0 : i32
    %c0_i32_1 = arith.constant 0 : i32
    return %c0_i32, %c0_i32_0 : i32, i32
  }
  func.func @transform_2(%arg0: i32) -> (i32, i32) {
    %c0_i32 = arith.constant 0 : i32
    %c0_i32_0 = arith.constant 0 : i32
    %c0_i32_1 = arith.constant 0 : i32
    return %c0_i32, %c0_i32_0 : i32, i32
  }
  func.func @transform_3(%arg0: i32) -> (i32, i32) {
    %c0_i32 = arith.constant 0 : i32
    %c0_i32_0 = arith.constant 0 : i32
    %c0_i32_1 = arith.constant 0 : i32
    return %c0_i32, %c0_i32_0 : i32, i32
  }
  func.func @transform_4(%arg0: i32) -> (i32, i32) {
    %c0_i32 = arith.constant 0 : i32
    %c0_i32_0 = arith.constant 0 : i32
    %c0_i32_1 = arith.constant 0 : i32
    return %c0_i32, %c0_i32_0 : i32, i32
  }
  func.func @transform_5(%arg0: i32) -> (i32, i32) {
    %c0_i32 = arith.constant 0 : i32
    %c0_i32_0 = arith.constant 0 : i32
    %c0_i32_1 = arith.constant 0 : i32
    return %c0_i32, %c0_i32_0 : i32, i32
  }
  func.func @transform_6(%arg0: i32) -> (i32, i32) {
    %c0_i32 = arith.constant 0 : i32
    %c0_i32_0 = arith.constant 0 : i32
    %c0_i32_1 = arith.constant 0 : i32
    return %c0_i32, %c0_i32_0 : i32, i32
  }
  func.func @transform_7(%arg0: i32) -> (i32, i32) {
    %c0_i32 = arith.constant 0 : i32
    %c0_i32_0 = arith.constant 0 : i32
    %c0_i32_1 = arith.constant 0 : i32
    return %c0_i32, %c0_i32_0 : i32, i32
  }
  func.func @transform_8(%arg0: i32) -> (i32, i32) {
    %c0_i32 = arith.constant 0 : i32
    %c0_i32_0 = arith.constant 0 : i32
    %c0_i32_1 = arith.constant 0 : i32
    return %c0_i32, %c0_i32_0 : i32, i32
  }
  func.func @transform_9(%arg0: i32) -> (i32, i32) {
    %c0_i32 = arith.constant 0 : i32
    %c0_i32_0 = arith.constant 0 : i32
    %c0_i32_1 = arith.constant 0 : i32
    return %c0_i32, %c0_i32_0 : i32, i32
  }
  func.func @transform_10(%arg0: i32) -> (i32, i32) {
    %c0_i32 = arith.constant 0 : i32
    %c0_i32_0 = arith.constant 0 : i32
    %c0_i32_1 = arith.constant 0 : i32
    return %c0_i32, %c0_i32_0 : i32, i32
  }
  func.func @transform_11(%arg0: i32) -> (i32, i32) {
    %c0_i32 = arith.constant 0 : i32
    %c0_i32_0 = arith.constant 0 : i32
    %c0_i32_1 = arith.constant 0 : i32
    return %c0_i32, %c0_i32_0 : i32, i32
  }
  func.func @transform_12(%arg0: i32) -> (i32, i32) {
    %c0_i32 = arith.constant 0 : i32
    %c0_i32_0 = arith.constant 0 : i32
    %c0_i32_1 = arith.constant 0 : i32
    return %c0_i32, %c0_i32_0 : i32, i32
  }
  func.func @transform_13(%arg0: i32) -> (i32, i32) {
    %c0_i32 = arith.constant 0 : i32
    %c0_i32_0 = arith.constant 0 : i32
    %c0_i32_1 = arith.constant 0 : i32
    return %c0_i32, %c0_i32_0 : i32, i32
  }
  func.func @transform_14(%arg0: i32) -> (i32, i32) {
    %c0_i32 = arith.constant 0 : i32
    %c0_i32_0 = arith.constant 0 : i32
    %c0_i32_1 = arith.constant 0 : i32
    return %c0_i32, %c0_i32_0 : i32, i32
  }
  func.func @transform_15(%arg0: i32) -> (i32, i32) {
    %c0_i32 = arith.constant 0 : i32
    %c0_i32_0 = arith.constant 0 : i32
    %c0_i32_1 = arith.constant 0 : i32
    return %c0_i32, %c0_i32_0 : i32, i32
  }
  func.func @transform_16(%arg0: i32) -> (i32, i32) {
    %c0_i32 = arith.constant 0 : i32
    %c0_i32_0 = arith.constant 0 : i32
    %c0_i32_1 = arith.constant 0 : i32
    return %c0_i32, %c0_i32_0 : i32, i32
  }
  func.func @transform_17(%arg0: i32) -> (i32, i32) {
    %c0_i32 = arith.constant 0 : i32
    %c0_i32_0 = arith.constant 0 : i32
    %c0_i32_1 = arith.constant 0 : i32
    return %c0_i32, %c0_i32_0 : i32, i32
  }
  func.func @transform_18(%arg0: i32) -> (i32, i32) {
    %c0_i32 = arith.constant 0 : i32
    %c0_i32_0 = arith.constant 0 : i32
    %c0_i32_1 = arith.constant 0 : i32
    return %c0_i32, %c0_i32_0 : i32, i32
  }
  func.func @transform_19(%arg0: i32) -> (i32, i32) {
    %c0_i32 = arith.constant 0 : i32
    %c0_i32_0 = arith.constant 0 : i32
    %c0_i32_1 = arith.constant 0 : i32
    return %c0_i32, %c0_i32_0 : i32, i32
  }
  func.func @transform_20(%arg0: i32) -> (i32, i32) {
    %c0_i32 = arith.constant 0 : i32
    %c0_i32_0 = arith.constant 0 : i32
    %c0_i32_1 = arith.constant 0 : i32
    return %c0_i32, %c0_i32_0 : i32, i32
  }
  func.func @transform_21(%arg0: i32) -> (i32, i32) {
    %c0_i32 = arith.constant 0 : i32
    %c0_i32_0 = arith.constant 0 : i32
    %c0_i32_1 = arith.constant 0 : i32
    return %c0_i32, %c0_i32_0 : i32, i32
  }
  func.func @transform_22(%arg0: i32) -> (i32, i32) {
    %c0_i32 = arith.constant 0 : i32
    %c0_i32_0 = arith.constant 0 : i32
    %c0_i32_1 = arith.constant 0 : i32
    return %c0_i32, %c0_i32_0 : i32, i32
  }
  func.func @transform_23(%arg0: i32) -> (i32, i32) {
    %c0_i32 = arith.constant 0 : i32
    %c0_i32_0 = arith.constant 0 : i32
    %c0_i32_1 = arith.constant 0 : i32
    return %c0_i32, %c0_i32_0 : i32, i32
  }
  func.func @transform_24(%arg0: i32) -> (i32, i32) {
    %c0_i32 = arith.constant 0 : i32
    %c0_i32_0 = arith.constant 0 : i32
    %c0_i32_1 = arith.constant 0 : i32
    return %c0_i32, %c0_i32_0 : i32, i32
  }
  func.func @transform_25(%arg0: i32) -> (i32, i32) {
    %c0_i32 = arith.constant 0 : i32
    %c0_i32_0 = arith.constant 0 : i32
    %c0_i32_1 = arith.constant 0 : i32
    return %c0_i32, %c0_i32_0 : i32, i32
  }
  func.func @transform_26(%arg0: i32) -> (i32, i32) {
    %c0_i32 = arith.constant 0 : i32
    %c0_i32_0 = arith.constant 0 : i32
    %c0_i32_1 = arith.constant 0 : i32
    return %c0_i32, %c0_i32_0 : i32, i32
  }
  func.func @transform_27(%arg0: i32) -> (i32, i32, i32) {
    %c0_i32 = arith.constant 0 : i32
    %c0_i32_0 = arith.constant 0 : i32
    %c0_i32_1 = arith.constant 0 : i32
    return %arg0, %c0_i32, %c0_i32_0 : i32, i32, i32
  }
  func.func @transform_28(%arg0: i32) -> (i32, i32, i32) {
    %c0_i32 = arith.constant 0 : i32
    %c0_i32_0 = arith.constant 0 : i32
    %c0_i32_1 = arith.constant 0 : i32
    return %arg0, %c0_i32, %c0_i32_0 : i32, i32, i32
  }
}

</mosaic_0001>

<bundles_post_ra>
// kernel: tpu_custom_call.1
= control target key start
LH: loop header
LB: loop body
LE: loop exit
PB: predicated region body
PF: predicated region fallthrough
CT: control target
= control target key end

     0   :  { %s7552_s0 = inlined_call_operand.hbm [shape: f32[2,8,128], index: 0, kind: input, shape index: {}]   ;;  %s7553_s1 = inlined_call_operand.hbm [shape: f32[1,128], index: 1, kind: input, shape index: {}]   ;;  %s7554_s2 = inlined_call_operand.hbm [shape: f32[1,128], index: 2, kind: input, shape index: {}]   ;;  %s7555_s3 = inlined_call_operand.hbm [shape: bf16[128,384], index: 3, kind: input, shape index: {}]   ;;  %s7556_s4 = inlined_call_operand.vmem [shape: f32[1,384], index: 4, kind: input, shape index: {}]   ;;  %s7557_s5 = inlined_call_operand.hbm [shape: bf16[128,128], index: 5, kind: input, shape index: {}]   ;;  %s7558_s6 = inlined_call_operand.vmem [shape: f32[1,128], index: 6, kind: input, shape index: {}]   ;;  %s7559_s7 = inlined_call_operand.vmem [shape: f32[1,128], index: 7, kind: input, shape index: {}]   ;;  %s7560_s8 = inlined_call_operand.vmem [shape: f32[1,128], index: 8, kind: input, shape index: {}]   ;;  %s7561_s9 = inlined_call_operand.hbm [shape: bf16[128,256], index: 9, kind: input, shape index: {}]   ;;  %s7562_s10 = inlined_call_operand.vmem [shape: f32[1,256], index: 10, kind: input, shape index: {}]   ;;  %s7563_s11 = inlined_call_operand.hbm [shape: bf16[256,128], index: 11, kind: input, shape index: {}]   ;;  %s7564_s12 = inlined_call_operand.vmem [shape: f32[1,128], index: 12, kind: input, shape index: {}]   ;;  %s7565_s13 = inlined_call_operand.vmem [shape: f32[1,128], index: 13, kind: input, shape index: {}]   ;;  %s7566_s14 = inlined_call_operand.vmem [shape: f32[1,128], index: 14, kind: input, shape index: {}]   ;;  %s7567_s15 = inlined_call_operand.hbm [shape: bf16[128,512], index: 15, kind: input, shape index: {}]   ;;  %s7568_s16 = inlined_call_operand.vmem [shape: f32[1,512], index: 16, kind: input, shape index: {}]   ;;  %s7569_s17 = inlined_call_operand.hbm [shape: bf16[512,128], index: 17, kind: input, shape index: {}]   ;;  %s7570_s18 = inlined_call_operand.vmem [shape: f32[1,128], index: 18, kind: input, shape index: {}]   ;;  %s7571_s19 = inlined_call_operand.vmem [shape: f32[1,128], index: 19, kind: input, shape index: {}]   ;;  %s7572_s20 = inlined_call_operand.vmem [shape: f32[1,128], index: 20, kind: input, shape index: {}]   ;;  %s7573_s21 = inlined_call_operand.hbm [shape: bf16[128,384], index: 21, kind: input, shape index: {}]   ;;  %s7574_s22 = inlined_call_operand.vmem [shape: f32[1,384], index: 22, kind: input, shape index: {}]   ;;  %s7575_s23 = inlined_call_operand.vmem [shape: bf16[128,128], index: 23, kind: input, shape index: {}]   ;;  %s7576_s24 = inlined_call_operand.vmem [shape: f32[1,128], index: 24, kind: input, shape index: {}]   ;;  %s7577_s25 = inlined_call_operand.vmem [shape: f32[1,128], index: 25, kind: input, shape index: {}]   ;;  %s7578_s26 = inlined_call_operand.vmem [shape: f32[1,128], index: 26, kind: input, shape index: {}]   ;;  %s7579_s27 = inlined_call_operand.hbm [shape: f32[2,8,128], index: 27, kind: output, shape index: {0}]   ;;  %s7580_s28 = inlined_call_operand.hbm [shape: f32[2,8,128], index: 28, kind: output, shape index: {1}]  }
   0x1   :  { %7598 = sst [smem:[#allocation31_spill]] %s7552_s0 }
   0x2   :  { %7599 = sst [smem:[#allocation32_spill]] %s7553_s1 }
   0x3   :  { %7600 = sst [smem:[#allocation33_spill]] %s7554_s2 }
   0x4   :  { %7601 = sst [smem:[#allocation34_spill]] %s7555_s3 }
   0x5   :  { %7602 = sst [smem:[#allocation35_spill]] %s7556_s4 }
   0x6   :  { %7603 = sst [smem:[#allocation36_spill]] %s7557_s5 }
   0x7   :  { %7604 = sst [smem:[#allocation37_spill]] %s7558_s6 }
   0x8   :  { %7605 = sst [smem:[#allocation38_spill]] %s7559_s7 }
   0x9   :  { %7606 = sst [smem:[#allocation39_spill]] %s7560_s8 }
   0xa   :  { %7607 = sst [smem:[#allocation40_spill]] %s7561_s9 }
   0xb   :  { %7608 = sst [smem:[#allocation41_spill]] %s7562_s10 }
   0xc   :  { %7609 = sst [smem:[#allocation42_spill]] %s7563_s11 }
   0xd   :  { %7610 = sst [smem:[#allocation43_spill]] %s7564_s12 }
   0xe   :  { %7611 = sst [smem:[#allocation44_spill]] %s7576_s24 }
   0xf   :  { %7612 = sst [smem:[#allocation45_spill]] %s7579_s27 }
  0x10   :  { %7613 = sst [smem:[#allocation46_spill]] %s7580_s28 }
  0x11   :  { %34 = vsyncpa [#allocation4], 0 }
  0x12   :  { %35 = vsyncpa [#allocation7], 0 }
  0x13   :  { %36 = vsyncpa [#allocation10], 0 }
  0x14   :  { %37 = vsyncpa [#allocation13], 0 }
  0x15   :  { %38 = vsyncpa [#allocation16], 0 }
  0x16   :  { %39 = vsyncpa [#allocation19], 0 }
  0x17   :  { %40 = vsyncpa [#allocation5], 0 }
  0x18   :  { %41 = vsyncpa [#allocation22], 0  ;;  %s6408_s8 = smov [#allocation6]   ;;  %s6409_s9 = smov [#allocation9]  }
  0x19   :  { %s60_s5 = sshll.u32 %s6408_s8, 4  ;;  %s79_s30 = sshll.u32 %s6409_s9, 4  ;;  %s61_s5 = int_to_ptr.vmem [resolvable:$true] %s60_s5  ;;  %s6581_s30 = int_to_ptr.vmem [resolvable:$true] %s79_s30 }
  0x1a   :  { %s7614_s10 = sld [smem:[#allocation32_spill]] }
  0x20   :  { %s6128_s0 = scalar_lea.hbm %s7614_s10, 16 }
  0x21   :  { %p6129_p0 = scmp.ne.s32.totalorder %s7614_s10, %s6128_s0  ;;  %p6132_p1 = scmp.lt.u32.totalorder %s6128_s0, %s7614_s10 }
  0x23   :  { %p6134_p2 = pnand %p6132_p1, %p6129_p0 }
  0x25   :  { %6137 = shalt.err (!%p6134_p2)
}
  0x26   :  { %s6138_s12 = scalar_lea.vmem %s61_s5, 16  ;;  %s6142_s1 = scalar_lea.vmem %s61_s5, 32 }
  0x27   :  { %p6139_p3 = scmp.ne.s32.totalorder %s61_s5, %s6138_s12  ;;  %p6143_p4 = scmp.lt.s32.totalorder %s61_s5, %s61_s5 }
  0x28   :  { %p6144_p5 = scmp.lt.s32.totalorder %s6142_s1, %s6138_s12 }
  0x2a   :  { %p6145_p6 = por %p6144_p5, %p6143_p4 }
  0x2c   :  { %p6146_p7 = pnand %p6145_p6, %p6139_p3 }
  0x2e   :  { %6149 = shalt.err (!%p6146_p7)
}
  0x2f   :  { %63 = dma.hbm_to_vmem [thread:$0]  %s7614_s10, 16, %s61_s5, [#allocation7]  }
  0x30   :  { %s7615_s6 = sld [smem:[#allocation34_spill]] }
  0x36   :  { %s6150_s11 = scalar_lea.hbm %s7615_s6, 3072 }
  0x37   :  { %p6151_p8 = scmp.ne.s32.totalorder %s7615_s6, %s6150_s11  ;;  %p6154_p9 = scmp.lt.u32.totalorder %s6150_s11, %s7615_s6 }
  0x39   :  { %p6156_p10 = pnand %p6154_p9, %p6151_p8 }
  0x3b   :  { %6159 = shalt.err (!%p6156_p10)
}
  0x3c   :  { %s6160_s12 = scalar_lea.vmem %s6581_s30, 3072  ;;  %p6165_p12 = scmp.lt.s32.totalorder %s6581_s30, %s6581_s30 }
  0x3d   :  { %p6161_p11 = scmp.ne.s32.totalorder %s6581_s30, %s6160_s12  ;;  %p6166_p13 = scmp.lt.s32.totalorder %s6160_s12, %s6160_s12 }
  0x3f   :  { %p6167_p0 = por %p6166_p13, %p6165_p12 }
  0x41   :  { %p6168_p1 = pnand %p6167_p0, %p6161_p11 }
  0x43   :  { %6171 = shalt.err (!%p6168_p1)
}
  0x44   :  { %s7590_s5 = smov 192   ;;  %s7591_s10 = smov 12  }
  0x45   :  { %85 = dma.hbm_to_vmem [thread:$0]  %s7615_s6, 3072, %s6581_s30, [#allocation10], %s7590_s5, %s7590_s5, %s7591_s10  }
  0x46   :  { %s6412_s8 = smov [#allocation12]   ;;  %s6413_s3 = smov [#allocation15]  }
  0x47   :  { %s111_s9 = sshll.u32 %s6412_s8, 4  ;;  %s143_s11 = sshll.u32 %s6413_s3, 4  ;;  %s112_s9 = int_to_ptr.vmem [resolvable:$true] %s111_s9  ;;  %s6615_s11 = int_to_ptr.vmem [resolvable:$true] %s143_s11 }
  0x48   :  { %s7616_s2 = sld [smem:[#allocation40_spill]] }
  0x4e   :  { %s6172_s7 = scalar_lea.hbm %s7616_s2, 2048 }
  0x4f   :  { %p6173_p2 = scmp.ne.s32.totalorder %s7616_s2, %s6172_s7  ;;  %p6176_p3 = scmp.lt.u32.totalorder %s6172_s7, %s7616_s2 }
  0x51   :  { %p6178_p4 = pnand %p6176_p3, %p6173_p2 }
  0x53   :  { %6181 = shalt.err (!%p6178_p4)
}
  0x54   :  { %s6182_s30 = scalar_lea.vmem %s112_s9, 2048  ;;  %p6187_p6 = scmp.lt.s32.totalorder %s112_s9, %s112_s9 }
  0x55   :  { %p6183_p5 = scmp.ne.s32.totalorder %s112_s9, %s6182_s30  ;;  %p6188_p7 = scmp.lt.s32.totalorder %s6182_s30, %s6182_s30 }
  0x57   :  { %p6189_p8 = por %p6188_p7, %p6187_p6 }
  0x59   :  { %p6190_p9 = pnand %p6189_p8, %p6183_p5 }
  0x5b   :  { %6193 = shalt.err (!%p6190_p9)
}
  0x5c   :  { %s7592_s6 = smov 128   ;;  %s7594_s1 = smov 8  }
  0x5d   :  { %117 = dma.hbm_to_vmem [thread:$0]  %s7616_s2, 2048, %s112_s9, [#allocation13], %s7592_s6, %s7592_s6, %s7594_s1  }
  0x5e   :  { %s6194_s8 = scalar_lea.hbm %s7567_s15, 4096 }
  0x5f   :  { %p6195_p10 = scmp.ne.s32.totalorder %s7567_s15, %s6194_s8  ;;  %p6198_p11 = scmp.lt.u32.totalorder %s6194_s8, %s7567_s15 }
  0x61   :  { %p6200_p12 = pnand %p6198_p11, %p6195_p10 }
  0x63   :  { %6203 = shalt.err (!%p6200_p12)
}
  0x64   :  { %s6204_s12 = scalar_lea.vmem %s6615_s11, 4096  ;;  %p6209_p0 = scmp.lt.s32.totalorder %s6615_s11, %s6615_s11 }
  0x65   :  { %p6205_p13 = scmp.ne.s32.totalorder %s6615_s11, %s6204_s12  ;;  %p6210_p1 = scmp.lt.s32.totalorder %s6204_s12, %s6204_s12 }
  0x67   :  { %p6211_p2 = por %p6210_p1, %p6209_p0 }
  0x69   :  { %p6212_p3 = pnand %p6211_p2, %p6205_p13 }
  0x6b   :  { %6215 = shalt.err (!%p6212_p3)
}
  0x6c   :  { %s6416_s9 = smov 256   ;;  %s7596_s2 = smov 16  }
  0x6d   :  { %149 = dma.hbm_to_vmem [thread:$0]  %s7567_s15, 4096, %s6615_s11, [#allocation16], %s6416_s9, %s6416_s9, %s7596_s2  }
  0x6e   :  { %s6418_s4 = smov [#allocation3]   ;;  %s6419_s27 = smov [#allocation8]  }
  0x6f   :  { %s47_s24 = sshll.u32 %s6418_s4, 4  ;;  %s70_s8 = sshll.u32 %s6419_s27, 4  ;;  %s48_s24 = int_to_ptr.vmem [resolvable:$true] %s47_s24  ;;  %s71_s8 = int_to_ptr.vmem [resolvable:$true] %s70_s8 }
  0x70   :  { %s7617_s0 = sld [smem:[#allocation31_spill]] }
  0x76   :  { %s6216_s7 = scalar_lea.hbm %s7617_s0, 256 }
  0x77   :  { %p6217_p4 = scmp.ne.s32.totalorder %s7617_s0, %s6216_s7  ;;  %p6220_p5 = scmp.lt.u32.totalorder %s6216_s7, %s7617_s0 }
  0x79   :  { %p6222_p6 = pnand %p6220_p5, %p6217_p4 }
  0x7b   :  { %6225 = shalt.err (!%p6222_p6)
}
  0x7c   :  { %s6226_s15 = scalar_lea.vmem %s48_s24, 256  ;;  %p6231_p8 = scmp.lt.s32.totalorder %s48_s24, %s48_s24 }
  0x7d   :  { %p6227_p7 = scmp.ne.s32.totalorder %s48_s24, %s6226_s15  ;;  %p6232_p9 = scmp.lt.s32.totalorder %s6226_s15, %s6226_s15 }
  0x7f   :  { %p6233_p10 = por %p6232_p9, %p6231_p8 }
  0x81   :  { %p6234_p11 = pnand %p6233_p10, %p6227_p7 }
  0x83   :  { %6237 = shalt.err (!%p6234_p11)
}
  0x84   :  { %s7618_s11 = smov 128   ;;  %s7619_s10 = sld [smem:[#allocation33_spill]] }
  0x85   :  { %53 = dma.hbm_to_vmem [thread:$0]  %s7617_s0, 256, %s48_s24, [#allocation4], %s7618_s11, %s7618_s11, %s7594_s1  }
  0x8a   :  { %s6238_s6 = scalar_lea.hbm %s7619_s10, 16 }
  0x8b   :  { %p6239_p12 = scmp.ne.s32.totalorder %s7619_s10, %s6238_s6  ;;  %p6242_p13 = scmp.lt.u32.totalorder %s6238_s6, %s7619_s10 }
  0x8d   :  { %p6244_p0 = pnand %p6242_p13, %p6239_p12 }
  0x8f   :  { %6247 = shalt.err (!%p6244_p0)
}
  0x90   :  { %s6248_s7 = scalar_lea.vmem %s71_s8, 16  ;;  %s6252_s12 = scalar_lea.vmem %s71_s8, 32 }
  0x91   :  { %p6249_p1 = scmp.ne.s32.totalorder %s71_s8, %s6248_s7  ;;  %p6253_p2 = scmp.lt.s32.totalorder %s71_s8, %s71_s8 }
  0x92   :  { %p6254_p3 = scmp.lt.s32.totalorder %s6252_s12, %s6248_s7 }
  0x94   :  { %p6255_p4 = por %p6254_p3, %p6253_p2 }
  0x96   :  { %p6256_p5 = pnand %p6255_p4, %p6249_p1 }
  0x98   :  { %6259 = shalt.err (!%p6256_p5)
}
  0x99   :  { %73 = dma.hbm_to_vmem [thread:$0]  %s7619_s10, 16, %s71_s8, [#allocation7]  }
  0x9a   :  { %s6420_s15 = smov [#allocation11]   ;;  %s7620_s28 = sld [smem:[#allocation36_spill]] }
  0x9b   :  { %s93_s9 = sshll.u32 %s6420_s15, 4  ;;  %s94_s9 = int_to_ptr.vmem [resolvable:$true] %s93_s9 }
  0xa0   :  { %s6260_s6 = scalar_lea.hbm %s7620_s28, 1024 }
  0xa1   :  { %p6261_p6 = scmp.ne.s32.totalorder %s7620_s28, %s6260_s6  ;;  %p6264_p7 = scmp.lt.u32.totalorder %s6260_s6, %s7620_s28 }
  0xa3   :  { %p6266_p8 = pnand %p6264_p7, %p6261_p6 }
  0xa5   :  { %6269 = shalt.err (!%p6266_p8)
}
  0xa6   :  { %s6270_s7 = scalar_lea.vmem %s94_s9, 1024  ;;  %p6275_p10 = scmp.lt.s32.totalorder %s94_s9, %s94_s9 }
  0xa7   :  { %p6271_p9 = scmp.ne.s32.totalorder %s94_s9, %s6270_s7  ;;  %p6276_p11 = scmp.lt.s32.totalorder %s6270_s7, %s6270_s7 }
  0xa9   :  { %p6277_p12 = por %p6276_p11, %p6275_p10 }
  0xab   :  { %p6278_p13 = pnand %p6277_p12, %p6271_p9 }
  0xad   :  { %6281 = shalt.err (!%p6278_p13)
}
  0xae   :  { %s6421_s8 = smov 64   ;;  %s6422_s10 = smov 4  }
  0xaf   :  { %99 = dma.hbm_to_vmem [thread:$0]  %s7620_s28, 1024, %s94_s9, [#allocation10], %s6421_s8, %s6421_s8, %s6422_s10  }
  0xb0   :  { %s6423_s0 = smov [#allocation14]   ;;  %s6424_s30 = smov [#allocation17]  }
  0xb1   :  { %s125_s15 = sshll.u32 %s6423_s0, 4  ;;  %s157_s5 = sshll.u32 %s6424_s30, 4  ;;  %s126_s15 = int_to_ptr.vmem [resolvable:$true] %s125_s15  ;;  %s158_s5 = int_to_ptr.vmem [resolvable:$true] %s157_s5 }
  0xb2   :  { %s7621_s27 = sld [smem:[#allocation42_spill]] }
  0xb8   :  { %s6282_s3 = scalar_lea.hbm %s7621_s27, 2048 }
  0xb9   :  { %p6283_p0 = scmp.ne.s32.totalorder %s7621_s27, %s6282_s3  ;;  %p6286_p1 = scmp.lt.u32.totalorder %s6282_s3, %s7621_s27 }
  0xbb   :  { %p6288_p2 = pnand %p6286_p1, %p6283_p0 }
  0xbd   :  { %6291 = shalt.err (!%p6288_p2)
}
  0xbe   :  { %s6292_s9 = scalar_lea.vmem %s126_s15, 2048  ;;  %p6297_p4 = scmp.lt.s32.totalorder %s126_s15, %s126_s15 }
  0xbf   :  { %p6293_p3 = scmp.ne.s32.totalorder %s126_s15, %s6292_s9  ;;  %p6298_p5 = scmp.lt.s32.totalorder %s6292_s9, %s6292_s9 }
  0xc1   :  { %p6299_p6 = por %p6298_p5, %p6297_p4 }
  0xc3   :  { %p6300_p7 = pnand %p6299_p6, %p6293_p3 }
  0xc5   :  { %6303 = shalt.err (!%p6300_p7)
}
  0xc6   :  { %131 = dma.hbm_to_vmem [thread:$0]  %s7621_s27, 2048, %s126_s15, [#allocation13], %s6421_s8, %s6421_s8, %s6422_s10  }
  0xc7   :  { %s6304_s2 = scalar_lea.hbm %s7569_s17, 4096 }
  0xc8   :  { %p6305_p8 = scmp.ne.s32.totalorder %s7569_s17, %s6304_s2  ;;  %p6308_p9 = scmp.lt.u32.totalorder %s6304_s2, %s7569_s17 }
  0xca   :  { %p6310_p10 = pnand %p6308_p9, %p6305_p8 }
  0xcc   :  { %6313 = shalt.err (!%p6310_p10)
}
  0xcd   :  { %s6314_s3 = scalar_lea.vmem %s158_s5, 4096  ;;  %p6319_p12 = scmp.lt.s32.totalorder %s158_s5, %s158_s5 }
  0xce   :  { %p6315_p11 = scmp.ne.s32.totalorder %s158_s5, %s6314_s3  ;;  %p6320_p13 = scmp.lt.s32.totalorder %s6314_s3, %s6314_s3 }
  0xd0   :  { %p6321_p0 = por %p6320_p13, %p6319_p12 }
  0xd2   :  { %p6322_p1 = pnand %p6321_p0, %p6315_p11 }
  0xd4   :  { %6325 = shalt.err (!%p6322_p1)
}
  0xd5   :  { %163 = dma.hbm_to_vmem [thread:$0]  %s7569_s17, 4096, %s158_s5, [#allocation16], %s6421_s8, %s6421_s8, %s6422_s10  }
  0xd6   :  { %s6425_s29 = smov [#allocation18]   ;;  %s6326_s12 = scalar_lea.hbm %s7573_s21, 3072 }
  0xd7   :  { %s175_s7 = sshll.u32 %s6425_s29, 4  ;;  %p6327_p2 = scmp.ne.s32.totalorder %s7573_s21, %s6326_s12  ;;  %s176_s7 = int_to_ptr.vmem [resolvable:$true] %s175_s7 }
  0xd8   :  { %p6330_p3 = scmp.lt.u32.totalorder %s6326_s12, %s7573_s21 }
  0xda   :  { %p6332_p4 = pnand %p6330_p3, %p6327_p2 }
  0xdc   :  { %6335 = shalt.err (!%p6332_p4)
}
  0xdd   :  { %s6336_s30 = scalar_lea.vmem %s176_s7, 3072  ;;  %p6341_p6 = scmp.lt.s32.totalorder %s176_s7, %s176_s7 }
  0xde   :  { %p6337_p5 = scmp.ne.s32.totalorder %s176_s7, %s6336_s30  ;;  %p6342_p7 = scmp.lt.s32.totalorder %s6336_s30, %s6336_s30 }
  0xe0   :  { %p6343_p8 = por %p6342_p7, %p6341_p6 }
  0xe2   :  { %p6344_p9 = pnand %p6343_p8, %p6337_p5 }
  0xe4   :  { %6347 = shalt.err (!%p6344_p9)
}
  0xe5   :  { %s7622_s17 = smov 12   ;;  %s7623_s10 = smov 192  }
  0xe6   :  { %181 = dma.hbm_to_vmem [thread:$0]  %s7573_s21, 3072, %s176_s7, [#allocation19], %s7623_s10, %s7623_s10, %s7622_s17  }
  0xe7   :  { %6392 = dma.done.wait [#allocation4], 256  }
  0xe8   :  { %6393 = vsyncadd [#allocation4], 4294967040 }
  0xe9   :  { %6394 = dma.done.wait [#allocation7], 32  }
  0xea   :  { %6395 = vsyncadd [#allocation7], 4294967264 }
  0xeb   :  { %6396 = dma.done.wait [#allocation10], 4096  }
  0xec   :  { %6397 = vsyncadd [#allocation10], 4294963200 }
  0xed   :  { %6398 = dma.done.wait [#allocation13], 4096  }
  0xee   :  { %6399 = vsyncadd [#allocation13], 4294963200 }
  0xef   :  { %6400 = dma.done.wait [#allocation16], 8192  }
  0xf0   :  { %6401 = vsyncadd [#allocation16], 4294959104 }
  0xf1   :  { %6402 = dma.done.wait [#allocation19], 3072  }
  0xf2   :  { %6403 = vsyncadd [#allocation19], 4294964224  ;;  %v223_v0 = vld [vmem:[#allocation3] sm:$0xff]  ;;  %v224_v1 = vld [vmem:[#allocation3 + $0x8] sm:$0xff]  ;;  %v6426_v4 = vmov 0.0   ;;  %v6427_v30 = vmov 0   ;;  %v303_v53 = vlaneseq }
  0xf3   :  { %229 = vadd.xlane.f32.xlu0 %v223_v0  ;;  %v5808_v2 = vld [vmem:[#allocation9 + $0x4] ss:$12 sps:$4 sm:$0xff]   ;;  %v5810_v3 = vld [vmem:[#allocation9] ss:$12 sps:$4 sm:$0xff]   ;;  %5412 = vmatprep.subr.bf16.mxu1 %v6426_v4  ;;  %v5811_v5 = vld [vmem:[#allocation9 + $0x8] ss:$12 sps:$4 sm:$0xff]  }
  0xf4   :  { %v5812_v6 = vld [vmem:[#allocation9 + $0x1c] ss:$12 sps:$4 sm:$0xff]   ;;  %446 = vmatprep.subr.bf16.mxu0 %v5808_v2  ;;  %5413 = vmatpush3.bf16.msra.mxu1 %v5811_v5  ;;  %v5814_v15 = vld [vmem:[#allocation9 + $0x18] ss:$12 sps:$4 sm:$0xff]   ;;  %v5815_v16 = vld [vmem:[#allocation9 + $0x20] ss:$12 sps:$4 sm:$0xff]  }
  0xf5   :  { %447 = vmatpush1.bf16.msra.mxu0 %v5810_v3  ;;  %5414 = vmatprep.subr.bf16.mxu1 %v6426_v4  ;;  %v5816_v17 = vld [vmem:[#allocation9 + $0x34] ss:$12 sps:$4 sm:$0xff]   ;;  %v5818_v18 = vld [vmem:[#allocation9 + $0x30] ss:$12 sps:$4 sm:$0xff]   ;;  %v5819_v19 = vld [vmem:[#allocation9 + $0x38] ss:$12 sps:$4 sm:$0xff]  }
  0xf6   :  { %448 = vmatprep.subr.bf16.mxu0 %v5812_v6  ;;  %v5820_v20 = vld [vmem:[#allocation9 + $0x4c] ss:$12 sps:$4 sm:$0xff]   ;;  %v5822_v21 = vld [vmem:[#allocation9 + $0x48] ss:$12 sps:$4 sm:$0xff]   ;;  %v5823_v22 = vld [vmem:[#allocation9 + $0x50] ss:$12 sps:$4 sm:$0xff]   ;;  %478 = vmatprep.mubr.bf16.mxu0 %v6427_v30 }
  0xf7   :  { %231 = vadd.xlane.f32.xlu0 %v224_v1  ;;  %v5824_v23 = vld [vmem:[#allocation9 + $0x64] ss:$12 sps:$4 sm:$0xff]   ;;  %v5826_v24 = vld [vmem:[#allocation9 + $0x60] ss:$12 sps:$4 sm:$0xff]   ;;  %v5827_v25 = vld [vmem:[#allocation9 + $0x68] ss:$12 sps:$4 sm:$0xff]  }
  0xf8   :  { %5415 = vmatpush3.bf16.msra.mxu1 %v5815_v16  ;;  %v5828_v26 = vld [vmem:[#allocation9 + $0x7c] ss:$12 sps:$4 sm:$0xff]   ;;  %v5830_v27 = vld [vmem:[#allocation9 + $0x78] ss:$12 sps:$4 sm:$0xff]   ;;  %v5831_v28 = vld [vmem:[#allocation9 + $0x80] ss:$12 sps:$4 sm:$0xff]  }
  0xf9   :  { %449 = vmatpush1.bf16.msra.mxu0 %v5814_v15  ;;  %5416 = vmatprep.subr.bf16.mxu1 %v6426_v4  ;;  %v5832_v29 = vld [vmem:[#allocation9 + $0x94] ss:$12 sps:$4 sm:$0xff]   ;;  %vm6428_vm0 = vmmov 0   ;;  %v5834_v31 = vld [vmem:[#allocation9 + $0x90] ss:$12 sps:$4 sm:$0xff]   ;;  %v6764_v54 = vshrl.u32 %v303_v53, 7 }
  0xfa   :  { %450 = vmatprep.subr.bf16.mxu0 %v5816_v17  ;;  %5428 = vmatprep.mubr.msk.bf16.mxu1 %vm6428_vm0, %v6426_v4  ;;  %v5835_v32 = vld [vmem:[#allocation9 + $0x98] ss:$12 sps:$4 sm:$0xff]   ;;  %v5838_v34 = vld [vmem:[#allocation9 + $0xa8] ss:$12 sps:$4 sm:$0xff]   ;;  %v5839_v35 = vld [vmem:[#allocation9 + $0xb0] ss:$12 sps:$4 sm:$0xff]  }
  0xfb   :  { %v5836_v33 = vld [vmem:[#allocation9 + $0xac] ss:$12 sps:$4 sm:$0xff]   ;;  %v4992_v44 = vld [vmem:[#allocation6] ss:$0 sm:$0xff]  ;;  %v4993_v48 = vld [vmem:[#allocation8] ss:$0 sm:$0xff] }
  0xfc   :  { %5417 = vmatpush3.bf16.msra.mxu1 %v5819_v19  ;;  %v6767_v55 = vsub.s32 1, %v6764_v54  ;;  %s7624_s3 = sld [smem:[#allocation35_spill]]  ;;  %v6773_v57 = vsub.s32 0, %v6764_v54  ;;  %v6776_v58 = vsub.s32 2, %v6764_v54  ;;  %vm533_vm1 = vcmask 261120   ;;  %s6429_s15 = smov 96  }
  0xfd   :  { %451 = vmatpush1.bf16.msra.mxu0 %v5818_v18  ;;  %5418 = vmatprep.subr.bf16.mxu1 %v6426_v4  ;;  %vm596_vm2 = vcmask 1043456   ;;  %vm580_vm3 = vcmask 64512   ;;  %s6430_s27 = smov 32   ;;  %vm758_vm4 = vcmask 523520   ;;  %vm874_vm5 = vcmask 785920   ;;  %s7625_s9 = sld [smem:[#allocation37_spill]] }
  0xfe   :  { %452 = vmatprep.subr.bf16.mxu0 %v5820_v20  ;;  %vm990_vm6 = vcmask 1048320   ;;  %s7626_s24 = sld [smem:[#allocation38_spill]]  ;;  %s7627_s0 = sld [smem:[#allocation39_spill]]  ;;  %vm2970_vm7 = vcmask 130048   ;;  %vm3193_vm8 = vcmask 261248   ;;  %vm3309_vm9 = vcmask 392448  }
  0xff   :  { %s7628_s10 = sld [smem:[#allocation41_spill]]  ;;  %s7629_s21 = sld [smem:[#allocation43_spill]]  ;;  %vm3425_vm10 = vcmask 523648   ;;  %vm3541_vm11 = vcmask 654848   ;;  %vm3657_vm12 = vcmask 786048   ;;  %vm3773_vm13 = vcmask 917248  }
 0x100   :  { %5419 = vmatpush3.bf16.msra.mxu1 %v5823_v22  ;;  %s7630_s5 = smov 16   ;;  %vm3889_vm14 = vcmask 1048448   ;;  %s6434_s2 = smov [#allocation20]  }
 0x101   :  { %453 = vmatpush1.bf16.msra.mxu0 %v5822_v21  ;;  %5420 = vmatprep.subr.bf16.mxu1 %v6426_v4 }
 0x102   :  { %454 = vmatprep.subr.bf16.mxu0 %v5824_v23  ;;  %v301_v56 = vld [vmem:[%s7624_s3] sm:$0x7] }
 0x103   :  { %v310_v59 = vrot.slane %v301_v56, %v6767_v55  ;;  %v306_v62 = vrot.slane %v301_v56, %v6773_v57  ;;  %v314_v63 = vrot.slane %v301_v56, %v6776_v58 }
 0x104   :  { %5421 = vmatpush3.bf16.msra.mxu1 %v5827_v25 }
 0x105   :  { %455 = vmatpush1.bf16.msra.mxu0 %v5826_v24  ;;  %5422 = vmatprep.subr.bf16.mxu1 %v6426_v4 }
 0x106   :  { %456 = vmatprep.subr.bf16.mxu0 %v5828_v26 }
 0x108   :  { %5423 = vmatpush3.bf16.msra.mxu1 %v5831_v28 }
 0x109   :  { %457 = vmatpush1.bf16.msra.mxu0 %v5830_v27  ;;  %5424 = vmatprep.subr.bf16.mxu1 %v6426_v4 }
 0x10a   :  { %458 = vmatprep.subr.bf16.mxu0 %v5832_v29 }
 0x10c   :  { %5425 = vmatpush3.bf16.msra.mxu1 %v5835_v32 }
 0x10d   :  { %459 = vmatpush1.bf16.msra.mxu0 %v5834_v31  ;;  %5426 = vmatprep.subr.bf16.mxu1 %v6426_v4 }
 0x10e   :  { %460 = vmatprep.subr.bf16.mxu0 %v5836_v33 }
 0x110   :  { %5427 = vmatpush3.bf16.msra.mxu1 %v5839_v35 }
 0x111   :  { %461 = vmatpush1.bf16.msra.mxu0 %v5838_v34  ;;  %5432 = vmatprep.subr.bf16.mxu1 %v6426_v4 }
 0x112   :  { %5456 = vmatprep.subr.bf16.mxu0 %v6426_v4 }
 0x180   :  { %v230_v7 = vpop.xlane.xlu0 %229 }
 0x181   :  { %v234_v8 = vmul.f32 0.0078125, %v230_v7 }
 0x183   :  { %v6739_v9 = vsub.f32 %v223_v0, %v234_v8 }
 0x184   :  { %v232_v10 = vpop.xlane.xlu0 %231 }
 0x185   :  { %v235_v11 = vmul.f32 0.0078125, %v232_v10  ;;  %v238_v12 = vmul.f32 %v6739_v9, %v6739_v9 }
 0x187   :  { %240 = vadd.xlane.f32.xlu1 %v238_v12  ;;  %v6743_v13 = vsub.f32 %v224_v1, %v235_v11 }
 0x189   :  { %v239_v14 = vmul.f32 %v6743_v13, %v6743_v13 }
 0x18b   :  { %242 = vadd.xlane.f32.xlu1 %v239_v14 }
 0x214   :  { %v241_v36 = vpop.xlane.xlu1 %240 }
 0x215   :  { %v244_v37 = vmul.f32 0.0078125, %v241_v36 }
 0x217   :  { %v246_v38 = vadd.f32 1e-05, %v244_v37 }
 0x218   :  { %v243_v39 = vpop.xlane.xlu1 %242 }
 0x219   :  { %6008 = vrsqrt.f32 %v246_v38  ;;  %v245_v40 = vmul.f32 0.0078125, %v243_v39 }
 0x21b   :  { %v247_v41 = vadd.f32 1e-05, %v245_v40 }
 0x21d   :  { %6010 = vrsqrt.f32 %v247_v41 }
 0x223   :  { %v6009_v42 = vpop.eup %6008 }
 0x224   :  { %v250_v43 = vmul.f32 %v6009_v42, %v6739_v9 }
 0x226   :  { %v258_v47 = vmul.f32 %v4992_v44, %v250_v43 }
 0x227   :  { %v6011_v45 = vpop.eup %6010 }
 0x228   :  { %v251_v46 = vmul.f32 %v6011_v45, %v6743_v13  ;;  %v266_v50 = vadd.f32 %v4993_v48, %v258_v47 }
 0x22a   :  { %v259_v49 = vmul.f32 %v4992_v44, %v251_v46 }
 0x22c   :  { %v267_v51 = vadd.f32 %v4993_v48, %v259_v49 }
 0x22e   :  { %v300_v52 = vpack.c.bf16 %v267_v51, %v266_v50 }
 0x230   :  { %479 = vmatmul.mubr.bf16.vlgmr.msra.gmra.mrb[0].mxu0 %v300_v52  ;;  %5429 = vmatmul.mubr.bf16.vlgmr.msra.gmra.mrb[0].mxu1 %v300_v52 }
 0x231   :  { %5434 = vmatprep.mubr.msk.bf16.mxu1 %vm6428_vm0, %v6426_v4  ;;  %5458 = vmatprep.mubr.msk.bf16.mxu0 %vm6428_vm0, %v6426_v4 }
 0x303   :  { %v480_v60 = vpop.f32.mrb[0].mxu0  ;;  %v523_v61 = vpop.f32.mrb[0].mxu1 }
 0x304   :  { %v482_v0 = vpop.f32.mrb[1].mxu0  ;;  %v5430_v1 = vpop.f32.mrb[1].mxu1  ;;  %v524_v12 = vadd.f32 %v523_v61, %v314_v63  ;;  %v481_v14 = vadd.f32 %v480_v60, %v306_v62 }
 0x305   :  { %v483_v2 = vadd.f32 %v482_v0, %v310_v59  ;;  %v484_v3 = vpop.f32.mrb[2].mxu0  ;;  %v526_v5 = vpop.f32.mrb[2].mxu1 }
 0x306   :  { %v485_v6 = vadd.f32 %v484_v3, %v306_v62  ;;  %v6781_v7 = vadd.f32 %v526_v5, %v314_v63  ;;  %v486_v8 = vpop.f32.mrb[3].mxu0  ;;  %v5431_v9 = vpop.f32.mrb[3].mxu1  ;;  %v6785_v15 = vpack.c.bf16 %v524_v12, %v524_v12  ;;  %v530_v16 = vpack.c.bf16 %v481_v14, %v481_v14 }
 0x307   :  { %v531_v10 = vpack.c.bf16 %v483_v2, %v483_v2  ;;  %v487_v11 = vadd.f32 %v486_v8, %v310_v59 }
 0x308   :  { %v598_v17 = vsel %vm596_vm2, %v6785_v15, 0  ;;  %v992_v29 = vpack.c.bf16 %v485_v6, %v485_v6 }
 0x309   :  { %v538_v13 = vsel %vm533_vm1, %v531_v10, 0  ;;  %v993_v23 = vpack.c.bf16 %v487_v11, %v487_v11 }
 0x30a   :  { %5433 = vmatpush3.bf16.xpose.msra.mxu1 %v538_v13 }
 0x30b   :  { %5438 = vmatprep.subr.bf16.mxu1 %v6426_v4  ;;  %v999_v44 = vsel %vm533_vm1, %v993_v23, 0 }
 0x311   :  { %5435 = vmatmul.mubr.msk.bf16.vlgmr.msra.gmra.mrb[4].mxu1 %vm533_vm1, %v530_v16 }
 0x312   :  { %5439 = vmatpush3.bf16.msra.mxu1 %v598_v17  ;;  %5440 = vmatprep.mubr.msk.bf16.mxu1 %vm6428_vm0, %v6426_v4 }
 0x313   :  { %5444 = vmatprep.subr.bf16.mxu1 %v6426_v4 }
 0x3e4   :  { %v574_v18 = vpop.f32.mrb[4].mxu1 }
 0x3e5   :  { %v5436_v19 = vpop.f32.mrb[5].mxu1  ;;  %v581_v20 = vsel %vm580_vm3, %v574_v18, -inf }
 0x3e6   :  { %582 = vmax.xlane.f32.xlu0 %v581_v20  ;;  %v577_v21 = vpop.f32.mrb[6].mxu1 }
 0x3e7   :  { %v5437_v22 = vpop.f32.mrb[7].mxu1 }
 0x3fc   :  { %645 = vrot.lane.b32.xlu0 %v531_v10, %s6429_s15 }
 0x400   :  { %878 = vrot.lane.b32.xlu0 %v531_v10, %s6430_s27 }
 0x404   :  { %1104 = vrot.lane.b32.xlu0 %v993_v23, %s6429_s15 }
 0x408   :  { %1220 = vrot.lane.b32.xlu0 %v993_v23, %s6421_s8 }
 0x40c   :  { %1335 = vrot.lane.b32.xlu0 %v993_v23, %s6430_s27 }
 0x473   :  { %v583_v24 = vpop.xlane.xlu0 %582 }
 0x474   :  { %v584_v25 = vsub.f32 %v574_v18, %v583_v24 }
 0x476   :  { %v585_v26 = vmul.f32 1.442695, %v584_v25 }
 0x477   :  { %v646_v33 = vpop.permute.xlu0 %645 }
 0x478   :  { %6012 = vpow2.f32 %v585_v26  ;;  %v651_v40 = vsel %vm533_vm1, %v646_v33, 0 }
 0x47b   :  { %v879_v38 = vpop.permute.xlu0 %878 }
 0x47c   :  { %v884_v42 = vsel %vm533_vm1, %v879_v38, 0 }
 0x47f   :  { %v1105_v45 = vpop.permute.xlu0 %1104 }
 0x480   :  { %v1110_v46 = vsel %vm533_vm1, %v1105_v45, 0 }
 0x482   :  { %v6013_v27 = vpop.eup %6012 }
 0x483   :  { %v587_v28 = vsel %vm580_vm3, %v6013_v27, 0.0  ;;  %v1221_v47 = vpop.permute.xlu0 %1220 }
 0x484   :  { %588 = vadd.xlane.f32.xlu1 %v587_v28  ;;  %v1226_v49 = vsel %vm533_vm1, %v1221_v47, 0 }
 0x487   :  { %v1336_v50 = vpop.permute.xlu0 %1335 }
 0x488   :  { %v1341_v52 = vsel %vm533_vm1, %v1336_v50, 0 }
 0x495   :  { %642 = vrot.lane.b32.xlu1 %v530_v16, %s6429_s15 }
 0x499   :  { %762 = vrot.lane.b32.xlu1 %v531_v10, %s6421_s8 }
 0x49d   :  { %760 = vrot.lane.b32.xlu1 %v530_v16, %s6421_s8 }
 0x4a1   :  { %876 = vrot.lane.b32.xlu1 %v530_v16, %s6430_s27 }
 0x4a5   :  { %1101 = vrot.lane.b32.xlu1 %v992_v29, %s6429_s15 }
 0x4a9   :  { %1218 = vrot.lane.b32.xlu1 %v992_v29, %s6421_s8 }
 0x4ad   :  { %1333 = vrot.lane.b32.xlu1 %v992_v29, %s6430_s27 }
 0x511   :  { %v589_v31 = vpop.xlane.xlu1 %588 }
 0x512   :  { %6014 = vrcp.f32 %v589_v31 }
 0x515   :  { %v643_v32 = vpop.permute.xlu1 %642 }
 0x519   :  { %v763_v34 = vpop.permute.xlu1 %762 }
 0x51a   :  { %v768_v35 = vsel %vm533_vm1, %v763_v34, 0 }
 0x51b   :  { %5457 = vmatpush3.bf16.xpose.msra.mxu0 %v768_v35 }
 0x51c   :  { %v6015_v36 = vpop.eup %6014  ;;  %5468 = vmatprep.subr.bf16.mxu0 %v6426_v4 }
 0x51d   :  { %v591_v37 = vmul.f32 %v6015_v36, %v6013_v27  ;;  %v761_v41 = vpop.permute.xlu1 %760 }
 0x51f   :  { %v592_v39 = vpack.c.bf16 %v591_v37, %v591_v37 }
 0x521   :  { %5441 = vmatmul.mubr.msk.bf16.vlgmr.msra.gmra.mrb[8].mxu1 %vm580_vm3, %v592_v39  ;;  %v877_v43 = vpop.permute.xlu1 %876 }
 0x522   :  { %5445 = vmatpush3.bf16.xpose.msra.mxu1 %v651_v40  ;;  %5459 = vmatmul.mubr.msk.bf16.vlgmr.msra.gmra.mrb[4].mxu0 %vm533_vm1, %v761_v41 }
 0x523   :  { %5469 = vmatpush3.bf16.xpose.msra.mxu0 %v884_v42  ;;  %5446 = vmatprep.mubr.msk.bf16.mxu1 %vm6428_vm0, %v6426_v4 }
 0x524   :  { %5470 = vmatprep.mubr.msk.bf16.mxu0 %vm6428_vm0, %v6426_v4  ;;  %5480 = vmatprep.subr.bf16.mxu0 %v6426_v4 }
 0x525   :  { %5450 = vmatprep.subr.bf16.mxu1 %v6426_v4  ;;  %v1102_v48 = vpop.permute.xlu1 %1101 }
 0x529   :  { %5447 = vmatmul.mubr.msk.bf16.vlgmr.msra.gmra.mrb[12].mxu1 %vm533_vm1, %v643_v32  ;;  %v1219_v51 = vpop.permute.xlu1 %1218 }
 0x52a   :  { %5471 = vmatmul.mubr.msk.bf16.vlgmr.msra.gmra.mrb[8].mxu0 %vm533_vm1, %v877_v43  ;;  %5452 = vmatprep.mubr.msk.bf16.mxu1 %vm6428_vm0, %v6426_v4 }
 0x52b   :  { %5481 = vmatpush3.bf16.xpose.msra.mxu0 %v999_v44  ;;  %5482 = vmatprep.mubr.msk.bf16.mxu0 %vm6428_vm0, %v6426_v4 }
 0x52c   :  { %5492 = vmatprep.subr.bf16.mxu0 %v6426_v4 }
 0x52d   :  { %v1334_v53 = vpop.permute.xlu1 %1333 }
 0x532   :  { %5483 = vmatmul.mubr.msk.bf16.vlgmr.msra.gmra.mrb[12].mxu0 %vm533_vm1, %v992_v29 }
 0x533   :  { %5493 = vmatpush3.bf16.xpose.msra.mxu0 %v1110_v46  ;;  %5494 = vmatprep.mubr.msk.bf16.mxu0 %vm6428_vm0, %v6426_v4 }
 0x534   :  { %5504 = vmatprep.subr.bf16.mxu0 %v6426_v4 }
 0x53a   :  { %5495 = vmatmul.mubr.msk.bf16.vlgmr.msra.gmra.mrb[16].mxu0 %vm533_vm1, %v1102_v48 }
 0x53b   :  { %5505 = vmatpush3.bf16.xpose.msra.mxu0 %v1226_v49  ;;  %5506 = vmatprep.mubr.msk.bf16.mxu0 %vm6428_vm0, %v6426_v4 }
 0x53c   :  { %5516 = vmatprep.subr.bf16.mxu0 %v6426_v4 }
 0x542   :  { %5507 = vmatmul.mubr.msk.bf16.vlgmr.msra.gmra.mrb[20].mxu0 %vm533_vm1, %v1219_v51 }
 0x543   :  { %5517 = vmatpush3.bf16.xpose.msra.mxu0 %v1341_v52  ;;  %5518 = vmatprep.mubr.msk.bf16.mxu0 %vm6428_vm0, %v6426_v4 }
 0x544   :  { %5528 = vmatprep.subr.bf16.mxu0 %v6426_v4 }
 0x54a   :  { %5519 = vmatmul.mubr.msk.bf16.vlgmr.msra.gmra.mrb[24].mxu0 %vm533_vm1, %v1334_v53 }
 0x54b   :  { %5544 = vmatprep.mubr.msk.bf16.mxu0 %vm6428_vm0, %v6426_v4 }
 0x5f4   :  { %v634_v56 = vpop.f32.mrb[8].mxu1 }
 0x5f5   :  { %640 = vst.msk [vmem:[#allocation2] sm:$0xff] %vm533_vm1, %v634_v56  ;;  %v5442_v59 = vpop.f32.mrb[9].mxu1  ;;  %v804_v60 = vpop.f32.mrb[4].mxu0 }
 0x5f6   :  { %v637_v61 = vpop.f32.mrb[10].mxu1  ;;  %v5460_v62 = vpop.f32.mrb[5].mxu0  ;;  %v810_v63 = vsel %vm580_vm3, %v804_v60, -inf }
 0x5f7   :  { %811 = vmax.xlane.f32.xlu1 %v810_v63  ;;  %v5443_v0 = vpop.f32.mrb[11].mxu1  ;;  %v807_v1 = vpop.f32.mrb[6].mxu0 }
 0x5f8   :  { %v5461_v2 = vpop.f32.mrb[7].mxu0 }
 0x5fc   :  { %v687_v3 = vpop.f32.mrb[12].mxu1 }
 0x5fd   :  { %v5448_v5 = vpop.f32.mrb[13].mxu1  ;;  %v920_v6 = vpop.f32.mrb[8].mxu0  ;;  %v693_v8 = vsel %vm580_vm3, %v687_v3, -inf }
 0x5fe   :  { %v5472_v9 = vpop.f32.mrb[9].mxu0  ;;  %694 = vmax.xlane.f32.xlu0 %v693_v8  ;;  %v690_v10 = vpop.f32.mrb[14].mxu1  ;;  %v926_v14 = vsel %vm580_vm3, %v920_v6, -inf }
 0x5ff   :  { %v5449_v11 = vpop.f32.mrb[15].mxu1  ;;  %v923_v12 = vpop.f32.mrb[10].mxu0 }
 0x600   :  { %v5473_v13 = vpop.f32.mrb[11].mxu0 }
 0x602   :  { %927 = vmax.xlane.f32.xlu0 %v926_v14 }
 0x605   :  { %v1035_v16 = vpop.f32.mrb[12].mxu0 }
 0x606   :  { %v5484_v17 = vpop.f32.mrb[13].mxu0  ;;  %v1041_v18 = vsel %vm580_vm3, %v1035_v16, -inf }
 0x607   :  { %v1038_v19 = vpop.f32.mrb[14].mxu0  ;;  %1042 = vmax.xlane.f32.xlu0 %v1041_v18 }
 0x608   :  { %v5485_v20 = vpop.f32.mrb[15].mxu0 }
 0x60d   :  { %v1146_v21 = vpop.f32.mrb[16].mxu0 }
 0x60e   :  { %v5496_v22 = vpop.f32.mrb[17].mxu0  ;;  %v1152_v23 = vsel %vm580_vm3, %v1146_v21, -inf }
 0x60f   :  { %v1149_v24 = vpop.f32.mrb[18].mxu0  ;;  %1153 = vmax.xlane.f32.xlu0 %v1152_v23 }
 0x610   :  { %v5497_v25 = vpop.f32.mrb[19].mxu0 }
 0x615   :  { %v1262_v26 = vpop.f32.mrb[20].mxu0 }
 0x616   :  { %v5508_v27 = vpop.f32.mrb[21].mxu0  ;;  %v1268_v28 = vsel %vm580_vm3, %v1262_v26, -inf }
 0x617   :  { %1269 = vmax.xlane.f32.xlu1 %v1268_v28  ;;  %v1265_v29 = vpop.f32.mrb[22].mxu0 }
 0x618   :  { %v5509_v31 = vpop.f32.mrb[23].mxu0 }
 0x61d   :  { %v1377_v32 = vpop.f32.mrb[24].mxu0 }
 0x61e   :  { %v5520_v33 = vpop.f32.mrb[25].mxu0  ;;  %v1383_v34 = vsel %vm580_vm3, %v1377_v32, -inf }
 0x61f   :  { %v1380_v35 = vpop.f32.mrb[26].mxu0  ;;  %1384 = vmax.xlane.f32.xlu0 %v1383_v34 }
 0x620   :  { %v5521_v36 = vpop.f32.mrb[27].mxu0 }
 0x684   :  { %v812_v37 = vpop.xlane.xlu1 %811 }
 0x685   :  { %v813_v38 = vsub.f32 %v804_v60, %v812_v37 }
 0x687   :  { %v814_v39 = vmul.f32 1.442695, %v813_v38 }
 0x689   :  { %6016 = vpow2.f32 %v814_v39 }
 0x68b   :  { %v695_v40 = vpop.xlane.xlu0 %694 }
 0x68c   :  { %v696_v41 = vsub.f32 %v687_v3, %v695_v40 }
 0x68e   :  { %v697_v44 = vmul.f32 1.442695, %v696_v41 }
 0x68f   :  { %v928_v42 = vpop.xlane.xlu0 %927 }
 0x690   :  { %v929_v43 = vsub.f32 %v920_v6, %v928_v42 }
 0x692   :  { %v930_v45 = vmul.f32 1.442695, %v929_v43 }
 0x693   :  { %v6853_v46 = vpop.eup %6016 }
 0x694   :  { %6018 = vpow2.f32 %v930_v45  ;;  %v1043_v47 = vpop.xlane.xlu0 %1042  ;;  %v816_v48 = vsel %vm580_vm3, %v6853_v46, 0.0 }
 0x695   :  { %v1044_v49 = vsub.f32 %v1035_v16, %v1043_v47  ;;  %817 = vadd.xlane.f32.xlu0 %v816_v48  ;;  %6020 = vpow2.f32 %v697_v44 }
 0x697   :  { %v1045_v50 = vmul.f32 1.442695, %v1044_v49 }
 0x699   :  { %6022 = vpow2.f32 %v1045_v50 }
 0x69c   :  { %v1154_v51 = vpop.xlane.xlu0 %1153 }
 0x69d   :  { %v1155_v52 = vsub.f32 %v1146_v21, %v1154_v51 }
 0x69e   :  { %v6857_v53 = vpop.eup %6018 }
 0x69f   :  { %v1156_v56 = vmul.f32 1.442695, %v1155_v52  ;;  %v932_v59 = vsel %vm580_vm3, %v6857_v53, 0.0  ;;  %v6021_v60 = vpop.eup %6020 }
 0x6a0   :  { %933 = vadd.xlane.f32.xlu1 %v932_v59  ;;  %v699_v62 = vsel %vm580_vm3, %v6021_v60, 0.0 }
 0x6a1   :  { %6024 = vpow2.f32 %v1156_v56 }
 0x6a3   :  { %v6861_v61 = vpop.eup %6022 }
 0x6a4   :  { %700 = vadd.xlane.f32.xlu1 %v699_v62  ;;  %v1047_v63 = vsel %vm580_vm3, %v6861_v61, 0.0  ;;  %v1270_v2 = vpop.xlane.xlu1 %1269 }
 0x6a5   :  { %1048 = vadd.xlane.f32.xlu0 %v1047_v63  ;;  %v1271_v3 = vsub.f32 %v1262_v26, %v1270_v2 }
 0x6a7   :  { %v1272_v5 = vmul.f32 1.442695, %v1271_v3 }
 0x6a9   :  { %6026 = vpow2.f32 %v1272_v5 }
 0x6ab   :  { %v6866_v0 = vpop.eup %6024 }
 0x6ac   :  { %v1158_v1 = vsel %vm580_vm3, %v6866_v0, 0.0  ;;  %v1385_v6 = vpop.xlane.xlu0 %1384 }
 0x6ad   :  { %1159 = vadd.xlane.f32.xlu0 %v1158_v1  ;;  %v1386_v8 = vsub.f32 %v1377_v32, %v1385_v6 }
 0x6af   :  { %v1387_v9 = vmul.f32 1.442695, %v1386_v8 }
 0x6b1   :  { %6028 = vpow2.f32 %v1387_v9 }
 0x6b3   :  { %v6876_v10 = vpop.eup %6026 }
 0x6b4   :  { %v1274_v11 = vsel %vm580_vm3, %v6876_v10, 0.0 }
 0x6b5   :  { %706 = vrot.lane.b32.xlu1 %v6785_v15, %s6429_s15 }
 0x6bb   :  { %v6880_v12 = vpop.eup %6028 }
 0x6bc   :  { %v1389_v13 = vsel %vm580_vm3, %v6880_v12, 0.0 }
 0x6c3   :  { %822 = vrot.lane.b32.xlu0 %v6785_v15, %s6421_s8 }
 0x6c7   :  { %938 = vrot.lane.b32.xlu0 %v6785_v15, %s6430_s27  ;;  %v994_v15 = vpack.c.bf16 %v6781_v7, %v6781_v7 }
 0x6c9   :  { %v1057_v36 = vsel %vm596_vm2, %v994_v15, 0 }
 0x6d9   :  { %1275 = vadd.xlane.f32.xlu1 %v1274_v11 }
 0x6e6   :  { %1390 = vadd.xlane.f32.xlu0 %v1389_v13 }
 0x6ea   :  { %1165 = vrot.lane.b32.xlu1 %v994_v15, %s6429_s15 }
 0x6ee   :  { %1395 = vrot.lane.b32.xlu1 %v994_v15, %s6430_s27 }
 0x6fc   :  { %1280 = vrot.lane.b32.xlu0 %v994_v15, %s6421_s8  ;;  %v5840_v15 = vld [vmem:[#allocation11] sm:$0xff]  }
 0x6fd   :  { %5529 = vmatpush3.bf16.msra.mxu0 %v5840_v15  ;;  %v5865_v15 = vld [vmem:[#allocation12 + $0x54] ss:$8 sps:$4 sm:$0xff]  }
 0x6fe   :  { %5530 = vmatprep.subr.bf16.mxu0 %v6426_v4 }
 0x722   :  { %v818_v17 = vpop.xlane.xlu0 %817 }
 0x72d   :  { %v934_v14 = vpop.xlane.xlu1 %933 }
 0x731   :  { %v701_v16 = vpop.xlane.xlu1 %700 }
 0x732   :  { %6030 = vrcp.f32 %v701_v16  ;;  %v1049_v19 = vpop.xlane.xlu0 %1048  ;;  %v5842_v16 = vld [vmem:[#allocation11 + $0x10] sm:$0xff]  }
 0x733   :  { %6032 = vrcp.f32 %v818_v17  ;;  %v5843_v17 = vld [vmem:[#allocation11 + $0x18] sm:$0xff]  }
 0x734   :  { %6034 = vrcp.f32 %v934_v14  ;;  %v5841_v14 = vld [vmem:[#allocation11 + $0x8] sm:$0xff]  }
 0x735   :  { %v707_v18 = vpop.permute.xlu1 %706  ;;  %6036 = vrcp.f32 %v1049_v19  ;;  %5531 = vmatpush3.bf16.msra.mxu0 %v5841_v14  ;;  %v5863_v14 = vld [vmem:[#allocation12 + $0x50] ss:$8 sps:$4 sm:$0xff]  }
 0x736   :  { %v712_v20 = vsel %vm596_vm2, %v707_v18, 0  ;;  %5532 = vmatprep.subr.bf16.mxu0 %v6426_v4 }
 0x737   :  { %5451 = vmatpush3.bf16.msra.mxu1 %v712_v20  ;;  %v5844_v20 = vld [vmem:[#allocation11 + $0x20] sm:$0xff]  }
 0x738   :  { %5462 = vmatprep.subr.bf16.mxu1 %v6426_v4 }
 0x739   :  { %5533 = vmatpush3.bf16.msra.mxu0 %v5842_v16  ;;  %v5868_v16 = vld [vmem:[#allocation12 + $0x64] ss:$8 sps:$4 sm:$0xff]  }
 0x73a   :  { %v1160_v21 = vpop.xlane.xlu0 %1159  ;;  %5534 = vmatprep.subr.bf16.mxu0 %v6426_v4 }
 0x73b   :  { %6038 = vrcp.f32 %v1160_v21 }
 0x73c   :  { %v6031_v7 = vpop.eup %6030 }
 0x73d   :  { %v703_v22 = vmul.f32 %v6031_v7, %v6021_v60  ;;  %v6033_v26 = vpop.eup %6032  ;;  %5535 = vmatpush3.bf16.msra.mxu0 %v5843_v17  ;;  %v5866_v17 = vld [vmem:[#allocation12 + $0x60] ss:$8 sps:$4 sm:$0xff]  }
 0x73e   :  { %v823_v23 = vpop.permute.xlu0 %822  ;;  %v820_v27 = vmul.f32 %v6033_v26, %v6853_v46  ;;  %v6035_v31 = vpop.eup %6034  ;;  %5536 = vmatprep.subr.bf16.mxu0 %v6426_v4 }
 0x73f   :  { %v828_v24 = vsel %vm596_vm2, %v823_v23, 0  ;;  %v704_v25 = vpack.c.bf16 %v703_v22, %v703_v22  ;;  %v936_v33 = vmul.f32 %v6035_v31, %v6857_v53  ;;  %v6037_v35 = vpop.eup %6036  ;;  %v5845_v22 = vld [vmem:[#allocation11 + $0x28] sm:$0xff]   ;;  %v5846_v23 = vld [vmem:[#allocation11 + $0x30] sm:$0xff]  }
 0x740   :  { %v821_v29 = vpack.c.bf16 %v820_v27, %v820_v27  ;;  %v1051_v37 = vmul.f32 %v6037_v35, %v6861_v61 }
 0x741   :  { %5453 = vmatmul.mubr.msk.bf16.vlgmr.msra.gmra.mrb[16].mxu1 %vm580_vm3, %v704_v25  ;;  %v937_v34 = vpack.c.bf16 %v936_v33, %v936_v33  ;;  %5537 = vmatpush3.bf16.msra.mxu0 %v5844_v20  ;;  %v5847_v25 = vld [vmem:[#allocation11 + $0x38] sm:$0xff]   ;;  %v5872_v20 = vld [vmem:[#allocation14 + $0x40] sm:$0xff]  }
 0x742   :  { %5463 = vmatpush3.bf16.msra.mxu1 %v828_v24  ;;  %5464 = vmatprep.mubr.msk.bf16.mxu1 %vm6428_vm0, %v6426_v4  ;;  %v939_v28 = vpop.permute.xlu0 %938  ;;  %v1052_v38 = vpack.c.bf16 %v1051_v37, %v1051_v37 }
 0x743   :  { %5474 = vmatprep.subr.bf16.mxu1 %v6426_v4  ;;  %v944_v32 = vsel %vm596_vm2, %v939_v28, 0  ;;  %5538 = vmatprep.subr.bf16.mxu0 %v6426_v4 }
 0x745   :  { %v6039_v39 = vpop.eup %6038  ;;  %5539 = vmatpush3.bf16.msra.mxu0 %v5845_v22  ;;  %v5875_v22 = vld [vmem:[#allocation14 + $0x8] sm:$0xff]  }
 0x746   :  { %v1162_v41 = vmul.f32 %v6039_v39, %v6866_v0  ;;  %5540 = vmatprep.subr.bf16.mxu0 %v6426_v4 }
 0x748   :  { %v1163_v44 = vpack.c.bf16 %v1162_v41, %v1162_v41 }
 0x749   :  { %5465 = vmatmul.mubr.msk.bf16.vlgmr.msra.gmra.mrb[20].mxu1 %vm580_vm3, %v821_v29  ;;  %5541 = vmatpush3.bf16.msra.mxu0 %v5846_v23  ;;  %v5876_v23 = vld [vmem:[#allocation14 + $0x50] sm:$0xff]  }
 0x74a   :  { %5475 = vmatpush3.bf16.msra.mxu1 %v944_v32  ;;  %5476 = vmatprep.mubr.msk.bf16.mxu1 %vm6428_vm0, %v6426_v4 }
 0x74b   :  { %5486 = vmatprep.subr.bf16.mxu1 %v6426_v4  ;;  %5542 = vmatprep.subr.bf16.mxu0 %v6426_v4 }
 0x74d   :  { %5543 = vmatpush3.bf16.msra.mxu0 %v5847_v25  ;;  %v5878_v25 = vld [vmem:[#allocation14 + $0x58] sm:$0xff]  }
 0x74e   :  { %5264 = vmatprep.subr.bf16.mxu0 %v5872_v20 }
 0x751   :  { %5477 = vmatmul.mubr.msk.bf16.vlgmr.msra.gmra.mrb[24].mxu1 %vm580_vm3, %v937_v34 }
 0x752   :  { %5487 = vmatpush3.bf16.msra.mxu1 %v1057_v36  ;;  %5488 = vmatprep.mubr.msk.bf16.mxu1 %vm6428_vm0, %v6426_v4 }
 0x753   :  { %5498 = vmatprep.subr.bf16.mxu1 %v6426_v4 }
 0x759   :  { %5489 = vmatmul.mubr.msk.bf16.vlgmr.msra.gmra.mrb[28].mxu1 %vm580_vm3, %v1052_v38 }
 0x75a   :  { %5500 = vmatprep.mubr.msk.bf16.mxu1 %vm6428_vm0, %v6426_v4 }
 0x766   :  { %v1276_v40 = vpop.xlane.xlu1 %1275 }
 0x767   :  { %6040 = vrcp.f32 %v1276_v40 }
 0x76a   :  { %v1166_v42 = vpop.permute.xlu1 %1165 }
 0x76b   :  { %v1171_v43 = vsel %vm596_vm2, %v1166_v42, 0 }
 0x76c   :  { %5499 = vmatpush3.bf16.msra.mxu1 %v1171_v43 }
 0x76d   :  { %5510 = vmatprep.subr.bf16.mxu1 %v6426_v4 }
 0x76e   :  { %v1396_v50 = vpop.permute.xlu1 %1395 }
 0x76f   :  { %5501 = vmatmul.mubr.msk.bf16.vlgmr.msra.gmra.mrb[32].mxu1 %vm580_vm3, %v1163_v44  ;;  %v1401_v52 = vsel %vm596_vm2, %v1396_v50, 0  ;;  %v5042_v44 = vld [vmem:[%s7625_s9] ss:$0 sm:$0xff]  ;;  %v6125_v50 = vld [vmem:[#allocation3 + $0x8] sm:$0xff] }
 0x770   :  { %5512 = vmatprep.mubr.msk.bf16.mxu1 %vm6428_vm0, %v6426_v4 }
 0x771   :  { %v6041_v45 = vpop.eup %6040 }
 0x772   :  { %v1278_v47 = vmul.f32 %v6041_v45, %v6876_v10  ;;  %v6124_v45 = vld [vmem:[#allocation3] sm:$0xff] }
 0x773   :  { %v1391_v46 = vpop.xlane.xlu0 %1390 }
 0x774   :  { %6042 = vrcp.f32 %v1391_v46  ;;  %v1279_v51 = vpack.c.bf16 %v1278_v47, %v1278_v47 }
 0x777   :  { %v1281_v48 = vpop.permute.xlu0 %1280 }
 0x778   :  { %v1286_v49 = vsel %vm596_vm2, %v1281_v48, 0 }
 0x779   :  { %5511 = vmatpush3.bf16.msra.mxu1 %v1286_v49 }
 0x77a   :  { %5522 = vmatprep.subr.bf16.mxu1 %v6426_v4 }
 0x77c   :  { %5513 = vmatmul.mubr.msk.bf16.vlgmr.msra.gmra.mrb[36].mxu1 %vm580_vm3, %v1279_v51 }
 0x77d   :  { %5523 = vmatpush3.bf16.msra.mxu1 %v1401_v52  ;;  %5524 = vmatprep.mubr.msk.bf16.mxu1 %vm6428_vm0, %v6426_v4 }
 0x77e   :  { %v6043_v53 = vpop.eup %6042 }
 0x77f   :  { %v1393_v56 = vmul.f32 %v6043_v53, %v6880_v12 }
 0x781   :  { %v1394_v59 = vpack.c.bf16 %v1393_v56, %v1393_v56  ;;  %v5848_v56 = vld [vmem:[#allocation12] ss:$8 sps:$4 sm:$0xff]  }
 0x784   :  { %5525 = vmatmul.mubr.msk.bf16.vlgmr.msra.gmra.mrb[40].mxu1 %vm580_vm3, %v1394_v59  ;;  %v5850_v59 = vld [vmem:[#allocation12 + $0x4] ss:$8 sps:$4 sm:$0xff]  }
 0x785   :  { %1748 = vmatprep.mubr.bf16.mxu1 %v6427_v30  ;;  %1716 = vmatprep.subr.bf16.mxu1 %v5850_v59  ;;  %v1624_v59 = vld [vmem:[%s7628_s10] sm:$0x3]  ;;  %s6433_s10 = smov 48  }
 0x786   :  { %1717 = vmatpush1.bf16.msra.mxu1 %v5848_v56  ;;  %v5887_v56 = vld [vmem:[#allocation14 + $0x38] sm:$0xff]  }
 0x814   :  { %v748_v60 = vpop.f32.mrb[16].mxu1 }
 0x815   :  { %755 = vrot.lane.b32.xlu1 %v748_v60, %s6430_s27  ;;  %v5454_v61 = vpop.f32.mrb[17].mxu1  ;;  %v5853_v60 = vld [vmem:[#allocation12 + $0x14] ss:$8 sps:$4 sm:$0xff]  }
 0x816   :  { %v751_v62 = vpop.f32.mrb[18].mxu1  ;;  %v5851_v61 = vld [vmem:[#allocation12 + $0x10] ss:$8 sps:$4 sm:$0xff]   ;;  %1718 = vmatprep.subr.bf16.mxu1 %v5853_v60  ;;  %v1629_v60 = vrot.slane %v1624_v59, %v6773_v57 }
 0x817   :  { %v5455_v63 = vpop.f32.mrb[19].mxu1  ;;  %1719 = vmatpush1.bf16.msra.mxu1 %v5851_v61  ;;  %v1633_v61 = vrot.slane %v1624_v59, %v6767_v55  ;;  %v5918_v59 = vld [vmem:[#allocation15 + $0xa0] ss:$16 sps:$4 sm:$0xff]  }
 0x81c   :  { %v864_v0 = vpop.f32.mrb[20].mxu1 }
 0x81d   :  { %871 = vrot.lane.b32.xlu1 %v864_v0, %s6421_s8  ;;  %v5466_v1 = vpop.f32.mrb[21].mxu1 }
 0x81e   :  { %v867_v2 = vpop.f32.mrb[22].mxu1 }
 0x81f   :  { %v5467_v3 = vpop.f32.mrb[23].mxu1 }
 0x824   :  { %v980_v5 = vpop.f32.mrb[24].mxu1 }
 0x825   :  { %987 = vrot.lane.b32.xlu0 %v980_v5, %s6429_s15  ;;  %v5478_v6 = vpop.f32.mrb[25].mxu1 }
 0x826   :  { %v983_v8 = vpop.f32.mrb[26].mxu1 }
 0x827   :  { %v5479_v9 = vpop.f32.mrb[27].mxu1  ;;  %v5856_v8 = vld [vmem:[#allocation12 + $0x24] ss:$8 sps:$4 sm:$0xff]  }
 0x828   :  { %v5854_v9 = vld [vmem:[#allocation12 + $0x20] ss:$8 sps:$4 sm:$0xff]   ;;  %1720 = vmatprep.subr.bf16.mxu1 %v5856_v8 }
 0x829   :  { %1721 = vmatpush1.bf16.msra.mxu1 %v5854_v9 }
 0x82c   :  { %v1093_v10 = vpop.f32.mrb[28].mxu1 }
 0x82d   :  { %1099 = vst.msk [vmem:[#allocation2 + $0x8] sm:$0xff] %vm533_vm1, %v1093_v10  ;;  %v5490_v11 = vpop.f32.mrb[29].mxu1  ;;  %v5859_v10 = vld [vmem:[#allocation12 + $0x34] ss:$8 sps:$4 sm:$0xff]  }
 0x82e   :  { %v1096_v12 = vpop.f32.mrb[30].mxu1  ;;  %v5857_v11 = vld [vmem:[#allocation12 + $0x30] ss:$8 sps:$4 sm:$0xff]   ;;  %1722 = vmatprep.subr.bf16.mxu1 %v5859_v10 }
 0x82f   :  { %v5491_v13 = vpop.f32.mrb[31].mxu1  ;;  %v5862_v12 = vld [vmem:[#allocation12 + $0x44] ss:$8 sps:$4 sm:$0xff]   ;;  %1723 = vmatpush1.bf16.msra.mxu1 %v5857_v11 }
 0x830   :  { %v5860_v13 = vld [vmem:[#allocation12 + $0x40] ss:$8 sps:$4 sm:$0xff]   ;;  %1724 = vmatprep.subr.bf16.mxu1 %v5862_v12 }
 0x833   :  { %1725 = vmatpush1.bf16.msra.mxu1 %v5860_v13 }
 0x834   :  { %1726 = vmatprep.subr.bf16.mxu1 %v5865_v15 }
 0x837   :  { %1727 = vmatpush1.bf16.msra.mxu1 %v5863_v14 }
 0x838   :  { %1728 = vmatprep.subr.bf16.mxu1 %v5868_v16 }
 0x83b   :  { %1729 = vmatpush1.bf16.msra.mxu1 %v5866_v17 }
 0x842   :  { %v1207_v18 = vpop.f32.mrb[32].mxu1 }
 0x843   :  { %1214 = vrot.lane.b32.xlu1 %v1207_v18, %s6430_s27  ;;  %v5502_v19 = vpop.f32.mrb[33].mxu1  ;;  %v5871_v18 = vld [vmem:[#allocation12 + $0x74] ss:$8 sps:$4 sm:$0xff]  }
 0x844   :  { %v1210_v21 = vpop.f32.mrb[34].mxu1  ;;  %v5869_v19 = vld [vmem:[#allocation12 + $0x70] ss:$8 sps:$4 sm:$0xff]   ;;  %1730 = vmatprep.subr.bf16.mxu1 %v5871_v18 }
 0x845   :  { %v5503_v7 = vpop.f32.mrb[35].mxu1  ;;  %1731 = vmatpush1.bf16.msra.mxu1 %v5869_v19  ;;  %v5873_v21 = vld [vmem:[#allocation14] sm:$0xff]   ;;  %v5077_v19 = vld [vmem:[%s7629_s21] ss:$0 sm:$0xff] }
 0x846   :  { %v5874_v7 = vld [vmem:[#allocation14 + $0x48] sm:$0xff]  }
 0x84f   :  { %v1322_v24 = vpop.f32.mrb[36].mxu1 }
 0x850   :  { %1329 = vrot.lane.b32.xlu1 %v1322_v24, %s6421_s8  ;;  %v5514_v26 = vpop.f32.mrb[37].mxu1  ;;  %v5877_v24 = vld [vmem:[#allocation14 + $0x10] sm:$0xff]  }
 0x851   :  { %v1325_v27 = vpop.f32.mrb[38].mxu1  ;;  %v5879_v26 = vld [vmem:[#allocation14 + $0x18] sm:$0xff]  }
 0x852   :  { %v5515_v28 = vpop.f32.mrb[39].mxu1  ;;  %v5880_v27 = vld [vmem:[#allocation14 + $0x60] sm:$0xff]  }
 0x853   :  { %v5881_v28 = vld [vmem:[#allocation14 + $0x20] sm:$0xff]  }
 0x857   :  { %v1437_v29 = vpop.f32.mrb[40].mxu1 }
 0x858   :  { %1444 = vrot.lane.b32.xlu1 %v1437_v29, %s6429_s15  ;;  %v5526_v31 = vpop.f32.mrb[41].mxu1  ;;  %v5882_v29 = vld [vmem:[#allocation14 + $0x68] sm:$0xff]  }
 0x859   :  { %v1440_v32 = vpop.f32.mrb[42].mxu1 }
 0x85a   :  { %v5527_v33 = vpop.f32.mrb[43].mxu1 }
 0x887   :  { %v756_v34 = vpop.permute.xlu1 %755 }
 0x888   :  { %759 = vst.msk [vmem:[#allocation2] sm:$0xff] %vm758_vm4, %v756_v34 }
 0x88f   :  { %v872_v35 = vpop.permute.xlu1 %871 }
 0x890   :  { %875 = vst.msk [vmem:[#allocation2] sm:$0xff] %vm874_vm5, %v872_v35 }
 0x897   :  { %v988_v36 = vpop.permute.xlu0 %987 }
 0x898   :  { %991 = vst.msk [vmem:[#allocation2] sm:$0xff] %vm990_vm6, %v988_v36 }
 0x89f   :  { %v1448_v40 = vld [vmem:[#allocation2] sm:$0xff] }
 0x8b5   :  { %v1215_v37 = vpop.permute.xlu1 %1214 }
 0x8b6   :  { %1217 = vst.msk [vmem:[#allocation2 + $0x8] sm:$0xff] %vm758_vm4, %v1215_v37 }
 0x8c2   :  { %v1330_v38 = vpop.permute.xlu1 %1329 }
 0x8c3   :  { %1332 = vst.msk [vmem:[#allocation2 + $0x8] sm:$0xff] %vm874_vm5, %v1330_v38 }
 0x8ca   :  { %v1445_v39 = vpop.permute.xlu1 %1444 }
 0x8cb   :  { %1447 = vst.msk [vmem:[#allocation2 + $0x8] sm:$0xff] %vm990_vm6, %v1445_v39  ;;  %v5043_v39 = vld [vmem:[%s7626_s24] ss:$0 sm:$0xff] }
 0x8d2   :  { %v1449_v41 = vld [vmem:[#allocation2 + $0x8] sm:$0xff] }
 0x8d3   :  { %v1466_v42 = vpack.c.bf16 %v1449_v41, %v1448_v40 }
 0x8d5   :  { %5545 = vmatmul.mubr.bf16.vlgmr.msra.gmra.mrb[28].mxu0 %v1466_v42 }
 0x8d6   :  { %5265 = vmatpush3.bf16.msra.mxu0 %v5873_v21 }
 0x8d7   :  { %5266 = vmatprep.subr.bf16.mxu0 %v5874_v7 }
 0x8da   :  { %5267 = vmatpush3.bf16.msra.mxu0 %v5875_v22 }
 0x8db   :  { %5268 = vmatprep.subr.bf16.mxu0 %v5876_v23 }
 0x8de   :  { %5269 = vmatpush3.bf16.msra.mxu0 %v5877_v24  ;;  %v5888_v24 = vld [vmem:[#allocation15] ss:$16 sps:$4 sm:$0xff]  }
 0x8df   :  { %5270 = vmatprep.subr.bf16.mxu0 %v5878_v25  ;;  %v5890_v25 = vld [vmem:[#allocation15 + $0x4] ss:$16 sps:$4 sm:$0xff]  }
 0x8e0   :  { %2218 = vmatprep.subr.bf16.mxu1 %v5890_v25  ;;  %v5081_v25 = vld [vmem:[%s7566_s14] ss:$0 sm:$0xff] }
 0x8e2   :  { %5271 = vmatpush3.bf16.msra.mxu0 %v5879_v26  ;;  %v5891_v26 = vld [vmem:[#allocation15 + $0x8] ss:$16 sps:$4 sm:$0xff]  }
 0x8e3   :  { %5272 = vmatprep.subr.bf16.mxu0 %v5880_v27  ;;  %v5893_v27 = vld [vmem:[#allocation15 + $0xc] ss:$16 sps:$4 sm:$0xff]  }
 0x8e6   :  { %5273 = vmatpush3.bf16.msra.mxu0 %v5881_v28  ;;  %v5896_v28 = vld [vmem:[#allocation15 + $0x24] ss:$16 sps:$4 sm:$0xff]  }
 0x8e7   :  { %5274 = vmatprep.subr.bf16.mxu0 %v5882_v29  ;;  %v5899_v29 = vld [vmem:[#allocation15 + $0x2c] ss:$16 sps:$4 sm:$0xff]  }
 0x9a8   :  { %v1549_v43 = vpop.f32.mrb[28].mxu0 }
 0x9a9   :  { %v1556_v46 = vadd.f32 %v6124_v45, %v1549_v43  ;;  %v5546_v47 = vpop.f32.mrb[29].mxu0  ;;  %v5044_v43 = vld [vmem:[%s7627_s0] ss:$0 sm:$0xff]  ;;  %s4959_s0 = sshll.u32 %s6434_s2, 4  ;;  %s4960_s0 = int_to_ptr.vmem [resolvable:$true] %s4959_s0 }
 0x9aa   :  { %v1552_v48 = vpop.f32.mrb[30].mxu0  ;;  %s6348_s30 = scalar_lea.vmem %s4960_s0, 256  ;;  %p6353_p11 = scmp.lt.s32.totalorder %s4960_s0, %s4960_s0 }
 0x9ab   :  { %v6945_v49 = vadd.f32 %v5042_v44, %v1556_v46  ;;  %v1557_v51 = vadd.f32 %v6125_v50, %v1552_v48  ;;  %v5547_v52 = vpop.f32.mrb[31].mxu0  ;;  %v5883_v48 = vld [vmem:[#allocation14 + $0x28] sm:$0xff]   ;;  %v5884_v50 = vld [vmem:[#allocation14 + $0x70] sm:$0xff]   ;;  %p6349_p10 = scmp.ne.s32.totalorder %s4960_s0, %s6348_s30  ;;  %p6354_p12 = scmp.lt.s32.totalorder %s6348_s30, %s6348_s30 }
 0x9ac   :  { %5275 = vmatpush3.bf16.msra.mxu0 %v5883_v48  ;;  %v5886_v52 = vld [vmem:[#allocation14 + $0x78] sm:$0xff]  }
 0x9ad   :  { %v6947_v53 = vadd.f32 %v5042_v44, %v1557_v51  ;;  %1569 = vadd.xlane.f32.xlu0 %v6945_v49  ;;  %v5885_v51 = vld [vmem:[#allocation14 + $0x30] sm:$0xff]   ;;  %5276 = vmatprep.subr.bf16.mxu0 %v5884_v50  ;;  %v5917_v48 = vld [vmem:[#allocation15 + $0x8c] ss:$16 sps:$4 sm:$0xff]   ;;  %p6355_p13 = por %p6354_p12, %p6353_p11 }
 0x9ae   :  { %v5912_v50 = vld [vmem:[#allocation15 + $0x80] ss:$16 sps:$4 sm:$0xff]  }
 0x9af   :  { %1571 = vadd.xlane.f32.xlu1 %v6947_v53  ;;  %p6356_p0 = pnand %p6355_p13, %p6349_p10 }
 0x9b0   :  { %5277 = vmatpush3.bf16.msra.mxu0 %v5885_v51  ;;  %v5915_v51 = vld [vmem:[#allocation15 + $0x88] ss:$16 sps:$4 sm:$0xff]  }
 0x9b1   :  { %5278 = vmatprep.subr.bf16.mxu0 %v5886_v52  ;;  %v5920_v52 = vld [vmem:[#allocation15 + $0xa4] ss:$16 sps:$4 sm:$0xff]  }
 0x9b4   :  { %5279 = vmatpush3.bf16.msra.mxu0 %v5887_v56  ;;  %v5923_v56 = vld [vmem:[#allocation15 + $0xac] ss:$16 sps:$4 sm:$0xff]  }
 0x9b5   :  { %2261 = vmatprep.subr.bf16.mxu0 %v5893_v27 }
 0xa3a   :  { %v1570_v62 = vpop.xlane.xlu0 %1569 }
 0xa3b   :  { %v1573_v63 = vmul.f32 0.0078125, %v1570_v62 }
 0xa3c   :  { %v1572_v0 = vpop.xlane.xlu1 %1571 }
 0xa3d   :  { %v1574_v1 = vmul.f32 0.0078125, %v1572_v0  ;;  %v1575_v2 = vsub.f32 %v6945_v49, %v1573_v63 }
 0xa3f   :  { %v1577_v3 = vmul.f32 %v1575_v2, %v1575_v2  ;;  %v1576_v5 = vsub.f32 %v6947_v53, %v1574_v1 }
 0xa41   :  { %1579 = vadd.xlane.f32.xlu0 %v1577_v3  ;;  %v1578_v6 = vmul.f32 %v1576_v5, %v1576_v5 }
 0xa45   :  { %1581 = vadd.xlane.f32.xlu0 %v1578_v6 }
 0xace   :  { %v1580_v31 = vpop.xlane.xlu0 %1579 }
 0xacf   :  { %v1583_v32 = vmul.f32 0.0078125, %v1580_v31 }
 0xad1   :  { %v1585_v33 = vadd.f32 1e-05, %v1583_v32 }
 0xad2   :  { %v1582_v34 = vpop.xlane.xlu0 %1581 }
 0xad3   :  { %6044 = vrsqrt.f32 %v1585_v33  ;;  %v1584_v35 = vmul.f32 0.0078125, %v1582_v34 }
 0xad5   :  { %v1586_v36 = vadd.f32 1e-05, %v1584_v35 }
 0xad7   :  { %6046 = vrsqrt.f32 %v1586_v36 }
 0xadd   :  { %v6045_v37 = vpop.eup %6044 }
 0xade   :  { %v1589_v38 = vmul.f32 %v6045_v37, %v1575_v2 }
 0xae0   :  { %v1597_v42 = vmul.f32 %v5043_v39, %v1589_v38 }
 0xae1   :  { %v6047_v40 = vpop.eup %6046 }
 0xae2   :  { %v1590_v41 = vmul.f32 %v6047_v40, %v1576_v5  ;;  %v1605_v45 = vadd.f32 %v5044_v43, %v1597_v42  ;;  %v5905_v40 = vld [vmem:[#allocation15 + $0x4c] ss:$16 sps:$4 sm:$0xff]   ;;  %v5903_v42 = vld [vmem:[#allocation15 + $0x48] ss:$16 sps:$4 sm:$0xff]  }
 0xae4   :  { %v1598_v44 = vmul.f32 %v5043_v39, %v1590_v41  ;;  %v5902_v39 = vld [vmem:[#allocation15 + $0x44] ss:$16 sps:$4 sm:$0xff]   ;;  %v5900_v41 = vld [vmem:[#allocation15 + $0x40] ss:$16 sps:$4 sm:$0xff]  }
 0xae6   :  { %v1606_v46 = vadd.f32 %v5044_v43, %v1598_v44  ;;  %v5908_v43 = vld [vmem:[#allocation15 + $0x64] ss:$16 sps:$4 sm:$0xff]   ;;  %v5911_v44 = vld [vmem:[#allocation15 + $0x6c] ss:$16 sps:$4 sm:$0xff]  }
 0xae8   :  { %v1623_v47 = vpack.c.bf16 %v1606_v46, %v1605_v45  ;;  %v5906_v45 = vld [vmem:[#allocation15 + $0x60] ss:$16 sps:$4 sm:$0xff]   ;;  %v5909_v46 = vld [vmem:[#allocation15 + $0x68] ss:$16 sps:$4 sm:$0xff]  }
 0xaea   :  { %1749 = vmatmul.mubr.bf16.vlgmr.msra.gmra.mrb[44].mxu1 %v1623_v47  ;;  %v5914_v47 = vld [vmem:[#allocation15 + $0x84] ss:$16 sps:$4 sm:$0xff]  }
 0xaeb   :  { %2250 = vmatprep.mubr.bf16.mxu1 %v6427_v30  ;;  %2219 = vmatpush1.bf16.msra.mxu1 %v5888_v24 }
 0xaec   :  { %2220 = vmatprep.subr.bf16.mxu1 %v5896_v28 }
 0xbbd   :  { %v1750_v62 = vpop.f32.mrb[44].mxu1 }
 0xbbe   :  { %v1751_v63 = vadd.f32 %v1750_v62, %v1629_v60  ;;  %v1752_v0 = vpop.f32.mrb[45].mxu1  ;;  %v5929_v62 = vld [vmem:[#allocation15 + $0xcc] ss:$16 sps:$4 sm:$0xff]  }
 0xbbf   :  { %v1753_v1 = vadd.f32 %v1752_v0, %v1633_v61  ;;  %v1754_v2 = vpop.f32.mrb[46].mxu1  ;;  %v5927_v0 = vld [vmem:[#allocation15 + $0xc8] ss:$16 sps:$4 sm:$0xff]  }
 0xbc0   :  { %v1755_v3 = vadd.f32 %v1754_v2, %v1629_v60  ;;  %v1756_v5 = vpop.f32.mrb[47].mxu1  ;;  %v1759_v8 = vmax.f32 %v1751_v63, 0.0  ;;  %v5921_v60 = vld [vmem:[#allocation15 + $0xa8] ss:$16 sps:$4 sm:$0xff]   ;;  %v5924_v63 = vld [vmem:[#allocation15 + $0xc0] ss:$16 sps:$4 sm:$0xff]  }
 0xbc1   :  { %v1757_v6 = vadd.f32 %v1756_v5, %v1633_v61  ;;  %v1760_v10 = vmax.f32 %v1753_v1, 0.0  ;;  %v5926_v61 = vld [vmem:[#allocation15 + $0xc4] ss:$16 sps:$4 sm:$0xff]   ;;  %v5935_v2 = vld [vmem:[#allocation15 + $0xec] ss:$16 sps:$4 sm:$0xff]  }
 0xbc2   :  { %v1761_v9 = vmax.f32 %v1755_v3, 0.0  ;;  %v5932_v1 = vld [vmem:[#allocation15 + $0xe4] ss:$16 sps:$4 sm:$0xff]   ;;  %v5930_v3 = vld [vmem:[#allocation15 + $0xe0] ss:$16 sps:$4 sm:$0xff]  }
 0xbc3   :  { %v1762_v11 = vmax.f32 %v1757_v6, 0.0  ;;  %v5933_v5 = vld [vmem:[#allocation15 + $0xe8] ss:$16 sps:$4 sm:$0xff]   ;;  %v5936_v6 = vld [vmem:[#allocation17 + $0x40] sm:$0xff]  }
 0xbc4   :  { %v1795_v12 = vpack.c.bf16 %v1761_v9, %v1759_v8  ;;  %v5937_v8 = vld [vmem:[#allocation17 + $0xc0] sm:$0xff]  }
 0xbc5   :  { %v1796_v13 = vpack.c.bf16 %v1762_v11, %v1760_v10 }
 0xbc7   :  { %1925 = vmatprep.mubr.bf16.mxu0 %v1796_v13 }
 0xbc8   :  { %1926 = vmatmul.mubr.bf16.vlgmr.msra.gmra.mrb[32].mxu0 %v1795_v12 }
 0xbc9   :  { %2293 = vmatprep.mubr.bf16.mxu0 %v6427_v30  ;;  %2262 = vmatpush1.bf16.msra.mxu0 %v5891_v26 }
 0xbca   :  { %2263 = vmatprep.subr.bf16.mxu0 %v5899_v29 }
 0xc9b   :  { %v5280_v15 = vpop.f32.mrb[32].mxu0 }
 0xc9c   :  { %v5281_v14 = vpop.f32.mrb[33].mxu0 }
 0xc9d   :  { %v5282_v16 = vadd.f32 %v5281_v14, %v5280_v15  ;;  %v5283_v17 = vpop.f32.mrb[34].mxu0 }
 0xc9e   :  { %v5284_v18 = vpop.f32.mrb[35].mxu0 }
 0xc9f   :  { %v1934_v20 = vadd.f32 %v5282_v16, %v6945_v49  ;;  %v5285_v21 = vadd.f32 %v5284_v18, %v5283_v17  ;;  %v5894_v49 = vld [vmem:[#allocation15 + $0x20] ss:$16 sps:$4 sm:$0xff]   ;;  %v5080_v16 = vld [vmem:[%s7565_s13] ss:$0 sm:$0xff] }
 0xca0   :  { %2221 = vmatpush1.bf16.msra.mxu1 %v5894_v49  ;;  %v5078_v17 = vld [vmem:[%s7577_s25] ss:$0 sm:$0xff] }
 0xca1   :  { %v1935_v7 = vadd.f32 %v5285_v21, %v6947_v53  ;;  %v6971_v22 = vadd.f32 %v5077_v19, %v1934_v20  ;;  %v5897_v53 = vld [vmem:[#allocation15 + $0x28] ss:$16 sps:$4 sm:$0xff]   ;;  %2222 = vmatprep.subr.bf16.mxu1 %v5902_v39  ;;  %v5079_v20 = vld [vmem:[%s7578_s26] ss:$0 sm:$0xff]  ;;  %v5945_v39 = vld [vmem:[#allocation17 + $0xd0] sm:$0xff]  }
 0xca2   :  { %2264 = vmatpush1.bf16.msra.mxu0 %v5897_v53 }
 0xca3   :  { %1945 = vadd.xlane.f32.xlu0 %v6971_v22  ;;  %v6974_v23 = vadd.f32 %v5077_v19, %v1935_v7  ;;  %2265 = vmatprep.subr.bf16.mxu0 %v5905_v40  ;;  %v5946_v40 = vld [vmem:[#allocation17 + $0x10] sm:$0xff]  }
 0xca4   :  { %2223 = vmatpush1.bf16.msra.mxu1 %v5900_v41  ;;  %v5947_v41 = vld [vmem:[#allocation17 + $0x90] sm:$0xff]  }
 0xca5   :  { %1947 = vadd.xlane.f32.xlu1 %v6974_v23  ;;  %2224 = vmatprep.subr.bf16.mxu1 %v5908_v43  ;;  %v5949_v43 = vld [vmem:[#allocation17 + $0xd8] sm:$0xff]  }
 0xca6   :  { %2266 = vmatpush1.bf16.msra.mxu0 %v5903_v42  ;;  %v5948_v42 = vld [vmem:[#allocation17 + $0x58] sm:$0xff]  }
 0xca7   :  { %2267 = vmatprep.subr.bf16.mxu0 %v5911_v44  ;;  %v5950_v44 = vld [vmem:[#allocation17 + $0x18] sm:$0xff]  }
 0xca8   :  { %2225 = vmatpush1.bf16.msra.mxu1 %v5906_v45  ;;  %v5951_v45 = vld [vmem:[#allocation17 + $0x98] sm:$0xff]  }
 0xca9   :  { %2226 = vmatprep.subr.bf16.mxu1 %v5914_v47  ;;  %v5953_v47 = vld [vmem:[#allocation17 + $0xe0] sm:$0xff]  }
 0xcaa   :  { %2268 = vmatpush1.bf16.msra.mxu0 %v5909_v46  ;;  %v5952_v46 = vld [vmem:[#allocation17 + $0x60] sm:$0xff]  }
 0xcab   :  { %2269 = vmatprep.subr.bf16.mxu0 %v5917_v48  ;;  %v5954_v48 = vld [vmem:[#allocation17 + $0x20] sm:$0xff]  }
 0xcac   :  { %2227 = vmatpush1.bf16.msra.mxu1 %v5912_v50  ;;  %v5955_v50 = vld [vmem:[#allocation17 + $0xa0] sm:$0xff]  }
 0xcad   :  { %2228 = vmatprep.subr.bf16.mxu1 %v5920_v52  ;;  %v5957_v52 = vld [vmem:[#allocation17 + $0xe8] sm:$0xff]  }
 0xcae   :  { %2270 = vmatpush1.bf16.msra.mxu0 %v5915_v51  ;;  %v5956_v51 = vld [vmem:[#allocation17 + $0x68] sm:$0xff]  }
 0xcaf   :  { %2271 = vmatprep.subr.bf16.mxu0 %v5923_v56  ;;  %v5958_v56 = vld [vmem:[#allocation17 + $0x28] sm:$0xff]  }
 0xcb0   :  { %2229 = vmatpush1.bf16.msra.mxu1 %v5918_v59  ;;  %v5959_v59 = vld [vmem:[#allocation17 + $0xa8] sm:$0xff]  }
 0xcb1   :  { %2230 = vmatprep.subr.bf16.mxu1 %v5926_v61  ;;  %v5961_v61 = vld [vmem:[#allocation17 + $0xf0] sm:$0xff]  }
 0xcb2   :  { %2272 = vmatpush1.bf16.msra.mxu0 %v5921_v60  ;;  %v5960_v60 = vld [vmem:[#allocation17 + $0x70] sm:$0xff]  }
 0xcb3   :  { %2273 = vmatprep.subr.bf16.mxu0 %v5929_v62  ;;  %v5962_v62 = vld [vmem:[#allocation17 + $0x30] sm:$0xff]  }
 0xcb4   :  { %2231 = vmatpush1.bf16.msra.mxu1 %v5924_v63  ;;  %v5963_v63 = vld [vmem:[#allocation17 + $0xb0] sm:$0xff]  }
 0xcb5   :  { %2232 = vmatprep.subr.bf16.mxu1 %v5932_v1  ;;  %v5965_v1 = vld [vmem:[#allocation17 + $0xf8] sm:$0xff]  }
 0xcb6   :  { %2274 = vmatpush1.bf16.msra.mxu0 %v5927_v0  ;;  %v5964_v0 = vld [vmem:[#allocation17 + $0x78] sm:$0xff]  }
 0xcb7   :  { %2275 = vmatprep.subr.bf16.mxu0 %v5935_v2  ;;  %v5966_v2 = vld [vmem:[#allocation17 + $0x38] sm:$0xff]  }
 0xcb8   :  { %2233 = vmatpush1.bf16.msra.mxu1 %v5930_v3  ;;  %v5967_v3 = vld [vmem:[#allocation17 + $0xb8] sm:$0xff]  }
 0xcb9   :  { %5286 = vmatprep.subr.bf16.mxu1 %v5936_v6  ;;  %v2052_v6 = vsub.s32 3, %v6764_v54 }
 0xcba   :  { %2276 = vmatpush1.bf16.msra.mxu0 %v5933_v5  ;;  %v2036_v5 = vld [vmem:[%s7568_s16] sm:$0xf] }
 0xcbb   :  { %5308 = vmatprep.subr.bf16.mxu0 %v5937_v8  ;;  %v2041_v8 = vrot.slane %v2036_v5, %v6773_v57 }
 0xd30   :  { %v1946_v31 = vpop.xlane.xlu0 %1945 }
 0xd31   :  { %v1949_v32 = vmul.f32 0.0078125, %v1946_v31  ;;  %v5938_v31 = vld [vmem:[#allocation17] sm:$0xff]  }
 0xd32   :  { %v1948_v33 = vpop.xlane.xlu1 %1947 }
 0xd33   :  { %v1950_v34 = vmul.f32 0.0078125, %v1948_v33  ;;  %v6978_v35 = vsub.f32 %v6971_v22, %v1949_v32  ;;  %v5939_v32 = vld [vmem:[#allocation17 + $0x80] sm:$0xff]  }
 0xd35   :  { %v1953_v36 = vmul.f32 %v6978_v35, %v6978_v35  ;;  %v6983_v37 = vsub.f32 %v6974_v23, %v1950_v34  ;;  %v5940_v34 = vld [vmem:[#allocation17 + $0x48] sm:$0xff]  }
 0xd37   :  { %1955 = vadd.xlane.f32.xlu0 %v1953_v36  ;;  %v1954_v38 = vmul.f32 %v6983_v37, %v6983_v37  ;;  %v5942_v36 = vld [vmem:[#allocation17 + $0x8] sm:$0xff]  }
 0xd39   :  { %1957 = vadd.xlane.f32.xlu1 %v1954_v38  ;;  %v5944_v38 = vld [vmem:[#allocation17 + $0x50] sm:$0xff]  }
 0xdc4   :  { %v1956_v9 = vpop.xlane.xlu0 %1955 }
 0xdc5   :  { %v1959_v10 = vmul.f32 0.0078125, %v1956_v9  ;;  %v2049_v9 = vrot.slane %v2036_v5, %v6776_v58 }
 0xdc6   :  { %v1958_v11 = vpop.xlane.xlu1 %1957 }
 0xdc7   :  { %v1961_v12 = vadd.f32 1e-05, %v1959_v10  ;;  %v1960_v13 = vmul.f32 0.0078125, %v1958_v11  ;;  %v2045_v10 = vrot.slane %v2036_v5, %v6767_v55  ;;  %v2053_v11 = vrot.slane %v2036_v5, %v2052_v6 }
 0xdc9   :  { %6048 = vrsqrt.f32 %v1961_v12  ;;  %v1962_v15 = vadd.f32 1e-05, %v1960_v13 }
 0xdcb   :  { %6050 = vrsqrt.f32 %v1962_v15 }
 0xdd3   :  { %v6049_v14 = vpop.eup %6048 }
 0xdd4   :  { %v1965_v18 = vmul.f32 %v6049_v14, %v6978_v35  ;;  %v5941_v35 = vld [vmem:[#allocation17 + $0xc8] sm:$0xff]  }
 0xdd5   :  { %v6051_v19 = vpop.eup %6050 }
 0xdd6   :  { %v1966_v21 = vmul.f32 %v6051_v19, %v6983_v37  ;;  %v1993_v7 = vmul.f32 %v5080_v16, %v1965_v18  ;;  %v1973_v24 = vmul.f32 %v5078_v17, %v1965_v18  ;;  %v5943_v37 = vld [vmem:[#allocation17 + $0x88] sm:$0xff]  }
 0xdd8   :  { %v1994_v26 = vmul.f32 %v5080_v16, %v1966_v21  ;;  %v1974_v27 = vmul.f32 %v5078_v17, %v1966_v21  ;;  %v1981_v28 = vadd.f32 %v5079_v20, %v1973_v24  ;;  %v2001_v29 = vadd.f32 %v5081_v25, %v1993_v7 }
 0xdda   :  { %v2002_v49 = vadd.f32 %v5081_v25, %v1994_v26  ;;  %v1982_v53 = vadd.f32 %v5079_v20, %v1974_v27  ;;  %1983 = vst [vmem:[#allocation20] sm:$0xff] %v1981_v28 }
 0xddc   :  { %v2035_v33 = vpack.c.bf16 %v2002_v49, %v2001_v29  ;;  %1984 = vst [vmem:[#allocation20 + $0x8] sm:$0xff] %v1982_v53 }
 0xdde   :  { %2251 = vmatmul.mubr.bf16.vlgmr.msra.gmra.mrb[48].mxu1 %v2035_v33  ;;  %2294 = vmatmul.mubr.bf16.vlgmr.msra.gmra.mrb[36].mxu0 %v2035_v33 }
 0xddf   :  { %5287 = vmatpush3.bf16.msra.mxu1 %v5938_v31  ;;  %5309 = vmatpush3.bf16.msra.mxu0 %v5939_v32 }
 0xde0   :  { %5288 = vmatprep.subr.bf16.mxu1 %v5940_v34  ;;  %5310 = vmatprep.subr.bf16.mxu0 %v5941_v35 }
 0xde3   :  { %5289 = vmatpush3.bf16.msra.mxu1 %v5942_v36  ;;  %5311 = vmatpush3.bf16.msra.mxu0 %v5943_v37 }
 0xde4   :  { %5290 = vmatprep.subr.bf16.mxu1 %v5944_v38  ;;  %5312 = vmatprep.subr.bf16.mxu0 %v5945_v39 }
 0xde7   :  { %5291 = vmatpush3.bf16.msra.mxu1 %v5946_v40  ;;  %5313 = vmatpush3.bf16.msra.mxu0 %v5947_v41 }
 0xde8   :  { %5292 = vmatprep.subr.bf16.mxu1 %v5948_v42  ;;  %5314 = vmatprep.subr.bf16.mxu0 %v5949_v43 }
 0xdeb   :  { %5293 = vmatpush3.bf16.msra.mxu1 %v5950_v44  ;;  %5315 = vmatpush3.bf16.msra.mxu0 %v5951_v45 }
 0xdec   :  { %5294 = vmatprep.subr.bf16.mxu1 %v5952_v46  ;;  %5316 = vmatprep.subr.bf16.mxu0 %v5953_v47 }
 0xdef   :  { %5295 = vmatpush3.bf16.msra.mxu1 %v5954_v48  ;;  %5317 = vmatpush3.bf16.msra.mxu0 %v5955_v50 }
 0xdf0   :  { %5296 = vmatprep.subr.bf16.mxu1 %v5956_v51  ;;  %5318 = vmatprep.subr.bf16.mxu0 %v5957_v52 }
 0xdf3   :  { %5297 = vmatpush3.bf16.msra.mxu1 %v5958_v56  ;;  %5319 = vmatpush3.bf16.msra.mxu0 %v5959_v59 }
 0xdf4   :  { %5298 = vmatprep.subr.bf16.mxu1 %v5960_v60  ;;  %5320 = vmatprep.subr.bf16.mxu0 %v5961_v61 }
 0xdf7   :  { %5299 = vmatpush3.bf16.msra.mxu1 %v5962_v62  ;;  %5321 = vmatpush3.bf16.msra.mxu0 %v5963_v63  ;;  %v5968_v63 = vld [vmem:[#allocation18] ss:$12 sps:$4 sm:$0xff]  }
 0xdf8   :  { %5300 = vmatprep.subr.bf16.mxu1 %v5964_v0  ;;  %5322 = vmatprep.subr.bf16.mxu0 %v5965_v1  ;;  %v5970_v0 = vld [vmem:[#allocation18 + $0x4] ss:$12 sps:$4 sm:$0xff]   ;;  %v5971_v1 = vld [vmem:[#allocation18 + $0x8] ss:$12 sps:$4 sm:$0xff]  }
 0xdfb   :  { %5301 = vmatpush3.bf16.msra.mxu1 %v5966_v2  ;;  %5323 = vmatpush3.bf16.msra.mxu0 %v5967_v3  ;;  %v5974_v2 = vld [vmem:[#allocation18 + $0x1c] ss:$12 sps:$4 sm:$0xff]   ;;  %v5975_v3 = vld [vmem:[#allocation18 + $0x20] ss:$12 sps:$4 sm:$0xff]  }
 0xdfc   :  { %5548 = vmatprep.subr.bf16.mxu0 %v6426_v4  ;;  %2883 = vmatprep.subr.bf16.mxu1 %v5970_v0 }
 0xeb1   :  { %v2252_v12 = vpop.f32.mrb[48].mxu1  ;;  %v2295_v13 = vpop.f32.mrb[36].mxu0 }
 0xeb2   :  { %v2253_v15 = vadd.f32 %v2252_v12, %v2041_v8  ;;  %v2296_v14 = vadd.f32 %v2295_v13, %v2049_v9  ;;  %v2254_v16 = vpop.f32.mrb[49].mxu1  ;;  %v2297_v17 = vpop.f32.mrb[37].mxu0  ;;  %v5978_v13 = vld [vmem:[#allocation18 + $0x34] ss:$12 sps:$4 sm:$0xff]  }
 0xeb3   :  { %v2255_v18 = vadd.f32 %v2254_v16, %v2045_v10  ;;  %v2298_v19 = vadd.f32 %v2297_v17, %v2053_v11  ;;  %v2256_v20 = vpop.f32.mrb[50].mxu1  ;;  %v2299_v21 = vpop.f32.mrb[38].mxu0  ;;  %v5982_v16 = vld [vmem:[#allocation18 + $0x4c] ss:$12 sps:$4 sm:$0xff]   ;;  %v5980_v17 = vld [vmem:[#allocation18 + $0x48] ss:$12 sps:$4 sm:$0xff]  }
 0xeb4   :  { %v2257_v7 = vadd.f32 %v2256_v20, %v2041_v8  ;;  %v2300_v24 = vadd.f32 %v2299_v21, %v2049_v9  ;;  %v2258_v54 = vpop.f32.mrb[51].mxu1  ;;  %v2301_v25 = vpop.f32.mrb[39].mxu0  ;;  %v2304_v28 = vmax.f32 %v2253_v15, 0.0  ;;  %v2306_v29 = vmax.f32 %v2296_v14, 0.0  ;;  %v5976_v15 = vld [vmem:[#allocation18 + $0x30] ss:$12 sps:$4 sm:$0xff]  }
 0xeb5   :  { %v2259_v26 = vadd.f32 %v2258_v54, %v2045_v10  ;;  %v2302_v27 = vadd.f32 %v2301_v25, %v2053_v11  ;;  %v2305_v31 = vmax.f32 %v2255_v18, 0.0  ;;  %v2307_v32 = vmax.f32 %v2298_v19, 0.0  ;;  %v5979_v14 = vld [vmem:[#allocation18 + $0x38] ss:$12 sps:$4 sm:$0xff]   ;;  %v5983_v18 = vld [vmem:[#allocation18 + $0x50] ss:$12 sps:$4 sm:$0xff]  }
 0xeb6   :  { %v2308_v49 = vmax.f32 %v2257_v7, 0.0  ;;  %v2310_v53 = vmax.f32 %v2300_v24, 0.0  ;;  %v5986_v19 = vld [vmem:[#allocation18 + $0x64] ss:$12 sps:$4 sm:$0xff]   ;;  %v5984_v20 = vld [vmem:[#allocation18 + $0x60] ss:$12 sps:$4 sm:$0xff]  }
 0xeb7   :  { %v2309_v33 = vmax.f32 %v2259_v26, 0.0  ;;  %v2311_v34 = vmax.f32 %v2302_v27, 0.0  ;;  %v5987_v21 = vld [vmem:[#allocation18 + $0x68] ss:$12 sps:$4 sm:$0xff]   ;;  %v5988_v24 = vld [vmem:[#allocation18 + $0x78] ss:$12 sps:$4 sm:$0xff]  }
 0xeb8   :  { %v2376_v35 = vpack.c.bf16 %v2308_v49, %v2304_v28  ;;  %v2378_v36 = vpack.c.bf16 %v2310_v53, %v2306_v29  ;;  %v5990_v7 = vld [vmem:[#allocation18 + $0x7c] ss:$12 sps:$4 sm:$0xff]   ;;  %v5991_v54 = vld [vmem:[#allocation18 + $0x80] ss:$12 sps:$4 sm:$0xff]   ;;  %v5995_v27 = vld [vmem:[#allocation18 + $0x98] ss:$12 sps:$4 sm:$0xff]  }
 0xeb9   :  { %v2377_v37 = vpack.c.bf16 %v2309_v33, %v2305_v31  ;;  %v2379_v38 = vpack.c.bf16 %v2311_v34, %v2307_v32  ;;  %v5994_v25 = vld [vmem:[#allocation18 + $0x94] ss:$12 sps:$4 sm:$0xff]   ;;  %v5992_v26 = vld [vmem:[#allocation18 + $0x90] ss:$12 sps:$4 sm:$0xff]   ;;  %v5998_v28 = vld [vmem:[#allocation18 + $0xac] ss:$12 sps:$4 sm:$0xff]  }
 0xeba   :  { %v5996_v29 = vld [vmem:[#allocation18 + $0xa8] ss:$12 sps:$4 sm:$0xff]   ;;  %v5999_v49 = vld [vmem:[#allocation18 + $0xb0] ss:$12 sps:$4 sm:$0xff]  }
 0xebb   :  { %2604 = vmatprep.mubr.bf16.mxu1 %v2377_v37  ;;  %2645 = vmatprep.mubr.bf16.mxu0 %v2379_v38  ;;  %v5147_v37 = vld [vmem:[%s7571_s19] ss:$0 sm:$0xff] }
 0xebc   :  { %2605 = vmatmul.mubr.bf16.vlgmr.msra.gmra.mrb[52].mxu1 %v2376_v35  ;;  %2646 = vmatmul.mubr.bf16.vlgmr.msra.gmra.mrb[40].mxu0 %v2378_v36 }
 0xebd   :  { %2915 = vmatprep.mubr.bf16.mxu1 %v6427_v30  ;;  %5564 = vmatprep.mubr.msk.bf16.mxu0 %vm6428_vm0, %v6426_v4  ;;  %v5146_v30 = vld [vmem:[%s7570_s18] ss:$0 sm:$0xff]  ;;  %s7631_s18 = sld [smem:[#allocation44_spill]] }
 0xebe   :  { %5549 = vmatpush3.bf16.msra.mxu0 %v5971_v1  ;;  %2884 = vmatpush1.bf16.msra.mxu1 %v5968_v63 }
 0xebf   :  { %5550 = vmatprep.subr.bf16.mxu0 %v6426_v4  ;;  %2885 = vmatprep.subr.bf16.mxu1 %v5974_v2 }
 0xec2   :  { %5551 = vmatpush3.bf16.msra.mxu0 %v5975_v3 }
 0xec3   :  { %5552 = vmatprep.subr.bf16.mxu0 %v6426_v4 }
 0xec6   :  { %5553 = vmatpush3.bf16.msra.mxu0 %v5979_v14 }
 0xec7   :  { %5554 = vmatprep.subr.bf16.mxu0 %v6426_v4 }
 0xeca   :  { %5555 = vmatpush3.bf16.msra.mxu0 %v5983_v18 }
 0xecb   :  { %5556 = vmatprep.subr.bf16.mxu0 %v6426_v4 }
 0xece   :  { %5557 = vmatpush3.bf16.msra.mxu0 %v5987_v21 }
 0xecf   :  { %5558 = vmatprep.subr.bf16.mxu0 %v6426_v4 }
 0xed2   :  { %5559 = vmatpush3.bf16.msra.mxu0 %v5991_v54 }
 0xed3   :  { %5560 = vmatprep.subr.bf16.mxu0 %v6426_v4 }
 0xed6   :  { %5561 = vmatpush3.bf16.msra.mxu0 %v5995_v27 }
 0xed7   :  { %5562 = vmatprep.subr.bf16.mxu0 %v6426_v4 }
 0xeda   :  { %5563 = vmatpush3.bf16.msra.mxu0 %v5999_v49 }
 0xedb   :  { %5592 = vmatprep.subr.bf16.mxu0 %v6426_v4 }
 0xf8f   :  { %v5302_v39 = vpop.f32.mrb[52].mxu1  ;;  %v5324_v40 = vpop.f32.mrb[40].mxu0 }
 0xf90   :  { %v5303_v41 = vpop.f32.mrb[53].mxu1  ;;  %v5325_v42 = vpop.f32.mrb[41].mxu0 }
 0xf91   :  { %v5304_v43 = vadd.f32 %v5303_v41, %v5302_v39  ;;  %v5326_v44 = vadd.f32 %v5325_v42, %v5324_v40  ;;  %v5305_v45 = vpop.f32.mrb[54].mxu1  ;;  %v5327_v46 = vpop.f32.mrb[42].mxu0  ;;  %v5148_v42 = vld [vmem:[%s7572_s20] ss:$0 sm:$0xff]  ;;  %s6431_s20 = smov 112  }
 0xf92   :  { %v5306_v47 = vpop.f32.mrb[55].mxu1  ;;  %v5328_v48 = vpop.f32.mrb[43].mxu0 }
 0xf93   :  { %v2648_v50 = vadd.f32 %v5326_v44, %v5304_v43  ;;  %v5307_v51 = vadd.f32 %v5306_v47, %v5305_v45  ;;  %v5329_v52 = vadd.f32 %v5328_v48, %v5327_v46  ;;  %v2738_v47 = vld [vmem:[%s7574_s22] sm:$0x7]  ;;  %s6432_s22 = smov 80  }
 0xf94   :  { %v2747_v48 = vrot.slane %v2738_v47, %v6767_v55 }
 0xf95   :  { %v2654_v56 = vadd.f32 %v2648_v50, %v6971_v22  ;;  %v2651_v59 = vadd.f32 %v5329_v52, %v5307_v51  ;;  %v5972_v22 = vld [vmem:[#allocation18 + $0x18] ss:$12 sps:$4 sm:$0xff]   ;;  %v2743_v52 = vrot.slane %v2738_v47, %v6773_v57 }
 0xf96   :  { %2886 = vmatpush1.bf16.msra.mxu1 %v5972_v22 }
 0xf97   :  { %v2655_v60 = vadd.f32 %v2651_v59, %v6974_v23  ;;  %v7017_v61 = vadd.f32 %v5146_v30, %v2654_v56  ;;  %2887 = vmatprep.subr.bf16.mxu1 %v5978_v13 }
 0xf99   :  { %2667 = vadd.xlane.f32.xlu0 %v7017_v61  ;;  %v7020_v62 = vadd.f32 %v5146_v30, %v2655_v60  ;;  %v2751_v30 = vrot.slane %v2738_v47, %v6776_v58 }
 0xf9a   :  { %2888 = vmatpush1.bf16.msra.mxu1 %v5976_v15 }
 0xf9b   :  { %2669 = vadd.xlane.f32.xlu1 %v7020_v62  ;;  %2889 = vmatprep.subr.bf16.mxu1 %v5982_v16 }
 0xf9e   :  { %2890 = vmatpush1.bf16.msra.mxu1 %v5980_v17 }
 0xf9f   :  { %2891 = vmatprep.subr.bf16.mxu1 %v5986_v19 }
 0xfa2   :  { %2892 = vmatpush1.bf16.msra.mxu1 %v5984_v20 }
 0xfa3   :  { %2893 = vmatprep.subr.bf16.mxu1 %v5990_v7 }
 0xfa6   :  { %2894 = vmatpush1.bf16.msra.mxu1 %v5988_v24 }
 0xfa7   :  { %2895 = vmatprep.subr.bf16.mxu1 %v5994_v25 }
 0xfaa   :  { %2896 = vmatpush1.bf16.msra.mxu1 %v5992_v26 }
 0xfab   :  { %2897 = vmatprep.subr.bf16.mxu1 %v5998_v28 }
 0xfae   :  { %2898 = vmatpush1.bf16.msra.mxu1 %v5996_v29 }
 0xfaf   :  { %5568 = vmatprep.subr.bf16.mxu1 %v6426_v4 }
0x1026   :  { %v2668_v23 = vpop.xlane.xlu0 %2667 }
0x1027   :  { %v2671_v5 = vmul.f32 0.0078125, %v2668_v23 }
0x1028   :  { %v2670_v6 = vpop.xlane.xlu1 %2669 }
0x1029   :  { %v2673_v8 = vsub.f32 %v7017_v61, %v2671_v5  ;;  %v2672_v9 = vmul.f32 0.0078125, %v2670_v6 }
0x102b   :  { %v2674_v10 = vsub.f32 %v7020_v62, %v2672_v9  ;;  %v2675_v11 = vmul.f32 %v2673_v8, %v2673_v8 }
0x102d   :  { %2677 = vadd.xlane.f32.xlu0 %v2675_v11  ;;  %v2676_v12 = vmul.f32 %v2674_v10, %v2674_v10 }
0x102f   :  { %2679 = vadd.xlane.f32.xlu1 %v2676_v12 }
0x10ba   :  { %v2678_v53 = vpop.xlane.xlu0 %2677 }
0x10bb   :  { %v2681_v31 = vmul.f32 0.0078125, %v2678_v53 }
0x10bc   :  { %v2680_v32 = vpop.xlane.xlu1 %2679 }
0x10bd   :  { %v2683_v33 = vadd.f32 1e-05, %v2681_v31  ;;  %v2682_v34 = vmul.f32 0.0078125, %v2680_v32 }
0x10bf   :  { %6052 = vrsqrt.f32 %v2683_v33  ;;  %v2684_v35 = vadd.f32 1e-05, %v2682_v34 }
0x10c1   :  { %6054 = vrsqrt.f32 %v2684_v35 }
0x10c9   :  { %v6053_v36 = vpop.eup %6052 }
0x10ca   :  { %v2687_v38 = vmul.f32 %v6053_v36, %v2673_v8 }
0x10cb   :  { %v6055_v39 = vpop.eup %6054 }
0x10cc   :  { %v2688_v40 = vmul.f32 %v6055_v39, %v2674_v10  ;;  %v2695_v41 = vmul.f32 %v5147_v37, %v2687_v38 }
0x10ce   :  { %v2696_v43 = vmul.f32 %v5147_v37, %v2688_v40  ;;  %v2703_v44 = vadd.f32 %v5148_v42, %v2695_v41 }
0x10d0   :  { %v2704_v45 = vadd.f32 %v5148_v42, %v2696_v43 }
0x10d2   :  { %v2737_v46 = vpack.c.bf16 %v2704_v45, %v2703_v44 }
0x10d4   :  { %2916 = vmatmul.mubr.bf16.vlgmr.msra.gmra.mrb[56].mxu1 %v2737_v46  ;;  %5565 = vmatmul.mubr.bf16.vlgmr.msra.gmra.mrb[44].mxu0 %v2737_v46 }
0x10d5   :  { %5570 = vmatprep.mubr.msk.bf16.mxu1 %vm6428_vm0, %v6426_v4  ;;  %5594 = vmatprep.mubr.msk.bf16.mxu0 %vm6428_vm0, %v6426_v4 }
0x11a7   :  { %v2917_v50 = vpop.f32.mrb[56].mxu1  ;;  %v2960_v51 = vpop.f32.mrb[44].mxu0 }
0x11a8   :  { %v2919_v56 = vpop.f32.mrb[57].mxu1  ;;  %v5566_v59 = vpop.f32.mrb[45].mxu0  ;;  %v2961_v55 = vadd.f32 %v2960_v51, %v2751_v30  ;;  %v2918_v57 = vadd.f32 %v2917_v50, %v2743_v52 }
0x11a9   :  { %v2920_v60 = vadd.f32 %v2919_v56, %v2747_v48  ;;  %v2921_v63 = vpop.f32.mrb[58].mxu1  ;;  %v2963_v0 = vpop.f32.mrb[46].mxu0 }
0x11aa   :  { %v2922_v1 = vadd.f32 %v2921_v63, %v2743_v52  ;;  %v7050_v2 = vadd.f32 %v2963_v0, %v2751_v30  ;;  %v2923_v3 = vpop.f32.mrb[59].mxu1  ;;  %v5567_v22 = vpop.f32.mrb[47].mxu0  ;;  %v7054_v58 = vpack.c.bf16 %v2961_v55, %v2961_v55  ;;  %v2967_v8 = vpack.c.bf16 %v2918_v57, %v2918_v57 }
0x11ab   :  { %v2968_v23 = vpack.c.bf16 %v2920_v60, %v2920_v60  ;;  %v2924_v5 = vadd.f32 %v2923_v3, %v2747_v48 }
0x11ac   :  { %v3033_v9 = vsel %vm596_vm2, %v7054_v58, 0  ;;  %v7094_v21 = vpack.c.bf16 %v2922_v1, %v2922_v1 }
0x11ad   :  { %v2975_v6 = vsel %vm2970_vm7, %v2968_v23, 0  ;;  %v7069_v14 = vpack.c.bf16 %v2924_v5, %v2924_v5 }
0x11ae   :  { %5569 = vmatpush3.bf16.xpose.msra.mxu1 %v2975_v6 }
0x11af   :  { %5574 = vmatprep.subr.bf16.mxu1 %v6426_v4  ;;  %v3898_v46 = vsel %vm2970_vm7, %v7069_v14, 0 }
0x11b5   :  { %5571 = vmatmul.mubr.msk.bf16.vlgmr.msra.gmra.mrb[60].mxu1 %vm2970_vm7, %v2967_v8 }
0x11b6   :  { %5575 = vmatpush3.bf16.msra.mxu1 %v3033_v9  ;;  %5576 = vmatprep.mubr.msk.bf16.mxu1 %vm6428_vm0, %v6426_v4 }
0x11b7   :  { %5580 = vmatprep.subr.bf16.mxu1 %v6426_v4 }
0x1288   :  { %v3011_v10 = vpop.f32.mrb[60].mxu1 }
0x1289   :  { %v5572_v11 = vpop.f32.mrb[61].mxu1  ;;  %v3017_v12 = vsel %vm580_vm3, %v3011_v10, -inf }
0x128a   :  { %3018 = vmax.xlane.f32.xlu0 %v3017_v12  ;;  %v3014_v13 = vpop.f32.mrb[62].mxu1 }
0x128b   :  { %v5573_v15 = vpop.f32.mrb[63].mxu1 }
0x12a0   :  { %3080 = vrot.lane.b32.xlu0 %v2968_v23, %s6431_s20 }
0x12a4   :  { %3313 = vrot.lane.b32.xlu0 %v2968_v23, %s6432_s22 }
0x12a8   :  { %3429 = vrot.lane.b32.xlu0 %v2968_v23, %s6421_s8 }
0x12ac   :  { %3545 = vrot.lane.b32.xlu0 %v2968_v23, %s6433_s10 }
0x12b0   :  { %3661 = vrot.lane.b32.xlu0 %v2968_v23, %s6430_s27 }
0x12b4   :  { %3777 = vrot.lane.b32.xlu0 %v2968_v23, %s7630_s5 }
0x12b8   :  { %4003 = vrot.lane.b32.xlu0 %v7069_v14, %s6431_s20 }
0x12bc   :  { %4119 = vrot.lane.b32.xlu0 %v7069_v14, %s6429_s15 }
0x12c0   :  { %4234 = vrot.lane.b32.xlu0 %v7069_v14, %s6432_s22 }
0x12c4   :  { %4349 = vrot.lane.b32.xlu0 %v7069_v14, %s6421_s8 }
0x12c8   :  { %4464 = vrot.lane.b32.xlu0 %v7069_v14, %s6433_s10 }
0x12cc   :  { %4579 = vrot.lane.b32.xlu0 %v7069_v14, %s6430_s27 }
0x12d0   :  { %4694 = vrot.lane.b32.xlu0 %v7069_v14, %s7630_s5 }
0x1317   :  { %v3019_v16 = vpop.xlane.xlu0 %3018 }
0x1318   :  { %v3020_v17 = vsub.f32 %v3011_v10, %v3019_v16 }
0x131a   :  { %v3021_v18 = vmul.f32 1.442695, %v3020_v17 }
0x131b   :  { %v3081_v54 = vpop.permute.xlu0 %3080 }
0x131c   :  { %6056 = vpow2.f32 %v3021_v18  ;;  %v3086_v53 = vsel %vm2970_vm7, %v3081_v54, 0 }
0x131f   :  { %v3314_v29 = vpop.permute.xlu0 %3313 }
0x1320   :  { %v3319_v32 = vsel %vm2970_vm7, %v3314_v29, 0 }
0x1323   :  { %v3430_v33 = vpop.permute.xlu0 %3429 }
0x1324   :  { %v3435_v35 = vsel %vm2970_vm7, %v3430_v33, 0 }
0x1326   :  { %v6057_v19 = vpop.eup %6056 }
0x1327   :  { %v3023_v20 = vsel %vm580_vm3, %v6057_v19, 0.0  ;;  %v3546_v36 = vpop.permute.xlu0 %3545 }
0x1328   :  { %3024 = vadd.xlane.f32.xlu1 %v3023_v20  ;;  %v3551_v38 = vsel %vm2970_vm7, %v3546_v36, 0 }
0x132b   :  { %v3662_v39 = vpop.permute.xlu0 %3661 }
0x132c   :  { %v3667_v41 = vsel %vm2970_vm7, %v3662_v39, 0 }
0x132f   :  { %v3778_v42 = vpop.permute.xlu0 %3777 }
0x1330   :  { %v3783_v44 = vsel %vm2970_vm7, %v3778_v42, 0 }
0x1333   :  { %v4004_v47 = vpop.permute.xlu0 %4003 }
0x1334   :  { %v4009_v48 = vsel %vm2970_vm7, %v4004_v47, 0 }
0x1337   :  { %v4120_v50 = vpop.permute.xlu0 %4119 }
0x1338   :  { %v4125_v52 = vsel %vm2970_vm7, %v4120_v50, 0 }
0x1339   :  { %3077 = vrot.lane.b32.xlu1 %v2967_v8, %s6431_s20 }
0x133b   :  { %v4235_v30 = vpop.permute.xlu0 %4234 }
0x133c   :  { %v4240_v59 = vsel %vm2970_vm7, %v4235_v30, 0 }
0x133d   :  { %3197 = vrot.lane.b32.xlu1 %v2968_v23, %s6429_s15 }
0x133f   :  { %v4350_v60 = vpop.permute.xlu0 %4349 }
0x1340   :  { %v4355_v0 = vsel %vm2970_vm7, %v4350_v60, 0 }
0x1341   :  { %3195 = vrot.lane.b32.xlu1 %v2967_v8, %s6429_s15 }
0x1343   :  { %v4465_v1 = vpop.permute.xlu0 %4464 }
0x1344   :  { %v4470_v22 = vsel %vm2970_vm7, %v4465_v1, 0 }
0x1345   :  { %3311 = vrot.lane.b32.xlu1 %v2967_v8, %s6432_s22 }
0x1347   :  { %v4580_v23 = vpop.permute.xlu0 %4579 }
0x1348   :  { %v4585_v55 = vsel %vm2970_vm7, %v4580_v23, 0 }
0x1349   :  { %3427 = vrot.lane.b32.xlu1 %v2967_v8, %s6421_s8 }
0x134b   :  { %v4695_v6 = vpop.permute.xlu0 %4694 }
0x134d   :  { %3543 = vrot.lane.b32.xlu1 %v2967_v8, %s6433_s10 }
0x1351   :  { %3659 = vrot.lane.b32.xlu1 %v2967_v8, %s6430_s27 }
0x1355   :  { %3775 = vrot.lane.b32.xlu1 %v2967_v8, %s7630_s5  ;;  %v4700_v8 = vsel %vm2970_vm7, %v4695_v6, 0 }
0x1359   :  { %4000 = vrot.lane.b32.xlu1 %v7094_v21, %s6431_s20 }
0x135d   :  { %4117 = vrot.lane.b32.xlu1 %v7094_v21, %s6429_s15 }
0x1361   :  { %4232 = vrot.lane.b32.xlu1 %v7094_v21, %s6432_s22 }
0x1365   :  { %4347 = vrot.lane.b32.xlu1 %v7094_v21, %s6421_s8 }
0x1369   :  { %4462 = vrot.lane.b32.xlu1 %v7094_v21, %s6433_s10 }
0x136d   :  { %4577 = vrot.lane.b32.xlu1 %v7094_v21, %s6430_s27 }
0x1371   :  { %4692 = vrot.lane.b32.xlu1 %v7094_v21, %s7630_s5 }
0x13b5   :  { %v3025_v7 = vpop.xlane.xlu1 %3024 }
0x13b6   :  { %6058 = vrcp.f32 %v3025_v7 }
0x13b9   :  { %v3078_v24 = vpop.permute.xlu1 %3077 }
0x13bd   :  { %v3198_v25 = vpop.permute.xlu1 %3197 }
0x13be   :  { %v3203_v26 = vsel %vm2970_vm7, %v3198_v25, 0 }
0x13bf   :  { %5593 = vmatpush3.bf16.xpose.msra.mxu0 %v3203_v26 }
0x13c0   :  { %v6059_v27 = vpop.eup %6058  ;;  %5604 = vmatprep.subr.bf16.mxu0 %v6426_v4 }
0x13c1   :  { %v3027_v28 = vmul.f32 %v6059_v27, %v6057_v19  ;;  %v3196_v31 = vpop.permute.xlu1 %3195 }
0x13c3   :  { %v3028_v49 = vpack.c.bf16 %v3027_v28, %v3027_v28 }
0x13c5   :  { %5577 = vmatmul.mubr.msk.bf16.vlgmr.msra.gmra.mrb[64].mxu1 %vm580_vm3, %v3028_v49  ;;  %v3312_v34 = vpop.permute.xlu1 %3311 }
0x13c6   :  { %5581 = vmatpush3.bf16.xpose.msra.mxu1 %v3086_v53  ;;  %5595 = vmatmul.mubr.msk.bf16.vlgmr.msra.gmra.mrb[48].mxu0 %vm2970_vm7, %v3196_v31 }
0x13c7   :  { %5605 = vmatpush3.bf16.xpose.msra.mxu0 %v3319_v32  ;;  %5582 = vmatprep.mubr.msk.bf16.mxu1 %vm6428_vm0, %v6426_v4 }
0x13c8   :  { %5606 = vmatprep.mubr.msk.bf16.mxu0 %vm6428_vm0, %v6426_v4  ;;  %5616 = vmatprep.subr.bf16.mxu0 %v6426_v4 }
0x13c9   :  { %5586 = vmatprep.subr.bf16.mxu1 %v6426_v4  ;;  %v3428_v37 = vpop.permute.xlu1 %3427 }
0x13cd   :  { %5583 = vmatmul.mubr.msk.bf16.vlgmr.msra.gmra.mrb[68].mxu1 %vm2970_vm7, %v3078_v24  ;;  %v3544_v40 = vpop.permute.xlu1 %3543 }
0x13ce   :  { %5607 = vmatmul.mubr.msk.bf16.vlgmr.msra.gmra.mrb[52].mxu0 %vm2970_vm7, %v3312_v34  ;;  %5588 = vmatprep.mubr.msk.bf16.mxu1 %vm6428_vm0, %v6426_v4 }
0x13cf   :  { %5617 = vmatpush3.bf16.xpose.msra.mxu0 %v3435_v35  ;;  %5618 = vmatprep.mubr.msk.bf16.mxu0 %vm6428_vm0, %v6426_v4 }
0x13d0   :  { %5628 = vmatprep.subr.bf16.mxu0 %v6426_v4 }
0x13d1   :  { %v3660_v43 = vpop.permute.xlu1 %3659 }
0x13d5   :  { %v3776_v45 = vpop.permute.xlu1 %3775 }
0x13d6   :  { %5619 = vmatmul.mubr.msk.bf16.vlgmr.msra.gmra.mrb[56].mxu0 %vm2970_vm7, %v3428_v37 }
0x13d7   :  { %5629 = vmatpush3.bf16.xpose.msra.mxu0 %v3551_v38  ;;  %5630 = vmatprep.mubr.msk.bf16.mxu0 %vm6428_vm0, %v6426_v4 }
0x13d8   :  { %5640 = vmatprep.subr.bf16.mxu0 %v6426_v4 }
0x13d9   :  { %v4001_v51 = vpop.permute.xlu1 %4000 }
0x13dd   :  { %v4118_v56 = vpop.permute.xlu1 %4117 }
0x13de   :  { %5631 = vmatmul.mubr.msk.bf16.vlgmr.msra.gmra.mrb[60].mxu0 %vm2970_vm7, %v3544_v40 }
0x13df   :  { %5641 = vmatpush3.bf16.xpose.msra.mxu0 %v3667_v41  ;;  %5642 = vmatprep.mubr.msk.bf16.mxu0 %vm6428_vm0, %v6426_v4 }
0x13e0   :  { %5652 = vmatprep.subr.bf16.mxu0 %v6426_v4 }
0x13e1   :  { %v4233_v63 = vpop.permute.xlu1 %4232 }
0x13e5   :  { %v4348_v3 = vpop.permute.xlu1 %4347 }
0x13e6   :  { %5643 = vmatmul.mubr.msk.bf16.vlgmr.msra.gmra.mrb[64].mxu0 %vm2970_vm7, %v3660_v43 }
0x13e7   :  { %5653 = vmatpush3.bf16.xpose.msra.mxu0 %v3783_v44  ;;  %5654 = vmatprep.mubr.msk.bf16.mxu0 %vm6428_vm0, %v6426_v4 }
0x13e8   :  { %5664 = vmatprep.subr.bf16.mxu0 %v6426_v4 }
0x13e9   :  { %v4463_v5 = vpop.permute.xlu1 %4462 }
0x13ed   :  { %v4578_v57 = vpop.permute.xlu1 %4577 }
0x13ee   :  { %5655 = vmatmul.mubr.msk.bf16.vlgmr.msra.gmra.mrb[68].mxu0 %vm2970_vm7, %v3776_v45 }
0x13ef   :  { %5665 = vmatpush3.bf16.xpose.msra.mxu0 %v3898_v46  ;;  %5666 = vmatprep.mubr.msk.bf16.mxu0 %vm6428_vm0, %v6426_v4 }
0x13f0   :  { %5676 = vmatprep.subr.bf16.mxu0 %v6426_v4 }
0x13f1   :  { %v4693_v9 = vpop.permute.xlu1 %4692 }
0x13f6   :  { %5667 = vmatmul.mubr.msk.bf16.vlgmr.msra.gmra.mrb[72].mxu0 %vm2970_vm7, %v7094_v21 }
0x13f7   :  { %5677 = vmatpush3.bf16.xpose.msra.mxu0 %v4009_v48  ;;  %5678 = vmatprep.mubr.msk.bf16.mxu0 %vm6428_vm0, %v6426_v4 }
0x13f8   :  { %5688 = vmatprep.subr.bf16.mxu0 %v6426_v4 }
0x13fe   :  { %5679 = vmatmul.mubr.msk.bf16.vlgmr.msra.gmra.mrb[76].mxu0 %vm2970_vm7, %v4001_v51 }
0x13ff   :  { %5689 = vmatpush3.bf16.xpose.msra.mxu0 %v4125_v52  ;;  %5690 = vmatprep.mubr.msk.bf16.mxu0 %vm6428_vm0, %v6426_v4 }
0x1400   :  { %5700 = vmatprep.subr.bf16.mxu0 %v6426_v4 }
0x1406   :  { %5691 = vmatmul.mubr.msk.bf16.vlgmr.msra.gmra.mrb[80].mxu0 %vm2970_vm7, %v4118_v56 }
0x1407   :  { %5701 = vmatpush3.bf16.xpose.msra.mxu0 %v4240_v59  ;;  %5702 = vmatprep.mubr.msk.bf16.mxu0 %vm6428_vm0, %v6426_v4 }
0x1408   :  { %5712 = vmatprep.subr.bf16.mxu0 %v6426_v4 }
0x140e   :  { %5703 = vmatmul.mubr.msk.bf16.vlgmr.msra.gmra.mrb[84].mxu0 %vm2970_vm7, %v4233_v63 }
0x140f   :  { %5713 = vmatpush3.bf16.xpose.msra.mxu0 %v4355_v0  ;;  %5714 = vmatprep.mubr.msk.bf16.mxu0 %vm6428_vm0, %v6426_v4 }
0x1410   :  { %5724 = vmatprep.subr.bf16.mxu0 %v6426_v4 }
0x1416   :  { %5715 = vmatmul.mubr.msk.bf16.vlgmr.msra.gmra.mrb[88].mxu0 %vm2970_vm7, %v4348_v3 }
0x1417   :  { %5725 = vmatpush3.bf16.xpose.msra.mxu0 %v4470_v22  ;;  %5726 = vmatprep.mubr.msk.bf16.mxu0 %vm6428_vm0, %v6426_v4 }
0x1418   :  { %5736 = vmatprep.subr.bf16.mxu0 %v6426_v4 }
0x141e   :  { %5727 = vmatmul.mubr.msk.bf16.vlgmr.msra.gmra.mrb[92].mxu0 %vm2970_vm7, %v4463_v5 }
0x141f   :  { %5737 = vmatpush3.bf16.xpose.msra.mxu0 %v4585_v55  ;;  %5738 = vmatprep.mubr.msk.bf16.mxu0 %vm6428_vm0, %v6426_v4 }
0x1420   :  { %5748 = vmatprep.subr.bf16.mxu0 %v6426_v4 }
0x1426   :  { %5739 = vmatmul.mubr.msk.bf16.vlgmr.msra.gmra.mrb[96].mxu0 %vm2970_vm7, %v4578_v57 }
0x1427   :  { %5749 = vmatpush3.bf16.xpose.msra.mxu0 %v4700_v8  ;;  %5750 = vmatprep.mubr.msk.bf16.mxu0 %vm6428_vm0, %v6426_v4 }
0x1428   :  { %5760 = vmatprep.subr.bf16.mxu0 %v6426_v4 }
0x142e   :  { %5751 = vmatmul.mubr.msk.bf16.vlgmr.msra.gmra.mrb[100].mxu0 %vm2970_vm7, %v4693_v9 }
0x142f   :  { %5776 = vmatprep.mubr.msk.bf16.mxu0 %vm6428_vm0, %v6426_v4 }
0x1498   :  { %v3069_v10 = vpop.f32.mrb[64].mxu1 }
0x1499   :  { %3075 = vst.msk [vmem:[#allocation2] sm:$0xff] %vm2970_vm7, %v3069_v10  ;;  %v5578_v11 = vpop.f32.mrb[65].mxu1  ;;  %v7191_v12 = vpop.f32.mrb[48].mxu0 }
0x149a   :  { %v3072_v13 = vpop.f32.mrb[66].mxu1  ;;  %v5596_v15 = vpop.f32.mrb[49].mxu0  ;;  %v3245_v14 = vsel %vm580_vm3, %v7191_v12, -inf }
0x149b   :  { %3246 = vmax.xlane.f32.xlu1 %v3245_v14  ;;  %v5579_v16 = vpop.f32.mrb[67].mxu1  ;;  %v3242_v17 = vpop.f32.mrb[50].mxu0 }
0x149c   :  { %v5597_v18 = vpop.f32.mrb[51].mxu0 }
0x14a0   :  { %v7195_v19 = vpop.f32.mrb[68].mxu1 }
0x14a1   :  { %v5584_v20 = vpop.f32.mrb[69].mxu1  ;;  %v7197_v21 = vpop.f32.mrb[52].mxu0 }
0x14a2   :  { %v3125_v7 = vpop.f32.mrb[70].mxu1  ;;  %v5608_v24 = vpop.f32.mrb[53].mxu0  ;;  %v3361_v54 = vsel %vm580_vm3, %v7197_v21, -inf }
0x14a3   :  { %3362 = vmax.xlane.f32.xlu0 %v3361_v54  ;;  %v5585_v25 = vpop.f32.mrb[71].mxu1  ;;  %v3358_v26 = vpop.f32.mrb[54].mxu0 }
0x14a4   :  { %v5609_v27 = vpop.f32.mrb[55].mxu0 }
0x14a9   :  { %v7201_v28 = vpop.f32.mrb[56].mxu0 }
0x14aa   :  { %v5620_v29 = vpop.f32.mrb[57].mxu0  ;;  %v3477_v49 = vsel %vm580_vm3, %v7201_v28, -inf }
0x14ab   :  { %3478 = vmax.xlane.f32.xlu0 %v3477_v49  ;;  %v3474_v53 = vpop.f32.mrb[58].mxu0 }
0x14ac   :  { %v5621_v31 = vpop.f32.mrb[59].mxu0 }
0x14b1   :  { %v7205_v32 = vpop.f32.mrb[60].mxu0 }
0x14b2   :  { %v5632_v33 = vpop.f32.mrb[61].mxu0  ;;  %v3593_v34 = vsel %vm580_vm3, %v7205_v32, -inf }
0x14b3   :  { %3594 = vmax.xlane.f32.xlu0 %v3593_v34  ;;  %v3590_v35 = vpop.f32.mrb[62].mxu0 }
0x14b4   :  { %v5633_v36 = vpop.f32.mrb[63].mxu0 }
0x14b9   :  { %v7209_v37 = vpop.f32.mrb[64].mxu0 }
0x14ba   :  { %v5644_v38 = vpop.f32.mrb[65].mxu0  ;;  %v3709_v39 = vsel %vm580_vm3, %v7209_v37, -inf }
0x14bb   :  { %3710 = vmax.xlane.f32.xlu1 %v3709_v39  ;;  %v3706_v40 = vpop.f32.mrb[66].mxu0 }
0x14bc   :  { %v5645_v41 = vpop.f32.mrb[67].mxu0 }
0x14c1   :  { %v7213_v42 = vpop.f32.mrb[68].mxu0 }
0x14c2   :  { %v5656_v43 = vpop.f32.mrb[69].mxu0  ;;  %v3825_v44 = vsel %vm580_vm3, %v7213_v42, -inf }
0x14c3   :  { %3826 = vmax.xlane.f32.xlu0 %v3825_v44  ;;  %v3822_v45 = vpop.f32.mrb[70].mxu0 }
0x14c4   :  { %v5657_v46 = vpop.f32.mrb[71].mxu0 }
0x14c9   :  { %v7217_v47 = vpop.f32.mrb[72].mxu0 }
0x14ca   :  { %v5668_v48 = vpop.f32.mrb[73].mxu0  ;;  %v3940_v9 = vsel %vm580_vm3, %v7217_v47, -inf }
0x14cb   :  { %v3937_v50 = vpop.f32.mrb[74].mxu0 }
0x14cc   :  { %3141 = vrot.lane.b32.xlu1 %v7054_v58, %s6431_s20  ;;  %v5669_v51 = vpop.f32.mrb[75].mxu0 }
0x14d1   :  { %v7221_v52 = vpop.f32.mrb[76].mxu0 }
0x14d2   :  { %v5680_v30 = vpop.f32.mrb[77].mxu0  ;;  %v4051_v16 = vsel %vm580_vm3, %v7221_v52, -inf }
0x14d3   :  { %v4048_v56 = vpop.f32.mrb[78].mxu0 }
0x14d4   :  { %v5681_v59 = vpop.f32.mrb[79].mxu0 }
0x14d9   :  { %3257 = vrot.lane.b32.xlu0 %v7054_v58, %s6429_s15  ;;  %v7225_v60 = vpop.f32.mrb[80].mxu0 }
0x14da   :  { %v5692_v63 = vpop.f32.mrb[81].mxu0  ;;  %v4167_v15 = vsel %vm580_vm3, %v7225_v60, -inf }
0x14db   :  { %v4164_v0 = vpop.f32.mrb[82].mxu0 }
0x14dc   :  { %v5693_v1 = vpop.f32.mrb[83].mxu0 }
0x14e1   :  { %v7227_v3 = vpop.f32.mrb[84].mxu0 }
0x14e2   :  { %v5704_v22 = vpop.f32.mrb[85].mxu0  ;;  %v4282_v7 = vsel %vm580_vm3, %v7227_v3, -inf }
0x14e3   :  { %v4279_v23 = vpop.f32.mrb[86].mxu0  ;;  %v3128_v22 = vsel %vm580_vm3, %v7195_v19, -inf }
0x14e4   :  { %v5705_v5 = vpop.f32.mrb[87].mxu0 }
0x14e9   :  { %v7229_v55 = vpop.f32.mrb[88].mxu0 }
0x14ea   :  { %v5716_v6 = vpop.f32.mrb[89].mxu0  ;;  %v4397_v54 = vsel %vm580_vm3, %v7229_v55, -inf }
0x14eb   :  { %v4394_v57 = vpop.f32.mrb[90].mxu0 }
0x14ec   :  { %v5717_v8 = vpop.f32.mrb[91].mxu0 }
0x14f0   :  { %3941 = vmax.xlane.f32.xlu1 %v3940_v9 }
0x14f1   :  { %v7233_v10 = vpop.f32.mrb[92].mxu0 }
0x14f2   :  { %v5728_v11 = vpop.f32.mrb[93].mxu0  ;;  %v4512_v29 = vsel %vm580_vm3, %v7233_v10, -inf }
0x14f3   :  { %v4509_v13 = vpop.f32.mrb[94].mxu0 }
0x14f4   :  { %4168 = vmax.xlane.f32.xlu1 %v4167_v15  ;;  %v5729_v14 = vpop.f32.mrb[95].mxu0 }
0x14f8   :  { %4052 = vmax.xlane.f32.xlu0 %v4051_v16 }
0x14f9   :  { %v7239_v17 = vpop.f32.mrb[96].mxu0 }
0x14fa   :  { %v5740_v18 = vpop.f32.mrb[97].mxu0  ;;  %v4627_v53 = vsel %vm580_vm3, %v7239_v17, -inf }
0x14fb   :  { %v4624_v20 = vpop.f32.mrb[98].mxu0 }
0x14fc   :  { %4283 = vmax.xlane.f32.xlu0 %v4282_v7  ;;  %v5741_v24 = vpop.f32.mrb[99].mxu0 }
0x1500   :  { %4398 = vmax.xlane.f32.xlu0 %v4397_v54 }
0x1501   :  { %v7245_v25 = vpop.f32.mrb[100].mxu0 }
0x1502   :  { %v5752_v26 = vpop.f32.mrb[101].mxu0  ;;  %v4742_v31 = vsel %vm580_vm3, %v7245_v25, -inf }
0x1503   :  { %v4739_v27 = vpop.f32.mrb[102].mxu0 }
0x1504   :  { %4513 = vmax.xlane.f32.xlu0 %v4512_v29  ;;  %v5753_v49 = vpop.f32.mrb[103].mxu0 }
0x1508   :  { %4628 = vmax.xlane.f32.xlu0 %v4627_v53 }
0x150c   :  { %4743 = vmax.xlane.f32.xlu0 %v4742_v31 }
0x1528   :  { %v3247_v33 = vpop.xlane.xlu1 %3246 }
0x1529   :  { %v3248_v34 = vsub.f32 %v7191_v12, %v3247_v33 }
0x152b   :  { %v3249_v35 = vmul.f32 1.442695, %v3248_v34 }
0x152d   :  { %6060 = vpow2.f32 %v3249_v35 }
0x1530   :  { %v3363_v36 = vpop.xlane.xlu0 %3362 }
0x1531   :  { %v3364_v38 = vsub.f32 %v7197_v21, %v3363_v36 }
0x1533   :  { %v3365_v39 = vmul.f32 1.442695, %v3364_v38 }
0x1535   :  { %6062 = vpow2.f32 %v3365_v39 }
0x1537   :  { %v7255_v40 = vpop.eup %6060 }
0x1538   :  { %v3479_v41 = vpop.xlane.xlu0 %3478  ;;  %v3251_v43 = vsel %vm580_vm3, %v7255_v40, 0.0 }
0x1539   :  { %v3480_v44 = vsub.f32 %v7201_v28, %v3479_v41  ;;  %3252 = vadd.xlane.f32.xlu1 %v3251_v43 }
0x153b   :  { %v3481_v45 = vmul.f32 1.442695, %v3480_v44 }
0x153d   :  { %6064 = vpow2.f32 %v3481_v45 }
0x153f   :  { %v7260_v46 = vpop.eup %6062 }
0x1540   :  { %v3595_v12 = vpop.xlane.xlu0 %3594  ;;  %v3367_v48 = vsel %vm580_vm3, %v7260_v46, 0.0 }
0x1541   :  { %v3596_v21 = vsub.f32 %v7205_v32, %v3595_v12  ;;  %3368 = vadd.xlane.f32.xlu1 %v3367_v48 }
0x1543   :  { %v3597_v50 = vmul.f32 1.442695, %v3596_v21 }
0x1545   :  { %6066 = vpow2.f32 %v3597_v50 }
0x1547   :  { %v7265_v51 = vpop.eup %6064 }
0x1548   :  { %v3711_v30 = vpop.xlane.xlu1 %3710  ;;  %v3483_v28 = vsel %vm580_vm3, %v7265_v51, 0.0 }
0x1549   :  { %v3712_v56 = vsub.f32 %v7209_v37, %v3711_v30  ;;  %3484 = vadd.xlane.f32.xlu1 %v3483_v28 }
0x154b   :  { %v3713_v59 = vmul.f32 1.442695, %v3712_v56 }
0x154c   :  { %v3142_v63 = vpop.permute.xlu1 %3141 }
0x154d   :  { %6068 = vpow2.f32 %v3713_v59  ;;  %v3147_v0 = vsel %vm596_vm2, %v3142_v63, 0 }
0x154e   :  { %5587 = vmatpush3.bf16.msra.mxu1 %v3147_v0 }
0x154f   :  { %v7271_v1 = vpop.eup %6066  ;;  %5598 = vmatprep.subr.bf16.mxu1 %v6426_v4 }
0x1550   :  { %v3599_v32 = vsel %vm580_vm3, %v7271_v1, 0.0  ;;  %v3827_v5 = vpop.xlane.xlu0 %3826 }
0x1551   :  { %3600 = vadd.xlane.f32.xlu0 %v3599_v32  ;;  %v3828_v6 = vsub.f32 %v7213_v42, %v3827_v5 }
0x1553   :  { %v3829_v57 = vmul.f32 1.442695, %v3828_v6 }
0x1554   :  { %v7288_v13 = vpop.permute.xlu0 %3257 }
0x1555   :  { %3129 = vmax.xlane.f32.xlu0 %v3128_v22  ;;  %6070 = vpow2.f32 %v3829_v57 }
0x1557   :  { %v7278_v37 = vpop.eup %6068 }
0x1558   :  { %v3715_v23 = vsel %vm580_vm3, %v7278_v37, 0.0 }
0x1559   :  { %3716 = vadd.xlane.f32.xlu1 %v3715_v23 }
0x155f   :  { %v7290_v14 = vpop.eup %6070 }
0x1560   :  { %v3831_v7 = vsel %vm580_vm3, %v7290_v14, 0.0 }
0x156a   :  { %3489 = vrot.lane.b32.xlu1 %v7054_v58, %s6421_s8 }
0x156b   :  { %3373 = vrot.lane.b32.xlu0 %v7054_v58, %s6432_s22 }
0x157d   :  { %v3942_v8 = vpop.xlane.xlu1 %3941 }
0x157e   :  { %v3943_v9 = vsub.f32 %v7217_v47, %v3942_v8 }
0x1580   :  { %v3944_v11 = vmul.f32 1.442695, %v3943_v9 }
0x1582   :  { %6072 = vpow2.f32 %v3944_v11 }
0x1585   :  { %v4053_v15 = vpop.xlane.xlu0 %4052 }
0x1586   :  { %v4054_v16 = vsub.f32 %v7221_v52, %v4053_v15 }
0x1588   :  { %v4055_v18 = vmul.f32 1.442695, %v4054_v16 }
0x1589   :  { %v4284_v20 = vpop.xlane.xlu0 %4283 }
0x158a   :  { %6074 = vpow2.f32 %v4055_v18  ;;  %v4285_v42 = vsub.f32 %v7227_v3, %v4284_v20  ;;  %3832 = vadd.xlane.f32.xlu0 %v3831_v7  ;;  %v4169_v3 = vpop.xlane.xlu1 %4168  ;;  %v3263_v18 = vsel %vm596_vm2, %v7288_v13, 0 }
0x158b   :  { %v4170_v53 = vsub.f32 %v7225_v60, %v4169_v3 }
0x158c   :  { %v7296_v24 = vpop.eup %6072 }
0x158d   :  { %v4399_v47 = vpop.xlane.xlu0 %4398  ;;  %v3946_v54 = vsel %vm580_vm3, %v7296_v24, 0.0  ;;  %v4171_v31 = vmul.f32 1.442695, %v4170_v53 }
0x158e   :  { %3947 = vadd.xlane.f32.xlu0 %v3946_v54  ;;  %v4400_v33 = vsub.f32 %v7229_v55, %v4399_v47  ;;  %v7323_v55 = vpack.c.bf16 %v7050_v2, %v7050_v2 }
0x158f   :  { %6076 = vpow2.f32 %v4171_v31 }
0x1590   :  { %v4401_v34 = vmul.f32 1.442695, %v4400_v33 }
0x1591   :  { %v4514_v26 = vpop.xlane.xlu0 %4513 }
0x1592   :  { %6078 = vpow2.f32 %v4401_v34  ;;  %v4515_v45 = vsub.f32 %v7233_v10, %v4514_v26 }
0x1594   :  { %v7300_v27 = vpop.eup %6074  ;;  %v4516_v12 = vmul.f32 1.442695, %v4515_v45 }
0x1595   :  { %v4629_v52 = vpop.xlane.xlu0 %4628  ;;  %v4057_v29 = vsel %vm580_vm3, %v7300_v27, 0.0 }
0x1596   :  { %v4630_v49 = vsub.f32 %v7239_v17, %v4629_v52  ;;  %4058 = vadd.xlane.f32.xlu1 %v4057_v29 }
0x1598   :  { %v4631_v63 = vmul.f32 1.442695, %v4630_v49 }
0x1599   :  { %v7311_v35 = vpop.eup %6076  ;;  %v4744_v39 = vpop.xlane.xlu0 %4743 }
0x159a   :  { %v4173_v17 = vsel %vm580_vm3, %v7311_v35, 0.0  ;;  %v4745_v10 = vsub.f32 %v7245_v25, %v4744_v39 }
0x159c   :  { %v7315_v36 = vpop.eup %6078  ;;  %v4746_v30 = vmul.f32 1.442695, %v4745_v10 }
0x159d   :  { %v4403_v38 = vsel %vm580_vm3, %v7315_v36, 0.0 }
0x15a4   :  { %3605 = vrot.lane.b32.xlu0 %v7054_v58, %s6433_s10 }
0x15a8   :  { %3721 = vrot.lane.b32.xlu0 %v7054_v58, %s6430_s27 }
0x15c6   :  { %v3253_v32 = vpop.xlane.xlu1 %3252 }
0x15c7   :  { %4174 = vadd.xlane.f32.xlu0 %v4173_v17 }
0x15cb   :  { %4404 = vadd.xlane.f32.xlu0 %v4403_v38 }
0x15ce   :  { %v3369_v22 = vpop.xlane.xlu1 %3368 }
0x15d6   :  { %v3485_v23 = vpop.xlane.xlu1 %3484 }
0x15de   :  { %v7319_v60 = vpop.xlane.xlu0 %3600 }
0x15e1   :  { %4064 = vrot.lane.b32.xlu0 %v7323_v55, %s6431_s20 }
0x15e2   :  { %v3130_v41 = vpop.xlane.xlu0 %3129 }
0x15e3   :  { %v3131_v43 = vsub.f32 %v7195_v19, %v3130_v41  ;;  %v4286_v19 = vmul.f32 1.442695, %v4285_v42 }
0x15e5   :  { %v3132_v44 = vmul.f32 1.442695, %v3131_v43 }
0x15e6   :  { %v3717_v5 = vpop.xlane.xlu1 %3716  ;;  %v3374_v7 = vpop.permute.xlu0 %3373 }
0x15e7   :  { %6080 = vpow2.f32 %v3132_v44  ;;  %v3379_v54 = vsel %vm596_vm2, %v3374_v7, 0 }
0x15e8   :  { %6082 = vpow2.f32 %v4516_v12 }
0x15e9   :  { %6084 = vpow2.f32 %v4286_v19 }
0x15ea   :  { %6086 = vpow2.f32 %v4746_v30  ;;  %v3490_v6 = vpop.permute.xlu1 %3489 }
0x15eb   :  { %6088 = vpow2.f32 %v4631_v63  ;;  %v3495_v49 = vsel %vm596_vm2, %v3490_v6, 0 }
0x15f1   :  { %v6081_v48 = vpop.eup %6080 }
0x15f2   :  { %v3134_v21 = vsel %vm580_vm3, %v6081_v48, 0.0  ;;  %v7330_v50 = vpop.eup %6082 }
0x15f3   :  { %3135 = vadd.xlane.f32.xlu1 %v3134_v21  ;;  %v4518_v2 = vsel %vm580_vm3, %v7330_v50, 0.0  ;;  %v7339_v28 = vpop.eup %6084 }
0x15f4   :  { %v4288_v56 = vsel %vm580_vm3, %v7339_v28, 0.0  ;;  %v7343_v59 = vpop.eup %6086 }
0x15f5   :  { %v7351_v25 = vpop.eup %6088 }
0x15f6   :  { %v4633_v0 = vsel %vm580_vm3, %v7351_v25, 0.0 }
0x1600   :  { %4519 = vadd.xlane.f32.xlu0 %v4518_v2  ;;  %v3956_v2 = vsel %vm596_vm2, %v7323_v55, 0 }
0x1604   :  { %3837 = vrot.lane.b32.xlu1 %v7054_v58, %s7630_s5  ;;  %v4748_v58 = vsel %vm580_vm3, %v7343_v59, 0.0 }
0x1616   :  { %4294 = vrot.lane.b32.xlu0 %v7323_v55, %s6432_s22 }
0x1617   :  { %v3833_v26 = vpop.xlane.xlu0 %3832 }
0x161b   :  { %v3948_v29 = vpop.xlane.xlu0 %3947 }
0x1623   :  { %v7361_v57 = vpop.xlane.xlu1 %4058 }
0x1628   :  { %4289 = vadd.xlane.f32.xlu1 %v4288_v56 }
0x1635   :  { %4749 = vadd.xlane.f32.xlu0 %v4748_v58 }
0x1639   :  { %4179 = vrot.lane.b32.xlu1 %v7323_v55, %s6429_s15 }
0x164b   :  { %4754 = vrot.lane.b32.xlu0 %v7323_v55, %s7630_s5 }
0x165d   :  { %4634 = vadd.xlane.f32.xlu1 %v4633_v0 }
0x166e   :  { %4409 = vrot.lane.b32.xlu1 %v7323_v55, %s6421_s8 }
0x1672   :  { %4524 = vrot.lane.b32.xlu1 %v7323_v55, %s6433_s10 }
0x1676   :  { %4639 = vrot.lane.b32.xlu1 %v7323_v55, %s6430_s27 }
0x1680   :  { %v3136_v8 = vpop.xlane.xlu1 %3135 }
0x1681   :  { %6090 = vrcp.f32 %v3136_v8 }
0x1682   :  { %6092 = vrcp.f32 %v3253_v32 }
0x1683   :  { %6094 = vrcp.f32 %v3369_v22 }
0x1684   :  { %6096 = vrcp.f32 %v3485_v23 }
0x1685   :  { %6098 = vrcp.f32 %v7319_v60 }
0x1686   :  { %6100 = vrcp.f32 %v3717_v5 }
0x1687   :  { %6102 = vrcp.f32 %v3833_v26 }
0x1688   :  { %6104 = vrcp.f32 %v3948_v29 }
0x1689   :  { %6106 = vrcp.f32 %v7361_v57 }
0x168b   :  { %v6091_v9 = vpop.eup %6090 }
0x168c   :  { %v3138_v11 = vmul.f32 %v6091_v9, %v6081_v48  ;;  %v6093_v16 = vpop.eup %6092 }
0x168d   :  { %v3255_v20 = vmul.f32 %v6093_v16, %v7255_v40  ;;  %v6095_v47 = vpop.eup %6094 }
0x168e   :  { %v3139_v15 = vpack.c.bf16 %v3138_v11, %v3138_v11  ;;  %v3371_v13 = vmul.f32 %v6095_v47, %v7260_v46  ;;  %v6097_v52 = vpop.eup %6096  ;;  %v3606_v46 = vpop.permute.xlu0 %3605 }
0x168f   :  { %v3256_v42 = vpack.c.bf16 %v3255_v20, %v3255_v20  ;;  %v3487_v3 = vmul.f32 %v6097_v52, %v7265_v51  ;;  %v6099_v31 = vpop.eup %6098  ;;  %v3611_v33 = vsel %vm596_vm2, %v3606_v46, 0 }
0x1690   :  { %5589 = vmatmul.mubr.msk.bf16.vlgmr.msra.gmra.mrb[72].mxu1 %vm580_vm3, %v3139_v15  ;;  %v3372_v40 = vpack.c.bf16 %v3371_v13, %v3371_v13  ;;  %v3603_v34 = vmul.f32 %v6099_v31, %v7271_v1  ;;  %v6101_v38 = vpop.eup %6100  ;;  %v3838_v1 = vpop.permute.xlu1 %3837 }
0x1691   :  { %5599 = vmatpush3.bf16.msra.mxu1 %v3263_v18  ;;  %5600 = vmatprep.mubr.msk.bf16.mxu1 %vm6428_vm0, %v6426_v4  ;;  %v3488_v53 = vpack.c.bf16 %v3487_v3, %v3487_v3  ;;  %v3719_v60 = vmul.f32 %v6101_v38, %v7278_v37  ;;  %v6103_v43 = vpop.eup %6102  ;;  %v3843_v44 = vsel %vm596_vm2, %v3838_v1, 0 }
0x1692   :  { %5610 = vmatprep.subr.bf16.mxu1 %v6426_v4  ;;  %v3722_v51 = vpop.permute.xlu0 %3721  ;;  %v3604_v17 = vpack.c.bf16 %v3603_v34, %v3603_v34  ;;  %v3835_v12 = vmul.f32 %v6103_v43, %v7290_v14  ;;  %v6105_v48 = vpop.eup %6104 }
0x1693   :  { %v3727_v39 = vsel %vm596_vm2, %v3722_v51, 0  ;;  %v3720_v41 = vpack.c.bf16 %v3719_v60, %v3719_v60  ;;  %v3950_v19 = vmul.f32 %v6105_v48, %v7296_v24  ;;  %v6107_v30 = vpop.eup %6106 }
0x1694   :  { %v3836_v37 = vpack.c.bf16 %v3835_v12, %v3835_v12  ;;  %v4061_v55 = vmul.f32 %v6107_v30, %v7300_v27 }
0x1695   :  { %v3951_v10 = vpack.c.bf16 %v3950_v19, %v3950_v19 }
0x1696   :  { %v4175_v45 = vpop.xlane.xlu0 %4174  ;;  %v4062_v63 = vpack.c.bf16 %v4061_v55, %v4061_v55 }
0x1697   :  { %6108 = vrcp.f32 %v4175_v45 }
0x1698   :  { %5601 = vmatmul.mubr.msk.bf16.vlgmr.msra.gmra.mrb[76].mxu1 %vm580_vm3, %v3256_v42 }
0x1699   :  { %5611 = vmatpush3.bf16.msra.mxu1 %v3379_v54  ;;  %5612 = vmatprep.mubr.msk.bf16.mxu1 %vm6428_vm0, %v6426_v4 }
0x169a   :  { %5622 = vmatprep.subr.bf16.mxu1 %v6426_v4  ;;  %v4405_v21 = vpop.xlane.xlu0 %4404 }
0x169e   :  { %v4065_v14 = vpop.permute.xlu0 %4064 }
0x169f   :  { %v4070_v58 = vsel %vm596_vm2, %v4065_v14, 0 }
0x16a0   :  { %5613 = vmatmul.mubr.msk.bf16.vlgmr.msra.gmra.mrb[80].mxu1 %vm580_vm3, %v3372_v40 }
0x16a1   :  { %5623 = vmatpush3.bf16.msra.mxu1 %v3495_v49  ;;  %5624 = vmatprep.mubr.msk.bf16.mxu1 %vm6428_vm0, %v6426_v4  ;;  %v6109_v0 = vpop.eup %6108 }
0x16a2   :  { %5634 = vmatprep.subr.bf16.mxu1 %v6426_v4  ;;  %v4520_v32 = vpop.xlane.xlu0 %4519  ;;  %v4177_v23 = vmul.f32 %v6109_v0, %v7311_v35 }
0x16a4   :  { %v4178_v5 = vpack.c.bf16 %v4177_v23, %v4177_v23 }
0x16a6   :  { %v4295_v27 = vpop.permute.xlu0 %4294 }
0x16a7   :  { %v4300_v57 = vsel %vm596_vm2, %v4295_v27, 0 }
0x16a8   :  { %5625 = vmatmul.mubr.msk.bf16.vlgmr.msra.gmra.mrb[84].mxu1 %vm580_vm3, %v3488_v53 }
0x16a9   :  { %5635 = vmatpush3.bf16.msra.mxu1 %v3611_v33  ;;  %5636 = vmatprep.mubr.msk.bf16.mxu1 %vm6428_vm0, %v6426_v4 }
0x16aa   :  { %5646 = vmatprep.subr.bf16.mxu1 %v6426_v4 }
0x16b0   :  { %5637 = vmatmul.mubr.msk.bf16.vlgmr.msra.gmra.mrb[88].mxu1 %vm580_vm3, %v3604_v17 }
0x16b1   :  { %5647 = vmatpush3.bf16.msra.mxu1 %v3727_v39  ;;  %5648 = vmatprep.mubr.msk.bf16.mxu1 %vm6428_vm0, %v6426_v4 }
0x16b2   :  { %5658 = vmatprep.subr.bf16.mxu1 %v6426_v4 }
0x16b5   :  { %v4290_v56 = vpop.xlane.xlu1 %4289 }
0x16b6   :  { %6110 = vrcp.f32 %v4290_v56 }
0x16b7   :  { %6112 = vrcp.f32 %v4405_v21 }
0x16b8   :  { %5649 = vmatmul.mubr.msk.bf16.vlgmr.msra.gmra.mrb[92].mxu1 %vm580_vm3, %v3720_v41  ;;  %6114 = vrcp.f32 %v4520_v32 }
0x16b9   :  { %5659 = vmatpush3.bf16.msra.mxu1 %v3843_v44  ;;  %5660 = vmatprep.mubr.msk.bf16.mxu1 %vm6428_vm0, %v6426_v4  ;;  %v4180_v24 = vpop.permute.xlu1 %4179 }
0x16ba   :  { %5670 = vmatprep.subr.bf16.mxu1 %v6426_v4  ;;  %v4185_v22 = vsel %vm596_vm2, %v4180_v24, 0 }
0x16c0   :  { %5661 = vmatmul.mubr.msk.bf16.vlgmr.msra.gmra.mrb[96].mxu1 %vm580_vm3, %v3836_v37  ;;  %v6111_v6 = vpop.eup %6110 }
0x16c1   :  { %5671 = vmatpush3.bf16.msra.mxu1 %v3956_v2  ;;  %5672 = vmatprep.mubr.msk.bf16.mxu1 %vm6428_vm0, %v6426_v4  ;;  %v4292_v8 = vmul.f32 %v6111_v6, %v7339_v28  ;;  %v6113_v35 = vpop.eup %6112 }
0x16c2   :  { %5682 = vmatprep.subr.bf16.mxu1 %v6426_v4  ;;  %v4407_v15 = vmul.f32 %v6113_v35, %v7315_v36  ;;  %v6115_v20 = vpop.eup %6114  ;;  %v4750_v47 = vpop.xlane.xlu0 %4749 }
0x16c3   :  { %v4293_v9 = vpack.c.bf16 %v4292_v8, %v4292_v8  ;;  %v4522_v36 = vmul.f32 %v6115_v20, %v7330_v50  ;;  %v6001_v20 = vld [vmem:[%s7575_s23 + $0x8] sm:$0xff]  }
0x16c4   :  { %v4408_v28 = vpack.c.bf16 %v4407_v15, %v4407_v15 }
0x16c5   :  { %v4523_v26 = vpack.c.bf16 %v4522_v36, %v4522_v36 }
0x16c6   :  { %v4755_v50 = vpop.permute.xlu0 %4754 }
0x16c7   :  { %v4760_v3 = vsel %vm596_vm2, %v4755_v50, 0 }
0x16c8   :  { %5673 = vmatmul.mubr.msk.bf16.vlgmr.msra.gmra.mrb[100].mxu1 %vm580_vm3, %v3951_v10 }
0x16c9   :  { %5683 = vmatpush3.bf16.msra.mxu1 %v4070_v58  ;;  %5684 = vmatprep.mubr.msk.bf16.mxu1 %vm6428_vm0, %v6426_v4 }
0x16ca   :  { %5694 = vmatprep.subr.bf16.mxu1 %v6426_v4 }
0x16d0   :  { %5685 = vmatmul.mubr.msk.bf16.vlgmr.msra.gmra.mrb[104].mxu1 %vm580_vm3, %v4062_v63 }
0x16d1   :  { %5695 = vmatpush3.bf16.msra.mxu1 %v4185_v22  ;;  %5696 = vmatprep.mubr.msk.bf16.mxu1 %vm6428_vm0, %v6426_v4 }
0x16d2   :  { %5706 = vmatprep.subr.bf16.mxu1 %v6426_v4 }
0x16d8   :  { %5697 = vmatmul.mubr.msk.bf16.vlgmr.msra.gmra.mrb[108].mxu1 %vm580_vm3, %v4178_v5 }
0x16d9   :  { %5707 = vmatpush3.bf16.msra.mxu1 %v4300_v57  ;;  %5708 = vmatprep.mubr.msk.bf16.mxu1 %vm6428_vm0, %v6426_v4 }
0x16da   :  { %5718 = vmatprep.subr.bf16.mxu1 %v6426_v4 }
0x16e0   :  { %5709 = vmatmul.mubr.msk.bf16.vlgmr.msra.gmra.mrb[112].mxu1 %vm580_vm3, %v4293_v9 }
0x16e1   :  { %5720 = vmatprep.mubr.msk.bf16.mxu1 %vm6428_vm0, %v6426_v4 }
0x16ea   :  { %v4635_v11 = vpop.xlane.xlu1 %4634 }
0x16eb   :  { %6116 = vrcp.f32 %v4635_v11 }
0x16ec   :  { %6118 = vrcp.f32 %v4750_v47 }
0x16ee   :  { %v4410_v16 = vpop.permute.xlu1 %4409 }
0x16ef   :  { %v4415_v18 = vsel %vm596_vm2, %v4410_v16, 0 }
0x16f0   :  { %5719 = vmatpush3.bf16.msra.mxu1 %v4415_v18 }
0x16f1   :  { %5730 = vmatprep.subr.bf16.mxu1 %v6426_v4 }
0x16f2   :  { %v4525_v7 = vpop.permute.xlu1 %4524 }
0x16f3   :  { %v4530_v42 = vsel %vm596_vm2, %v4525_v7, 0  ;;  %5721 = vmatmul.mubr.msk.bf16.vlgmr.msra.gmra.mrb[116].mxu1 %vm580_vm3, %v4408_v28  ;;  %v6000_v28 = vld [vmem:[%s7575_s23] sm:$0xff]   ;;  %v6002_v7 = vld [vmem:[%s7575_s23 + $0x10] sm:$0xff]  }
0x16f4   :  { %5731 = vmatpush3.bf16.msra.mxu1 %v4530_v42  ;;  %5732 = vmatprep.mubr.msk.bf16.mxu1 %vm6428_vm0, %v6426_v4  ;;  %v6003_v42 = vld [vmem:[%s7575_s23 + $0x18] sm:$0xff]  }
0x16f5   :  { %5742 = vmatprep.subr.bf16.mxu1 %v6426_v4  ;;  %v6117_v13 = vpop.eup %6116  ;;  %5761 = vmatpush3.bf16.msra.mxu0 %v6000_v28 }
0x16f6   :  { %v4640_v54 = vpop.permute.xlu1 %4639  ;;  %v4637_v52 = vmul.f32 %v6117_v13, %v7351_v25  ;;  %v6119_v49 = vpop.eup %6118  ;;  %5762 = vmatprep.subr.bf16.mxu0 %v6426_v4  ;;  %v6004_v13 = vld [vmem:[%s7575_s23 + $0x20] sm:$0xff]  }
0x16f7   :  { %v4645_v40 = vsel %vm596_vm2, %v4640_v54, 0  ;;  %v4752_v46 = vmul.f32 %v6119_v49, %v7343_v59 }
0x16f8   :  { %v4638_v29 = vpack.c.bf16 %v4637_v52, %v4637_v52 }
0x16f9   :  { %v4753_v53 = vpack.c.bf16 %v4752_v46, %v4752_v46  ;;  %5763 = vmatpush3.bf16.msra.mxu0 %v6001_v20  ;;  %v6007_v46 = vld [vmem:[%s7575_s23 + $0x38] sm:$0xff]  }
0x16fa   :  { %5764 = vmatprep.subr.bf16.mxu0 %v6426_v4 }
0x16fb   :  { %5733 = vmatmul.mubr.msk.bf16.vlgmr.msra.gmra.mrb[120].mxu1 %vm580_vm3, %v4523_v26 }
0x16fc   :  { %5743 = vmatpush3.bf16.msra.mxu1 %v4645_v40  ;;  %5744 = vmatprep.mubr.msk.bf16.mxu1 %vm6428_vm0, %v6426_v4  ;;  %v6005_v40 = vld [vmem:[%s7575_s23 + $0x28] sm:$0xff]  }
0x16fd   :  { %5754 = vmatprep.subr.bf16.mxu1 %v6426_v4  ;;  %5765 = vmatpush3.bf16.msra.mxu0 %v6002_v7 }
0x16fe   :  { %5766 = vmatprep.subr.bf16.mxu0 %v6426_v4 }
0x1701   :  { %5767 = vmatpush3.bf16.msra.mxu0 %v6003_v42 }
0x1702   :  { %5768 = vmatprep.subr.bf16.mxu0 %v6426_v4 }
0x1703   :  { %5745 = vmatmul.mubr.msk.bf16.vlgmr.msra.gmra.mrb[124].mxu1 %vm580_vm3, %v4638_v29 }
0x1704   :  { %5755 = vmatpush3.bf16.msra.mxu1 %v4760_v3  ;;  %5756 = vmatprep.mubr.msk.bf16.mxu1 %vm6428_vm0, %v6426_v4  ;;  %v6006_v3 = vld [vmem:[%s7575_s23 + $0x30] sm:$0xff]  }
0x1705   :  { %5769 = vmatpush3.bf16.msra.mxu0 %v6004_v13 }
0x1706   :  { %5770 = vmatprep.subr.bf16.mxu0 %v6426_v4 }
0x1709   :  { %5771 = vmatpush3.bf16.msra.mxu0 %v6005_v40 }
0x170a   :  { %5772 = vmatprep.subr.bf16.mxu0 %v6426_v4 }
0x170b   :  { %5757 = vmatmul.mubr.msk.bf16.vlgmr.msra.gmra.mrb[128].mxu1 %vm580_vm3, %v4753_v53 }
0x170d   :  { %5773 = vmatpush3.bf16.msra.mxu0 %v6006_v3 }
0x170e   :  { %5774 = vmatprep.subr.bf16.mxu0 %v6426_v4 }
0x1711   :  { %5775 = vmatpush3.bf16.msra.mxu0 %v6007_v46 }
0x1763   :  { %v3183_v31 = vpop.f32.mrb[72].mxu1 }
0x1764   :  { %3190 = vrot.lane.b32.xlu1 %v3183_v31, %s7630_s5  ;;  %v5590_v25 = vpop.f32.mrb[73].mxu1 }
0x1765   :  { %v3186_v33 = vpop.f32.mrb[74].mxu1 }
0x1766   :  { %v5591_v34 = vpop.f32.mrb[75].mxu1 }
0x176b   :  { %v3299_v51 = vpop.f32.mrb[76].mxu1 }
0x176c   :  { %3306 = vrot.lane.b32.xlu1 %v3299_v51, %s6430_s27  ;;  %v5602_v17 = vpop.f32.mrb[77].mxu1 }
0x176d   :  { %v3302_v38 = vpop.f32.mrb[78].mxu1 }
0x176e   :  { %v5603_v39 = vpop.f32.mrb[79].mxu1 }
0x1773   :  { %v3415_v60 = vpop.f32.mrb[80].mxu1 }
0x1774   :  { %3422 = vrot.lane.b32.xlu1 %v3415_v60, %s6433_s10  ;;  %v5614_v1 = vpop.f32.mrb[81].mxu1 }
0x1775   :  { %v3418_v59 = vpop.f32.mrb[82].mxu1 }
0x1776   :  { %v5615_v41 = vpop.f32.mrb[83].mxu1 }
0x177b   :  { %v3531_v43 = vpop.f32.mrb[84].mxu1 }
0x177c   :  { %3538 = vrot.lane.b32.xlu0 %v3531_v43, %s6421_s8  ;;  %v5626_v44 = vpop.f32.mrb[85].mxu1 }
0x177d   :  { %v3534_v45 = vpop.f32.mrb[86].mxu1 }
0x177e   :  { %v5627_v12 = vpop.f32.mrb[87].mxu1 }
0x1783   :  { %v3647_v37 = vpop.f32.mrb[88].mxu1 }
0x1784   :  { %3654 = vrot.lane.b32.xlu0 %v3647_v37, %s6432_s22  ;;  %v5638_v48 = vpop.f32.mrb[89].mxu1 }
0x1785   :  { %v3650_v21 = vpop.f32.mrb[90].mxu1 }
0x1786   :  { %v5639_v2 = vpop.f32.mrb[91].mxu1 }
0x178b   :  { %v3763_v19 = vpop.f32.mrb[92].mxu1 }
0x178c   :  { %3770 = vrot.lane.b32.xlu0 %v3763_v19, %s6429_s15  ;;  %v5650_v14 = vpop.f32.mrb[93].mxu1 }
0x178d   :  { %v3766_v10 = vpop.f32.mrb[94].mxu1 }
0x178e   :  { %v5651_v30 = vpop.f32.mrb[95].mxu1 }
0x1793   :  { %v3879_v56 = vpop.f32.mrb[96].mxu1 }
0x1794   :  { %3886 = vrot.lane.b32.xlu0 %v3879_v56, %s6431_s20  ;;  %v5662_v58 = vpop.f32.mrb[97].mxu1  ;;  %v5213_v56 = vld [vmem:[%s7631_s18] ss:$0 sm:$0xff] }
0x1795   :  { %v3882_v55 = vpop.f32.mrb[98].mxu1 }
0x1796   :  { %v5663_v24 = vpop.f32.mrb[99].mxu1 }
0x179b   :  { %v3992_v63 = vpop.f32.mrb[100].mxu1 }
0x179c   :  { %3998 = vst.msk [vmem:[#allocation2 + $0x8] sm:$0xff] %vm2970_vm7, %v3992_v63  ;;  %v5674_v0 = vpop.f32.mrb[101].mxu1 }
0x179d   :  { %v3995_v32 = vpop.f32.mrb[102].mxu1 }
0x179e   :  { %v5675_v22 = vpop.f32.mrb[103].mxu1 }
0x17a3   :  { %v4106_v23 = vpop.f32.mrb[104].mxu1 }
0x17a4   :  { %4113 = vrot.lane.b32.xlu1 %v4106_v23, %s7630_s5  ;;  %v5686_v27 = vpop.f32.mrb[105].mxu1 }
0x17a5   :  { %v4109_v5 = vpop.f32.mrb[106].mxu1 }
0x17a6   :  { %v5687_v6 = vpop.f32.mrb[107].mxu1 }
0x17ab   :  { %v4221_v57 = vpop.f32.mrb[108].mxu1 }
0x17ac   :  { %4228 = vrot.lane.b32.xlu1 %v4221_v57, %s6430_s27  ;;  %v5698_v8 = vpop.f32.mrb[109].mxu1 }
0x17ad   :  { %v4224_v9 = vpop.f32.mrb[110].mxu1 }
0x17ae   :  { %v5699_v35 = vpop.f32.mrb[111].mxu1 }
0x17b3   :  { %v4336_v11 = vpop.f32.mrb[112].mxu1 }
0x17b4   :  { %4343 = vrot.lane.b32.xlu1 %v4336_v11, %s6433_s10  ;;  %v5710_v15 = vpop.f32.mrb[113].mxu1 }
0x17b5   :  { %v4339_v16 = vpop.f32.mrb[114].mxu1 }
0x17b6   :  { %v5711_v18 = vpop.f32.mrb[115].mxu1 }
0x17c6   :  { %v4451_v36 = vpop.f32.mrb[116].mxu1 }
0x17c7   :  { %4458 = vrot.lane.b32.xlu1 %v4451_v36, %s6421_s8  ;;  %v5722_v47 = vpop.f32.mrb[117].mxu1 }
0x17c8   :  { %v4454_v54 = vpop.f32.mrb[118].mxu1 }
0x17c9   :  { %v5723_v26 = vpop.f32.mrb[119].mxu1 }
0x17ce   :  { %v4566_v52 = vpop.f32.mrb[120].mxu1 }
0x17cf   :  { %4573 = vrot.lane.b32.xlu1 %v4566_v52, %s6432_s22  ;;  %v5734_v50 = vpop.f32.mrb[121].mxu1 }
0x17d0   :  { %v4569_v29 = vpop.f32.mrb[122].mxu1 }
0x17d1   :  { %v5735_v49 = vpop.f32.mrb[123].mxu1 }
0x17d6   :  { %v3191_v53 = vpop.permute.xlu1 %3190  ;;  %v4681_v31 = vpop.f32.mrb[124].mxu1 }
0x17d7   :  { %3194 = vst.msk [vmem:[#allocation2] sm:$0xff] %vm3193_vm8, %v3191_v53  ;;  %4688 = vrot.lane.b32.xlu1 %v4681_v31, %s6429_s15  ;;  %v5746_v25 = vpop.f32.mrb[125].mxu1 }
0x17d8   :  { %v4684_v33 = vpop.f32.mrb[126].mxu1 }
0x17d9   :  { %v5747_v34 = vpop.f32.mrb[127].mxu1 }
0x17de   :  { %v3307_v51 = vpop.permute.xlu1 %3306  ;;  %v4796_v17 = vpop.f32.mrb[128].mxu1 }
0x17df   :  { %3310 = vst.msk [vmem:[#allocation2] sm:$0xff] %vm3309_vm9, %v3307_v51  ;;  %4803 = vrot.lane.b32.xlu1 %v4796_v17, %s6431_s20  ;;  %v5758_v38 = vpop.f32.mrb[129].mxu1 }
0x17e0   :  { %v4799_v39 = vpop.f32.mrb[130].mxu1 }
0x17e1   :  { %v5759_v4 = vpop.f32.mrb[131].mxu1 }
0x17e6   :  { %v3423_v60 = vpop.permute.xlu1 %3422 }
0x17e7   :  { %3426 = vst.msk [vmem:[#allocation2] sm:$0xff] %vm3425_vm10, %v3423_v60 }
0x17ee   :  { %v3539_v1 = vpop.permute.xlu0 %3538 }
0x17ef   :  { %3542 = vst.msk [vmem:[#allocation2] sm:$0xff] %vm3541_vm11, %v3539_v1 }
0x17f6   :  { %v3655_v59 = vpop.permute.xlu0 %3654 }
0x17f7   :  { %3658 = vst.msk [vmem:[#allocation2] sm:$0xff] %vm3657_vm12, %v3655_v59 }
0x17fe   :  { %v3771_v41 = vpop.permute.xlu0 %3770 }
0x17ff   :  { %3774 = vst.msk [vmem:[#allocation2] sm:$0xff] %vm3773_vm13, %v3771_v41 }
0x1806   :  { %v3887_v43 = vpop.permute.xlu0 %3886 }
0x1807   :  { %3890 = vst.msk [vmem:[#allocation2] sm:$0xff] %vm3889_vm14, %v3887_v43 }
0x180e   :  { %v4807_v19 = vld [vmem:[#allocation2] sm:$0xff] }
0x1816   :  { %v4114_v44 = vpop.permute.xlu1 %4113 }
0x1817   :  { %4116 = vst.msk [vmem:[#allocation2 + $0x8] sm:$0xff] %vm3193_vm8, %v4114_v44 }
0x181e   :  { %v4229_v45 = vpop.permute.xlu1 %4228 }
0x181f   :  { %4231 = vst.msk [vmem:[#allocation2 + $0x8] sm:$0xff] %vm3309_vm9, %v4229_v45 }
0x1826   :  { %v4344_v12 = vpop.permute.xlu1 %4343 }
0x1827   :  { %4346 = vst.msk [vmem:[#allocation2 + $0x8] sm:$0xff] %vm3425_vm10, %v4344_v12 }
0x1839   :  { %v4459_v37 = vpop.permute.xlu1 %4458 }
0x183a   :  { %4461 = vst.msk [vmem:[#allocation2 + $0x8] sm:$0xff] %vm3541_vm11, %v4459_v37 }
0x1841   :  { %v4574_v48 = vpop.permute.xlu1 %4573 }
0x1842   :  { %4576 = vst.msk [vmem:[#allocation2 + $0x8] sm:$0xff] %vm3657_vm12, %v4574_v48 }
0x1849   :  { %v4689_v21 = vpop.permute.xlu1 %4688 }
0x184a   :  { %4691 = vst.msk [vmem:[#allocation2 + $0x8] sm:$0xff] %vm3773_vm13, %v4689_v21 }
0x1851   :  { %v4804_v2 = vpop.permute.xlu1 %4803 }
0x1852   :  { %4806 = vst.msk [vmem:[#allocation2 + $0x8] sm:$0xff] %vm3889_vm14, %v4804_v2 }
0x1859   :  { %v4808_v14 = vld [vmem:[#allocation2 + $0x8] sm:$0xff] }
0x185a   :  { %v4825_v10 = vpack.c.bf16 %v4808_v14, %v4807_v19 }
0x185c   :  { %5777 = vmatmul.mubr.bf16.vlgmr.msra.gmra.mrb[104].mxu0 %v4825_v10 }
0x192f   :  { %v4908_v30 = vpop.f32.mrb[104].mxu0 }
0x1930   :  { %v4915_v58 = vadd.f32 %v4908_v30, %v7017_v61  ;;  %v5778_v55 = vpop.f32.mrb[105].mxu0 }
0x1931   :  { %v4911_v24 = vpop.f32.mrb[106].mxu0 }
0x1932   :  { %v4924_v63 = vadd.f32 %v5213_v56, %v4915_v58  ;;  %v4916_v0 = vadd.f32 %v4911_v24, %v7020_v62  ;;  %v5779_v32 = vpop.f32.mrb[107].mxu0 }
0x1934   :  { %v4925_v22 = vadd.f32 %v5213_v56, %v4916_v0  ;;  %4926 = vadd.xlane.f32.xlu0 %v4924_v63 }
0x1936   :  { %4928 = vadd.xlane.f32.xlu1 %v4925_v22 }
0x19c1   :  { %v4927_v23 = vpop.xlane.xlu0 %4926 }
0x19c2   :  { %v4930_v27 = vmul.f32 0.0078125, %v4927_v23 }
0x19c3   :  { %v4929_v5 = vpop.xlane.xlu1 %4928 }
0x19c4   :  { %v4932_v6 = vsub.f32 %v4924_v63, %v4930_v27  ;;  %v4931_v57 = vmul.f32 0.0078125, %v4929_v5 }
0x19c6   :  { %v4933_v8 = vsub.f32 %v4925_v22, %v4931_v57  ;;  %v4934_v9 = vmul.f32 %v4932_v6, %v4932_v6 }
0x19c8   :  { %4936 = vadd.xlane.f32.xlu0 %v4934_v9  ;;  %v4935_v35 = vmul.f32 %v4933_v8, %v4933_v8 }
0x19cc   :  { %4938 = vadd.xlane.f32.xlu0 %v4935_v35 }
0x19cd   :  { %6359 = shalt.err (!%p6356_p0)
}
0x19ce   :  { %s7632_s20 = sld [smem:[#allocation45_spill]] }
0x19d4   :  { %s6360_s22 = scalar_lea.hbm %s7632_s20, 256 }
0x19d5   :  { %p6361_p1 = scmp.ne.s32.totalorder %s7632_s20, %s6360_s22  ;;  %p6364_p2 = scmp.lt.u32.totalorder %s6360_s22, %s7632_s20 }
0x19d7   :  { %p6366_p3 = pnand %p6364_p2, %p6361_p1 }
0x19d9   :  { %6369 = shalt.err (!%p6366_p3)
}
0x19da   :  { %s7633_s4 = smov 8   ;;  %v6126_v7 = vld [vmem:[%s7577_s25] ss:$0 sm:$0xff]  ;;  %s6435_s12 = smov [#allocation21]  }
0x19db   :  { %4965 = dma.vmem_to_hbm [thread:$0]  %s4960_s0, 256, %s7632_s20, [#allocation5], %s7618_s11, %s7618_s11, %s7633_s4  }
0x19dc   :  { %v6127_v54 = vld [vmem:[%s7578_s26] ss:$0 sm:$0xff]  ;;  %s4971_s24 = sshll.u32 %s6435_s12, 4  ;;  %s4972_s24 = int_to_ptr.vmem [resolvable:$true] %s4971_s24 }
0x19dd   :  { %s6370_s13 = scalar_lea.vmem %s4972_s24, 256  ;;  %p6375_p5 = scmp.lt.s32.totalorder %s4972_s24, %s4972_s24 }
0x19de   :  { %p6371_p4 = scmp.ne.s32.totalorder %s4972_s24, %s6370_s13  ;;  %p6376_p6 = scmp.lt.s32.totalorder %s6370_s13, %s6370_s13 }
0x19e0   :  { %p6377_p7 = por %p6376_p6, %p6375_p5 }
0x19e2   :  { %p6378_p8 = pnand %p6377_p7, %p6371_p4 }
0x1a55   :  { %v4937_v61 = vpop.xlane.xlu0 %4936 }
0x1a56   :  { %v4940_v62 = vmul.f32 0.0078125, %v4937_v61 }
0x1a58   :  { %v4942_v11 = vadd.f32 1e-05, %v4940_v62 }
0x1a59   :  { %v4939_v15 = vpop.xlane.xlu0 %4938 }
0x1a5a   :  { %6120 = vrsqrt.f32 %v4942_v11  ;;  %v4941_v16 = vmul.f32 0.0078125, %v4939_v15 }
0x1a5c   :  { %v4943_v18 = vadd.f32 1e-05, %v4941_v16 }
0x1a5e   :  { %6122 = vrsqrt.f32 %v4943_v18 }
0x1a64   :  { %v6121_v28 = vpop.eup %6120 }
0x1a65   :  { %v4946_v20 = vmul.f32 %v6121_v28, %v4932_v6 }
0x1a67   :  { %v4948_v42 = vmul.f32 %v6126_v7, %v4946_v20 }
0x1a68   :  { %v6123_v36 = vpop.eup %6122 }
0x1a69   :  { %v4947_v47 = vmul.f32 %v6123_v36, %v4933_v8  ;;  %v4950_v26 = vadd.f32 %v6127_v54, %v4948_v42 }
0x1a6b   :  { %v4949_v13 = vmul.f32 %v6126_v7, %v4947_v47  ;;  %4952 = vst [vmem:[#allocation21] sm:$0xff] %v4950_v26 }
0x1a6d   :  { %v4951_v40 = vadd.f32 %v6127_v54, %v4949_v13 }
0x1a6f   :  { %4953 = vst [vmem:[#allocation21 + $0x8] sm:$0xff] %v4951_v40 }
0x1a70   :  { %6381 = shalt.err (!%p6378_p8)
}
0x1a71   :  { %s7634_s14 = sld [smem:[#allocation46_spill]] }
0x1a77   :  { %s6382_s16 = scalar_lea.hbm %s7634_s14, 256 }
0x1a78   :  { %p6383_p9 = scmp.ne.s32.totalorder %s7634_s14, %s6382_s16  ;;  %p6386_p10 = scmp.lt.u32.totalorder %s6382_s16, %s7634_s14 }
0x1a7a   :  { %p6388_p11 = pnand %p6386_p10, %p6383_p9 }
0x1a7c   :  { %6391 = shalt.err (!%p6388_p11)
}
0x1a7d   :  { %4977 = dma.vmem_to_hbm [thread:$0]  %s4972_s24, 256, %s7634_s14, [#allocation22], %s7618_s11, %s7618_s11, %s7633_s4  }
0x1a7e   :  { %6404 = dma.done.wait [#allocation5], 256  }
0x1a7f   :  { %6405 = vsyncadd [#allocation5], 4294967040 }
0x1a80   :  { %6406 = dma.done.wait [#allocation22], 256  }
0x1a81   :  { %6407 = vsyncadd [#allocation22], 4294967040 }
0x1a82   :  { %4984 = vsyncpa [#allocation4], 1 }
0x1a83   :  { %4985 = vsyncpa [#allocation7], 1 }
0x1a84   :  { %4986 = vsyncpa [#allocation10], 1 }
0x1a85   :  { %4987 = vsyncpa [#allocation13], 1 }
0x1a86   :  { %4988 = vsyncpa [#allocation16], 1 }
0x1a87   :  { %4989 = vsyncpa [#allocation19], 1 }
0x1a88   :  { %4990 = vsyncpa [#allocation5], 1 }
0x1a89   :  { %4991 = vsyncpa [#allocation22], 1 }

</bundles_post_ra>
